<compile_context>
chip_gen: v7x
topology: tpu7x:2x2x1
jax: 0.10.0
libtpu: 0.0.40
codegen_flags: <defaults>
</compile_context>

<pallas_src>
import math
import functools

import jax
import jax.numpy as jnp
from jax.experimental import pallas as pl
from jax.experimental.pallas import tpu as pltpu


# ----------------------------------------------------------------------------
# generation-dependent tuning knobs (safe fallbacks everywhere)
# ----------------------------------------------------------------------------

def _device_kind():
    try:
        return jax.devices()[0].device_kind.lower()
    except Exception:
        return ""

_KIND = _device_kind()
_BIG_VMEM = ("v5" in _KIND) or ("v6" in _KIND)          # 128 MiB VMEM chips
_ROW_CAP = 512 if _BIG_VMEM else 256                     # v7x: 64 MiB VMEM -> smaller tiles
_VMEM_LIMIT_BYTES = 96 * 1024 * 1024 if _BIG_VMEM else None


def _cparams(dims):
    if _VMEM_LIMIT_BYTES is None:
        return pltpu.CompilerParams(dimension_semantics=dims)
    return pltpu.CompilerParams(dimension_semantics=dims,
                                vmem_limit_bytes=_VMEM_LIMIT_BYTES)


# ----------------------------------------------------------------------------
# small helpers (Python-only; no captured jnp constants inside kernels)
# ----------------------------------------------------------------------------

def _sigmoid(x):
    return 1.0 / (1.0 + jnp.exp(-x))


def _gelu_tanh(x):
    # tanh-approx GELU (EUP-friendly). DistilBERT uses erf GELU; difference is tiny.
    return 0.5 * x * (1.0 + jnp.tanh(0.7978845608028654 * (x + 0.044715 * x * x * x)))


def _layernorm_f32(y, g, b, eps):
    mu = jnp.mean(y, axis=-1, keepdims=True)
    var = jnp.mean(jnp.square(y - mu), axis=-1, keepdims=True)
    return (y - mu) * jax.lax.rsqrt(var + eps) * g + b


def _pick_row_tile(m, cap=None):
    cap = _ROW_CAP if cap is None else cap
    return m if m <= cap else cap


def _pick_k_tile(k, cap=512):
    if k <= cap:
        return k
    t = cap
    while t >= 128:
        if k % t == 0:
            return t
        t //= 2
    return k   # fall back to un-tiled K (always correct)


def _pick_time_chunk(s):
    for t in (32, 16, 8):
        if s % t == 0:
            return t
    return s


# ----------------------------------------------------------------------------
# Pallas kernels
# ----------------------------------------------------------------------------

def _linear_kernel(fuse_ln, eps, *refs):
    """y = x @ w + b, optionally fused with  LN(y + res)  as epilogue.
    grid = (M_tiles, K_tiles); f32 accumulator scratch; bf16 MXU inputs."""
    if fuse_ln:
        x_ref, w_ref, b_ref, res_ref, g_ref, beta_ref, o_ref, acc_ref = refs
    else:
        x_ref, w_ref, b_ref, o_ref, acc_ref = refs

    k = pl.program_id(1)

    @pl.when(k == 0)
    def _():
        acc_ref[...] = jnp.zeros_like(acc_ref)

    acc_ref[...] += jnp.dot(x_ref[...].astype(jnp.bfloat16), w_ref[...],
                            preferred_element_type=jnp.float32)

    @pl.when(k == pl.num_programs(1) - 1)
    def _():
        y = acc_ref[...] + b_ref[...]
        if fuse_ln:
            y = y + res_ref[...].astype(jnp.float32)
            y = _layernorm_f32(y, g_ref[...], beta_ref[...], eps)
        o_ref[...] = y.astype(o_ref.dtype)


def _ffn_kernel(eps, x_ref, w1_ref, b1_ref, w2_ref, b2_ref, g_ref, beta_ref, o_ref):
    """LN( x + GELU(x@w1+b1) @ w2 + b2 ) for one row tile.
    TODO(synk): on v7x, if VMEM-pressured, split into a K-tiled two-kernel FFN
    (w1+GELU, then w2+residual+LN via _linear_kernel)."""
    xb = x_ref[...].astype(jnp.bfloat16)
    h = jnp.dot(xb, w1_ref[...], preferred_element_type=jnp.float32) + b1_ref[...]
    h = _gelu_tanh(h)
    y = jnp.dot(h.astype(jnp.bfloat16), w2_ref[...],
                preferred_element_type=jnp.float32) + b2_ref[...]
    y = y + x_ref[...].astype(jnp.float32)
    o_ref[...] = _layernorm_f32(y, g_ref[...], beta_ref[...], eps).astype(o_ref.dtype)


def _layernorm_kernel(eps, x_ref, g_ref, b_ref, o_ref):
    x = x_ref[...].astype(jnp.float32)
    o_ref[...] = _layernorm_f32(x, g_ref[...], b_ref[...], eps).astype(o_ref.dtype)


def _mha_kernel(scale, D, dh, n_heads, qkv_ref, m_ref, o_ref):
    """One batch element per program. qkv_ref holds that batch's [S, 3D] fused-QKV slab;
    heads are processed in a static loop and the full lane-dense [S, D] context block is
    stored once (no XLA transposes on either side).
    TODO(synk): for long sequences convert to a flash-style KV grid axis w/ online softmax."""
    mask = m_ref[0]                                              # [1, S] f32
    outs = []
    for h in range(n_heads):
        q = qkv_ref[:, h * dh:(h + 1) * dh]                      # [S, dh] bf16
        k = qkv_ref[:, D + h * dh: D + (h + 1) * dh]
        v = qkv_ref[:, 2 * D + h * dh: 2 * D + (h + 1) * dh]
        s = jax.lax.dot_general(q, k, (((1,), (1,)), ((), ())),
                                preferred_element_type=jnp.float32) * scale   # [S, S] f32
        s = jnp.where(mask > 0.0, s, -1e9)                       # mask keys (HF semantics)
        s = s - jnp.max(s, axis=-1, keepdims=True)
        p = jnp.exp(s)
        p = p / jnp.sum(p, axis=-1, keepdims=True)
        outs.append(jnp.dot(p.astype(jnp.bfloat16), v, preferred_element_type=jnp.float32))
    o_ref[...] = jnp.concatenate(outs, axis=-1).astype(o_ref.dtype)


def _lstm_fwd_kernel(H, T, xg_ref, whh_ref, hN_ref, h_scr, c_scr):
    """Forward-direction LSTM: each grid step consumes a [B, T, 4H] time chunk and runs
    T cell steps in an unrolled loop; only the final h is emitted.
    TODO(synk): on v7x, add a leading parallel batch axis to split the recurrence
    across the two TensorCores."""
    tc = pl.program_id(0)

    @pl.when(tc == 0)
    def _():
        h_scr[...] = jnp.zeros_like(h_scr)
        c_scr[...] = jnp.zeros_like(c_scr)

    h = h_scr[...]
    c = c_scr[...]
    whh = whh_ref[...]
    xg = xg_ref[...]                                             # [B, T, 4H] f32

    for j in range(T):                                           # static unrolled loop
        gates = xg[:, j, :] + jnp.dot(h.astype(jnp.bfloat16), whh,
                                      preferred_element_type=jnp.float32)   # [B, 4H]
        i = _sigmoid(gates[:, 0 * H:1 * H])
        f = _sigmoid(gates[:, 1 * H:2 * H])
        g = jnp.tanh(gates[:, 2 * H:3 * H])
        o = _sigmoid(gates[:, 3 * H:4 * H])
        c = f * c + i * g
        h = o * jnp.tanh(c)

    h_scr[...] = h
    c_scr[...] = c

    @pl.when(tc == pl.num_programs(0) - 1)
    def _():
        hN_ref[...] = h


def _head_kernel(H, xl_ref, hf_ref, wih_ref, bias_ref, fcw_ref, fcb_ref, o_ref):
    """Backward-direction LSTM contribution at t = S-1 (one cell step from zero state),
    fused with the final Linear classifier.  Dropout is identity in eval mode."""
    gates = jnp.dot(xl_ref[...].astype(jnp.bfloat16), wih_ref[...],
                    preferred_element_type=jnp.float32) + bias_ref[...]   # [B, 4H]
    i = _sigmoid(gates[:, 0 * H:1 * H])
    g = jnp.tanh(gates[:, 2 * H:3 * H])
    o = _sigmoid(gates[:, 3 * H:4 * H])
    c = i * g                          # f * c_prev vanishes (c_prev = 0)
    h_bwd = o * jnp.tanh(c)            # [B, H]
    h_fwd = hf_ref[...]                # [B, H]
    logits = (jnp.dot(h_fwd.astype(jnp.bfloat16), fcw_ref[0:H, :],
                      preferred_element_type=jnp.float32)
              + jnp.dot(h_bwd.astype(jnp.bfloat16), fcw_ref[H:2 * H, :],
                        preferred_element_type=jnp.float32)
              + fcb_ref[...])
    o_ref[...] = logits.astype(o_ref.dtype)


# ----------------------------------------------------------------------------
# pallas_call wrappers
# ----------------------------------------------------------------------------

def linear(x, w, b, out_dtype=jnp.float32):
    """x: [M, K] @ w(bf16): [K, N] + b: [N]; tiled over (M, K)."""
    M, K = x.shape
    N = w.shape[1]
    tm = _pick_row_tile(M)
    tk = _pick_k_tile(K)
    return pl.pallas_call(
        functools.partial(_linear_kernel, False, 0.0),
        out_shape=jax.ShapeDtypeStruct((M, N), out_dtype),
        grid=(pl.cdiv(M, tm), K // tk),
        in_specs=[pl.BlockSpec((tm, tk), lambda i, k: (i, k)),
                  pl.BlockSpec((tk, N), lambda i, k: (k, 0)),
                  pl.BlockSpec((1, N), lambda i, k: (0, 0))],
        out_specs=pl.BlockSpec((tm, N), lambda i, k: (i, 0)),
        scratch_shapes=[pltpu.VMEM((tm, N), jnp.float32)],
        compiler_params=_cparams(("parallel", "arbitrary")),
    )(x, w, b.reshape(1, N))


def linear_ln(x, w, b, res, gamma, beta, eps=1e-12):
    """LN( (x @ w + b) + res ); residual + LayerNorm fused into the matmul epilogue.
    Emits bf16 activations (LN math is f32 inside)."""
    M, K = x.shape
    N = w.shape[1]
    tm = _pick_row_tile(M)
    tk = _pick_k_tile(K)
    return pl.pallas_call(
        functools.partial(_linear_kernel, True, float(eps)),
        out_shape=jax.ShapeDtypeStruct((M, N), jnp.bfloat16),
        grid=(pl.cdiv(M, tm), K // tk),
        in_specs=[pl.BlockSpec((tm, tk), lambda i, k: (i, k)),
                  pl.BlockSpec((tk, N), lambda i, k: (k, 0)),
                  pl.BlockSpec((1, N), lambda i, k: (0, 0)),
                  pl.BlockSpec((tm, N), lambda i, k: (i, 0)),
                  pl.BlockSpec((1, N), lambda i, k: (0, 0)),
                  pl.BlockSpec((1, N), lambda i, k: (0, 0))],
        out_specs=pl.BlockSpec((tm, N), lambda i, k: (i, 0)),
        scratch_shapes=[pltpu.VMEM((tm, N), jnp.float32)],
        compiler_params=_cparams(("parallel", "arbitrary")),
    )(x, w, b.reshape(1, N), res, gamma.reshape(1, N), beta.reshape(1, N))


def ffn_ln(x, w1, b1, w2, b2, gamma, beta, eps=1e-12):
    """LN( x + GELU(x@w1+b1)@w2 + b2 ) in one kernel, tiled over rows; bf16 out."""
    M, D = x.shape
    F = w1.shape[1]
    tm = _pick_row_tile(M)
    return pl.pallas_call(
        functools.partial(_ffn_kernel, float(eps)),
        out_shape=jax.ShapeDtypeStruct((M, D), jnp.bfloat16),
        grid=(pl.cdiv(M, tm),),
        in_specs=[pl.BlockSpec((tm, D), lambda i: (i, 0)),
                  pl.BlockSpec((D, F), lambda i: (0, 0)),
                  pl.BlockSpec((1, F), lambda i: (0, 0)),
                  pl.BlockSpec((F, D), lambda i: (0, 0)),
                  pl.BlockSpec((1, D), lambda i: (0, 0)),
                  pl.BlockSpec((1, D), lambda i: (0, 0)),
                  pl.BlockSpec((1, D), lambda i: (0, 0))],
        out_specs=pl.BlockSpec((tm, D), lambda i: (i, 0)),
        compiler_params=_cparams(("parallel",)),
    )(x, w1, b1.reshape(1, F), w2, b2.reshape(1, D),
      gamma.reshape(1, D), beta.reshape(1, D))


def layernorm(x, gamma, beta, eps=1e-12):
    M, D = x.shape
    tm = _pick_row_tile(M)
    return pl.pallas_call(
        functools.partial(_layernorm_kernel, float(eps)),
        out_shape=jax.ShapeDtypeStruct((M, D), jnp.bfloat16),
        grid=(pl.cdiv(M, tm),),
        in_specs=[pl.BlockSpec((tm, D), lambda i: (i, 0)),
                  pl.BlockSpec((1, D), lambda i: (0, 0)),
                  pl.BlockSpec((1, D), lambda i: (0, 0))],
        out_specs=pl.BlockSpec((tm, D), lambda i: (i, 0)),
        compiler_params=_cparams(("parallel",)),
    )(x, gamma.reshape(1, D), beta.reshape(1, D))


def mha_attention(qkv, mask3, B, S, D, n_heads):
    """qkv: [B*S, 3D] bf16 (fused projection output, untouched by XLA); mask3: [B,1,S].
    One program per batch element; heads sliced inside the kernel; output written
    directly in [B*S, D] layout (lane-dense full-D store, no transposes)."""
    dh = D // n_heads
    scale = 1.0 / math.sqrt(dh)
    return pl.pallas_call(
        functools.partial(_mha_kernel, scale, D, dh, n_heads),
        out_shape=jax.ShapeDtypeStruct((B * S, D), jnp.bfloat16),
        grid=(B,),
        in_specs=[pl.BlockSpec((S, 3 * D), lambda b: (b, 0)),
                  pl.BlockSpec((1, 1, S), lambda b: (b, 0, 0))],
        out_specs=pl.BlockSpec((S, D), lambda b: (b, 0)),
        compiler_params=_cparams(("parallel",)),
    )(qkv, mask3)


def lstm_forward_last(xg, whh_T, H, B, S):
    """xg: [B*S, 4H] f32 (precomputed x@Wih^T + bias) viewed as [B, S, 4H] (batch-major,
    no HBM transpose); whh_T: [H, 4H] bf16.  Returns h_{S-1} : [B, H]."""
    G = 4 * H
    xg3 = xg.reshape(B, S, G)                    # free reshape (leading-dim split)
    T = _pick_time_chunk(S)
    return pl.pallas_call(
        functools.partial(_lstm_fwd_kernel, H, T),
        out_shape=jax.ShapeDtypeStruct((B, H), jnp.float32),
        grid=(S // T,),
        in_specs=[pl.BlockSpec((B, T, G), lambda t: (0, t, 0)),
                  pl.BlockSpec((H, G), lambda t: (0, 0))],
        out_specs=pl.BlockSpec((B, H), lambda t: (0, 0)),
        scratch_shapes=[pltpu.VMEM((B, H), jnp.float32),
                        pltpu.VMEM((B, H), jnp.float32)],
        compiler_params=pltpu.CompilerParams(dimension_semantics=("arbitrary",)),
    )(xg3, whh_T)


def bilstm_head(x_last, h_fwd, w_ih_b_T, b_b, fc_w, fc_b, H):
    """Single fused kernel: backward-direction cell at t=S-1 + concat + Linear head.
    TODO(synk): pad B to a multiple of 8 in production to fill vreg sublanes."""
    B, _ = x_last.shape
    C = fc_w.shape[1]
    G = 4 * H
    return pl.pallas_call(
        functools.partial(_head_kernel, H),
        out_shape=jax.ShapeDtypeStruct((B, C), jnp.float32),
        in_specs=[pl.BlockSpec(memory_space=pltpu.MemorySpace.VMEM)] * 6,
        out_specs=pl.BlockSpec(memory_space=pltpu.MemorySpace.VMEM),
    )(x_last, h_fwd, w_ih_b_T, b_b.reshape(1, G), fc_w, fc_b.reshape(1, C))


# ----------------------------------------------------------------------------
# Model forward (glue in plain JAX, hot paths in Pallas)
# ----------------------------------------------------------------------------

def transformer_bilstm_forward(params, input_ids, attention_mask, cfg):
    B, S = input_ids.shape
    D = cfg["d_model"]
    nh = cfg["n_heads"]
    H = cfg["lstm_hidden"]

    # --- DistilBERT-style embeddings ---
    x = params["word_emb"][input_ids] + params["pos_emb"][:S][None, :, :]
    x2 = layernorm(x.reshape(B * S, D).astype(jnp.float32),
                   params["emb_ln_g"], params["emb_ln_b"])          # bf16 [B*S, D]

    mask3 = attention_mask.reshape(B, 1, S).astype(jnp.float32)

    # --- transformer encoder layers: 4 fused pallas_calls each, bf16 activations ---
    for layer in params["layers"]:
        qkv = linear(x2, layer["w_qkv"], layer["b_qkv"], out_dtype=jnp.bfloat16)  # [B*S, 3D]
        ctx = mha_attention(qkv, mask3, B, S, D, nh)                              # [B*S, D]
        x2 = linear_ln(ctx, layer["wo"], layer["bo"],
                       x2, layer["sa_ln_g"], layer["sa_ln_b"])                    # attn out + LN
        x2 = ffn_ln(x2, layer["w1"], layer["b1"], layer["w2"], layer["b2"],
                    layer["out_ln_g"], layer["out_ln_b"])                         # FFN + LN

    hidden = x2                                                  # [B*S, D] bf16 == last_hidden_state

    # --- BiLSTM, exploiting that only lstm_out[:, -1, :] is used ---
    lp = params["lstm"]
    xg = linear(hidden, lp["w_ih_f_T"], lp["b_f"])               # [B*S, 4H] gate preact (f32)
    h_fwd = lstm_forward_last(xg, lp["w_hh_f_T"], H, B, S)       # forward dir, final h only

    x_last = hidden.reshape(B, S, D)[:, -1, :]                   # [B, D]
    # TODO(synk): nn.Dropout is identity in eval mode; training-mode stochastic dropout not implemented.
    logits = bilstm_head(x_last, h_fwd, lp["w_ih_b_T"], lp["b_b"],
                         params["fc_w"], params["fc_b"], H)      # backward cell + fc, fused
    return logits


# ----------------------------------------------------------------------------
# Deterministic synthetic parameters (+ packing to kernel-ready layout)
# ----------------------------------------------------------------------------

def init_params(key, cfg):
    D, F, H = cfg["d_model"], cfg["ffn"], cfg["lstm_hidden"]
    keys = iter(jax.random.split(key, 256))

    def nrm(shape, s=0.02):
        return s * jax.random.normal(next(keys), shape, jnp.float32)

    def uni(shape, a):
        return jax.random.uniform(next(keys), shape, jnp.float32, -a, a)

    p = {
        "word_emb": nrm((cfg["vocab"], D)),
        "pos_emb": nrm((cfg["max_pos"], D)),
        "emb_ln_g": jnp.ones((D,), jnp.float32),
        "emb_ln_b": jnp.zeros((D,), jnp.float32),
        "layers": [],
    }
    for _ in range(cfg["n_layers"]):
        p["layers"].append({
            "wq": nrm((D, D)), "bq": jnp.zeros((D,), jnp.float32),
            "wk": nrm((D, D)), "bk": jnp.zeros((D,), jnp.float32),
            "wv": nrm((D, D)), "bv": jnp.zeros((D,), jnp.float32),
            "wo": nrm((D, D)), "bo": jnp.zeros((D,), jnp.float32),
            "sa_ln_g": jnp.ones((D,), jnp.float32), "sa_ln_b": jnp.zeros((D,), jnp.float32),
            "w1": nrm((D, F)), "b1": jnp.zeros((F,), jnp.float32),
            "w2": nrm((F, D)), "b2": jnp.zeros((D,), jnp.float32),
            "out_ln_g": jnp.ones((D,), jnp.float32), "out_ln_b": jnp.zeros((D,), jnp.float32),
        })

    a = 1.0 / math.sqrt(H)
    p["lstm"] = {}
    for d in ("f", "b"):
        p["lstm"][f"w_ih_{d}"] = uni((4 * H, D), a)   # PyTorch layout [4H, D], gates i,f,g,o
        p["lstm"][f"w_hh_{d}"] = uni((4 * H, H), a)
        p["lstm"][f"b_ih_{d}"] = uni((4 * H,), a)
        p["lstm"][f"b_hh_{d}"] = uni((4 * H,), a)

    a2 = 1.0 / math.sqrt(2 * H)
    p["fc_w"] = uni((2 * H, cfg["num_classes"]), a2)
    p["fc_b"] = uni((cfg["num_classes"],), a2)
    return p


def pack_params(p):
    """Fuse QKV weights, transpose LSTM weights, cast matmul weights to bf16."""
    bf = lambda a: a.astype(jnp.bfloat16)
    layers = []
    for l in p["layers"]:
        layers.append({
            "w_qkv": bf(jnp.concatenate([l["wq"], l["wk"], l["wv"]], axis=1)),
            "b_qkv": jnp.concatenate([l["bq"], l["bk"], l["bv"]]),
            "wo": bf(l["wo"]), "bo": l["bo"],
            "sa_ln_g": l["sa_ln_g"], "sa_ln_b": l["sa_ln_b"],
            "w1": bf(l["w1"]), "b1": l["b1"],
            "w2": bf(l["w2"]), "b2": l["b2"],
            "out_ln_g": l["out_ln_g"], "out_ln_b": l["out_ln_b"],
        })
    lstm = {
        "w_ih_f_T": bf(p["lstm"]["w_ih_f"].T),          # [D, 4H]
        "w_hh_f_T": bf(p["lstm"]["w_hh_f"].T),          # [H, 4H]
        "b_f": p["lstm"]["b_ih_f"] + p["lstm"]["b_hh_f"],
        "w_ih_b_T": bf(p["lstm"]["w_ih_b"].T),          # [D, 4H]
        "b_b": p["lstm"]["b_ih_b"] + p["lstm"]["b_hh_b"],
    }
    return {
        "word_emb": p["word_emb"], "pos_emb": p["pos_emb"],
        "emb_ln_g": p["emb_ln_g"], "emb_ln_b": p["emb_ln_b"],
        "layers": layers, "lstm": lstm,
        "fc_w": bf(p["fc_w"]), "fc_b": p["fc_b"],
    }


# ----------------------------------------------------------------------------

if __name__ == "__main__":
    cfg = dict(vocab=100, max_pos=16, d_model=64, n_heads=4, n_layers=2,
               ffn=128, lstm_hidden=32, num_classes=2)

    key = jax.random.PRNGKey(0)
    k_params, k_ids = jax.random.split(key)
    params = pack_params(init_params(k_params, cfg))

    B, S = 2, 8
    input_ids = jax.random.randint(k_ids, (B, S), 0, cfg["vocab"])
    attention_mask = jnp.ones((B, S), jnp.float32).at[1, 6:].set(0.0)

    @jax.jit
    def run(p, ids, mask):
        return transformer_bilstm_forward(p, ids, mask, cfg)

    logits = run(params, input_ids, attention_mask)
    jax.block_until_ready(logits)
    assert logits.shape == (B, cfg["num_classes"])
    print("KERNEL_OK")
</pallas_src>

<mosaic_0001>
module attributes {stable_mosaic.version = 11 : i64} {
  func.func @_layernorm_kernel(%arg0: i32, %arg1: memref<16x64xf32, #tpu.memory_space<vmem>>, %arg2: memref<1x64xf32, #tpu.memory_space<vmem>>, %arg3: memref<1x64xf32, #tpu.memory_space<vmem>>, %arg4: memref<16x64xbf16, #tpu.memory_space<vmem>>) attributes {dimension_semantics = [#tpu.dimension_semantics<parallel>], iteration_bounds = array<i64: 1>, scalar_prefetch = 0 : i64, scratch_operands = 0 : i64, tpu.core_type = #tpu.core_type<tc>, window_params = [{transform_indices = @transform_0, window_bounds = array<i64: 16, 64>}, {pipeline_mode = #tpu.pipeline_mode<synchronous>, transform_indices = @transform_1, window_bounds = array<i64: 1, 64>}, {pipeline_mode = #tpu.pipeline_mode<synchronous>, transform_indices = @transform_2, window_bounds = array<i64: 1, 64>}, {transform_indices = @transform_3, window_bounds = array<i64: 16, 64>}]} {
    %c0 = arith.constant 0 : index
    %c0_0 = arith.constant 0 : index
    %0 = vector.load %arg1[%c0, %c0_0] : memref<16x64xf32, #tpu.memory_space<vmem>>, vector<16x64xf32>
    %c0_1 = arith.constant 0 : index
    %c0_2 = arith.constant 0 : index
    %1 = vector.load %arg2[%c0_1, %c0_2] : memref<1x64xf32, #tpu.memory_space<vmem>>, vector<1x64xf32>
    %c0_3 = arith.constant 0 : index
    %c0_4 = arith.constant 0 : index
    %2 = vector.load %arg3[%c0_3, %c0_4] : memref<1x64xf32, #tpu.memory_space<vmem>>, vector<1x64xf32>
    %cst = arith.constant dense<0.000000e+00> : vector<16xf32>
    %3 = vector.multi_reduction <add>, %0, %cst [1] : vector<16x64xf32> to vector<16xf32>
    %4 = vector.shape_cast %3 : vector<16xf32> to vector<16x1xf32>
    %cst_5 = arith.constant 6.400000e+01 : f32
    %5 = vector.broadcast %cst_5 : f32 to vector<16x1xf32>
    %6 = arith.divf %4, %5 : vector<16x1xf32>
    %7 = vector.broadcast %6 : vector<16x1xf32> to vector<16x64xf32>
    %8 = arith.subf %0, %7 : vector<16x64xf32>
    %9 = arith.mulf %8, %8 : vector<16x64xf32>
    %cst_6 = arith.constant dense<0.000000e+00> : vector<16xf32>
    %10 = vector.multi_reduction <add>, %9, %cst_6 [1] : vector<16x64xf32> to vector<16xf32>
    %11 = vector.shape_cast %10 : vector<16xf32> to vector<16x1xf32>
    %cst_7 = arith.constant 6.400000e+01 : f32
    %12 = vector.broadcast %cst_7 : f32 to vector<16x1xf32>
    %13 = arith.divf %11, %12 : vector<16x1xf32>
    %14 = vector.broadcast %6 : vector<16x1xf32> to vector<16x64xf32>
    %15 = arith.subf %0, %14 : vector<16x64xf32>
    %cst_8 = arith.constant 9.99999996E-13 : f32
    %16 = vector.broadcast %cst_8 : f32 to vector<16x1xf32>
    %17 = arith.addf %13, %16 : vector<16x1xf32>
    %18 = math.rsqrt %17 : vector<16x1xf32>
    %19 = vector.broadcast %18 : vector<16x1xf32> to vector<16x64xf32>
    %20 = arith.mulf %15, %19 : vector<16x64xf32>
    %21 = vector.broadcast %1 : vector<1x64xf32> to vector<16x64xf32>
    %22 = arith.mulf %20, %21 : vector<16x64xf32>
    %23 = vector.broadcast %2 : vector<1x64xf32> to vector<16x64xf32>
    %24 = arith.addf %22, %23 : vector<16x64xf32>
    %25 = arith.truncf %24 : vector<16x64xf32> to vector<16x64xbf16>
    %c0_9 = arith.constant 0 : index
    %c0_10 = arith.constant 0 : index
    %26 = vector.load %arg4[%c0_9, %c0_10] : memref<16x64xbf16, #tpu.memory_space<vmem>>, vector<16x64xbf16>
    tpu.vector_store %arg4[%c0_9, %c0_10], %25 {strides = array<i32>} : memref<16x64xbf16, #tpu.memory_space<vmem>>, vector<16x64xbf16>,
    return
  }
  func.func @transform_0(%arg0: i32) -> (i32, i32) {
    %c0_i32 = arith.constant 0 : i32
    %c0_i32_0 = arith.constant 0 : i32
    return %arg0, %c0_i32 : i32, i32
  }
  func.func @transform_1(%arg0: i32) -> (i32, i32) {
    %c0_i32 = arith.constant 0 : i32
    %c0_i32_0 = arith.constant 0 : i32
    %c0_i32_1 = arith.constant 0 : i32
    return %c0_i32, %c0_i32_0 : i32, i32
  }
  func.func @transform_2(%arg0: i32) -> (i32, i32) {
    %c0_i32 = arith.constant 0 : i32
    %c0_i32_0 = arith.constant 0 : i32
    %c0_i32_1 = arith.constant 0 : i32
    return %c0_i32, %c0_i32_0 : i32, i32
  }
  func.func @transform_3(%arg0: i32) -> (i32, i32) {
    %c0_i32 = arith.constant 0 : i32
    %c0_i32_0 = arith.constant 0 : i32
    return %arg0, %c0_i32 : i32, i32
  }
}

module attributes {stable_mosaic.version = 11 : i64} {
  func.func @_linear_kernel(%arg0: i32, %arg1: i32, %arg2: memref<16x64xbf16, #tpu.memory_space<vmem>>, %arg3: memref<64x192xbf16, #tpu.memory_space<vmem>>, %arg4: memref<1x192xf32, #tpu.memory_space<vmem>>, %arg5: memref<16x192xbf16, #tpu.memory_space<vmem>>, %arg6: memref<16x192xf32, #tpu.memory_space<vmem>>) attributes {dimension_semantics = [#tpu.dimension_semantics<parallel>, #tpu.dimension_semantics<arbitrary>], iteration_bounds = array<i64: 1, 1>, scalar_prefetch = 0 : i64, scratch_operands = 1 : i64, tpu.core_type = #tpu.core_type<tc>, window_params = [{transform_indices = @transform_0, window_bounds = array<i64: 16, 64>}, {transform_indices = @transform_1, window_bounds = array<i64: 64, 192>}, {pipeline_mode = #tpu.pipeline_mode<synchronous>, transform_indices = @transform_2, window_bounds = array<i64: 1, 192>}, {transform_indices = @transform_3, window_bounds = array<i64: 16, 192>}]} {
    %c0_i32 = arith.constant 0 : i32
    %0 = arith.cmpi eq, %arg1, %c0_i32 : i32
    %1 = arith.extui %0 : i1 to i32
    %c0_i32_0 = arith.constant 0 : i32
    %2 = arith.cmpi ne, %1, %c0_i32_0 : i32
    scf.if %2 {
      %cst_10 = arith.constant 0.000000e+00 : f32
      %12 = vector.broadcast %cst_10 : f32 to vector<16x192xf32>
      %c0_11 = arith.constant 0 : index
      %c0_12 = arith.constant 0 : index
      %13 = vector.load %arg6[%c0_11, %c0_12] : memref<16x192xf32, #tpu.memory_space<vmem>>, vector<16x192xf32>
      tpu.vector_store %arg6[%c0_11, %c0_12], %12 {strides = array<i32>} : memref<16x192xf32, #tpu.memory_space<vmem>>, vector<16x192xf32>,
    } else {
    }
    %c0 = arith.constant 0 : index
    %c0_1 = arith.constant 0 : index
    %3 = vector.load %arg6[%c0, %c0_1] : memref<16x192xf32, #tpu.memory_space<vmem>>, vector<16x192xf32>
    %c0_2 = arith.constant 0 : index
    %c0_3 = arith.constant 0 : index
    %4 = vector.load %arg2[%c0_2, %c0_3] : memref<16x64xbf16, #tpu.memory_space<vmem>>, vector<16x64xbf16>
    %c0_4 = arith.constant 0 : index
    %c0_5 = arith.constant 0 : index
    %5 = vector.load %arg3[%c0_4, %c0_5] : memref<64x192xbf16, #tpu.memory_space<vmem>>, vector<64x192xbf16>
    %cst = arith.constant dense<0.000000e+00> : vector<16x192xf32>
    %6 = tpu.matmul %4, %5, %cst {dimension_numbers = #tpu.dot_dimension_numbers<[1], [0], [0], [1], [0, 0, 1, 1], [], []>} : vector<16x64xbf16>, vector<64x192xbf16>, vector<16x192xf32> -> vector<16x192xf32>
    %7 = arith.addf %3, %6 : vector<16x192xf32>
    %c0_6 = arith.constant 0 : index
    %c0_7 = arith.constant 0 : index
    %8 = vector.load %arg6[%c0_6, %c0_7] : memref<16x192xf32, #tpu.memory_space<vmem>>, vector<16x192xf32>
    tpu.vector_store %arg6[%c0_6, %c0_7], %7 {strides = array<i32>} : memref<16x192xf32, #tpu.memory_space<vmem>>, vector<16x192xf32>,
    %c0_i32_8 = arith.constant 0 : i32
    %9 = arith.cmpi eq, %arg1, %c0_i32_8 : i32
    %10 = arith.extui %9 : i1 to i32
    %c0_i32_9 = arith.constant 0 : i32
    %11 = arith.cmpi ne, %10, %c0_i32_9 : i32
    scf.if %11 {
      %c0_10 = arith.constant 0 : index
      %c0_11 = arith.constant 0 : index
      %12 = vector.load %arg6[%c0_10, %c0_11] : memref<16x192xf32, #tpu.memory_space<vmem>>, vector<16x192xf32>
      %c0_12 = arith.constant 0 : index
      %c0_13 = arith.constant 0 : index
      %13 = vector.load %arg4[%c0_12, %c0_13] : memref<1x192xf32, #tpu.memory_space<vmem>>, vector<1x192xf32>
      %14 = vector.broadcast %13 : vector<1x192xf32> to vector<16x192xf32>
      %15 = arith.addf %12, %14 : vector<16x192xf32>
      %16 = arith.truncf %15 : vector<16x192xf32> to vector<16x192xbf16>
      %c0_14 = arith.constant 0 : index
      %c0_15 = arith.constant 0 : index
      %17 = vector.load %arg5[%c0_14, %c0_15] : memref<16x192xbf16, #tpu.memory_space<vmem>>, vector<16x192xbf16>
      tpu.vector_store %arg5[%c0_14, %c0_15], %16 {strides = array<i32>} : memref<16x192xbf16, #tpu.memory_space<vmem>>, vector<16x192xbf16>,
    } else {
    }
    return
  }
  func.func @transform_0(%arg0: i32, %arg1: i32) -> (i32, i32) {
    %c0_i32 = arith.constant 0 : i32
    return %arg0, %arg1 : i32, i32
  }
  func.func @transform_1(%arg0: i32, %arg1: i32) -> (i32, i32) {
    %c0_i32 = arith.constant 0 : i32
    %c0_i32_0 = arith.constant 0 : i32
    return %arg1, %c0_i32 : i32, i32
  }
  func.func @transform_2(%arg0: i32, %arg1: i32) -> (i32, i32) {
    %c0_i32 = arith.constant 0 : i32
    %c0_i32_0 = arith.constant 0 : i32
    %c0_i32_1 = arith.constant 0 : i32
    return %c0_i32, %c0_i32_0 : i32, i32
  }
  func.func @transform_3(%arg0: i32, %arg1: i32) -> (i32, i32) {
    %c0_i32 = arith.constant 0 : i32
    %c0_i32_0 = arith.constant 0 : i32
    return %arg0, %c0_i32 : i32, i32
  }
}

module attributes {stable_mosaic.version = 11 : i64} {
  func.func @_mha_kernel(%arg0: i32, %arg1: memref<8x192xbf16, #tpu.memory_space<vmem>>, %arg2: memref<1x1x8xf32, #tpu.memory_space<vmem>>, %arg3: memref<8x64xbf16, #tpu.memory_space<vmem>>) attributes {dimension_semantics = [#tpu.dimension_semantics<parallel>], iteration_bounds = array<i64: 2>, scalar_prefetch = 0 : i64, scratch_operands = 0 : i64, tpu.core_type = #tpu.core_type<tc>, window_params = [{transform_indices = @transform_0, window_bounds = array<i64: 8, 192>}, {transform_indices = @transform_1, window_bounds = array<i64: 1, 1, 8>}, {transform_indices = @transform_2, window_bounds = array<i64: 8, 64>}]} {
    %c0 = arith.constant 0 : index
    %c0_0 = arith.constant 0 : index
    %c0_1 = arith.constant 0 : index
    %0 = vector.load %arg2[%c0, %c0_0, %c0_1] : memref<1x1x8xf32, #tpu.memory_space<vmem>>, vector<1x1x8xf32>
    %1 = vector.shape_cast %0 : vector<1x1x8xf32> to vector<1x8xf32>
    %c0_2 = arith.constant 0 : index
    %c0_3 = arith.constant 0 : index
    %2 = vector.load %arg1[%c0_2, %c0_3] : memref<8x192xbf16, #tpu.memory_space<vmem>>, vector<8x16xbf16>
    %c0_4 = arith.constant 0 : index
    %c64 = arith.constant 64 : index
    %3 = vector.load %arg1[%c0_4, %c64] : memref<8x192xbf16, #tpu.memory_space<vmem>>, vector<8x16xbf16>
    %c0_5 = arith.constant 0 : index
    %c128 = arith.constant 128 : index
    %4 = vector.load %arg1[%c0_5, %c128] : memref<8x192xbf16, #tpu.memory_space<vmem>>, vector<8x16xbf16>
    %cst = arith.constant dense<0.000000e+00> : vector<8x8xf32>
    %5 = tpu.matmul %2, %3, %cst {dimension_numbers = #tpu.dot_dimension_numbers<[1], [1], [0], [0], [0, 0, 1, 0], [], []>} : vector<8x16xbf16>, vector<8x16xbf16>, vector<8x8xf32> -> vector<8x8xf32>
    %cst_6 = arith.constant 2.500000e-01 : f32
    %6 = vector.broadcast %cst_6 : f32 to vector<8x8xf32>
    %7 = arith.mulf %5, %6 : vector<8x8xf32>
    %cst_7 = arith.constant 0.000000e+00 : f32
    %8 = vector.broadcast %cst_7 : f32 to vector<1x8xf32>
    %9 = arith.cmpf ogt, %1, %8 : vector<1x8xf32>
    %cst_8 = arith.constant -1.000000e+09 : f32
    %10 = vector.shape_cast %9 : vector<1x8xi1> to vector<1x8xi1>
    %11 = vector.broadcast %10 : vector<1x8xi1> to vector<8x8xi1>
    %12 = vector.broadcast %cst_8 : f32 to vector<8x8xf32>
    %13 = arith.select %11, %7, %12 : vector<8x8xi1>, vector<8x8xf32>
    %cst_9 = arith.constant dense<0xFF800000> : vector<8xf32>
    %14 = vector.multi_reduction <maximumf>, %13, %cst_9 [1] : vector<8x8xf32> to vector<8xf32>
    %15 = vector.shape_cast %14 : vector<8xf32> to vector<8x1xf32>
    %16 = vector.broadcast %15 : vector<8x1xf32> to vector<8x8xf32>
    %17 = arith.subf %13, %16 : vector<8x8xf32>
    %18 = math.exp %17 : vector<8x8xf32>
    %cst_10 = arith.constant dense<0.000000e+00> : vector<8xf32>
    %19 = vector.multi_reduction <add>, %18, %cst_10 [1] : vector<8x8xf32> to vector<8xf32>
    %20 = vector.shape_cast %19 : vector<8xf32> to vector<8x1xf32>
    %21 = vector.broadcast %20 : vector<8x1xf32> to vector<8x8xf32>
    %22 = arith.divf %18, %21 : vector<8x8xf32>
    %23 = arith.truncf %22 : vector<8x8xf32> to vector<8x8xbf16>
    %cst_11 = arith.constant dense<0.000000e+00> : vector<8x16xf32>
    %24 = tpu.matmul %23, %4, %cst_11 {dimension_numbers = #tpu.dot_dimension_numbers<[1], [0], [0], [1], [0, 0, 1, 1], [], []>} : vector<8x8xbf16>, vector<8x16xbf16>, vector<8x16xf32> -> vector<8x16xf32>
    %c0_12 = arith.constant 0 : index
    %c16 = arith.constant 16 : index
    %25 = vector.load %arg1[%c0_12, %c16] : memref<8x192xbf16, #tpu.memory_space<vmem>>, vector<8x16xbf16>
    %c0_13 = arith.constant 0 : index
    %c80 = arith.constant 80 : index
    %26 = vector.load %arg1[%c0_13, %c80] : memref<8x192xbf16, #tpu.memory_space<vmem>>, vector<8x16xbf16>
    %c0_14 = arith.constant 0 : index
    %c144 = arith.constant 144 : index
    %27 = vector.load %arg1[%c0_14, %c144] : memref<8x192xbf16, #tpu.memory_space<vmem>>, vector<8x16xbf16>
    %cst_15 = arith.constant dense<0.000000e+00> : vector<8x8xf32>
    %28 = tpu.matmul %25, %26, %cst_15 {dimension_numbers = #tpu.dot_dimension_numbers<[1], [1], [0], [0], [0, 0, 1, 0], [], []>} : vector<8x16xbf16>, vector<8x16xbf16>, vector<8x8xf32> -> vector<8x8xf32>
    %cst_16 = arith.constant 2.500000e-01 : f32
    %29 = vector.broadcast %cst_16 : f32 to vector<8x8xf32>
    %30 = arith.mulf %28, %29 : vector<8x8xf32>
    %cst_17 = arith.constant 0.000000e+00 : f32
    %31 = vector.broadcast %cst_17 : f32 to vector<1x8xf32>
    %32 = arith.cmpf ogt, %1, %31 : vector<1x8xf32>
    %cst_18 = arith.constant -1.000000e+09 : f32
    %33 = vector.shape_cast %32 : vector<1x8xi1> to vector<1x8xi1>
    %34 = vector.broadcast %33 : vector<1x8xi1> to vector<8x8xi1>
    %35 = vector.broadcast %cst_18 : f32 to vector<8x8xf32>
    %36 = arith.select %34, %30, %35 : vector<8x8xi1>, vector<8x8xf32>
    %cst_19 = arith.constant dense<0xFF800000> : vector<8xf32>
    %37 = vector.multi_reduction <maximumf>, %36, %cst_19 [1] : vector<8x8xf32> to vector<8xf32>
    %38 = vector.shape_cast %37 : vector<8xf32> to vector<8x1xf32>
    %39 = vector.broadcast %38 : vector<8x1xf32> to vector<8x8xf32>
    %40 = arith.subf %36, %39 : vector<8x8xf32>
    %41 = math.exp %40 : vector<8x8xf32>
    %cst_20 = arith.constant dense<0.000000e+00> : vector<8xf32>
    %42 = vector.multi_reduction <add>, %41, %cst_20 [1] : vector<8x8xf32> to vector<8xf32>
    %43 = vector.shape_cast %42 : vector<8xf32> to vector<8x1xf32>
    %44 = vector.broadcast %43 : vector<8x1xf32> to vector<8x8xf32>
    %45 = arith.divf %41, %44 : vector<8x8xf32>
    %46 = arith.truncf %45 : vector<8x8xf32> to vector<8x8xbf16>
    %cst_21 = arith.constant dense<0.000000e+00> : vector<8x16xf32>
    %47 = tpu.matmul %46, %27, %cst_21 {dimension_numbers = #tpu.dot_dimension_numbers<[1], [0], [0], [1], [0, 0, 1, 1], [], []>} : vector<8x8xbf16>, vector<8x16xbf16>, vector<8x16xf32> -> vector<8x16xf32>
    %c0_22 = arith.constant 0 : index
    %c32 = arith.constant 32 : index
    %48 = vector.load %arg1[%c0_22, %c32] : memref<8x192xbf16, #tpu.memory_space<vmem>>, vector<8x16xbf16>
    %c0_23 = arith.constant 0 : index
    %c96 = arith.constant 96 : index
    %49 = vector.load %arg1[%c0_23, %c96] : memref<8x192xbf16, #tpu.memory_space<vmem>>, vector<8x16xbf16>
    %c0_24 = arith.constant 0 : index
    %c160 = arith.constant 160 : index
    %50 = vector.load %arg1[%c0_24, %c160] : memref<8x192xbf16, #tpu.memory_space<vmem>>, vector<8x16xbf16>
    %cst_25 = arith.constant dense<0.000000e+00> : vector<8x8xf32>
    %51 = tpu.matmul %48, %49, %cst_25 {dimension_numbers = #tpu.dot_dimension_numbers<[1], [1], [0], [0], [0, 0, 1, 0], [], []>} : vector<8x16xbf16>, vector<8x16xbf16>, vector<8x8xf32> -> vector<8x8xf32>
    %cst_26 = arith.constant 2.500000e-01 : f32
    %52 = vector.broadcast %cst_26 : f32 to vector<8x8xf32>
    %53 = arith.mulf %51, %52 : vector<8x8xf32>
    %cst_27 = arith.constant 0.000000e+00 : f32
    %54 = vector.broadcast %cst_27 : f32 to vector<1x8xf32>
    %55 = arith.cmpf ogt, %1, %54 : vector<1x8xf32>
    %cst_28 = arith.constant -1.000000e+09 : f32
    %56 = vector.shape_cast %55 : vector<1x8xi1> to vector<1x8xi1>
    %57 = vector.broadcast %56 : vector<1x8xi1> to vector<8x8xi1>
    %58 = vector.broadcast %cst_28 : f32 to vector<8x8xf32>
    %59 = arith.select %57, %53, %58 : vector<8x8xi1>, vector<8x8xf32>
    %cst_29 = arith.constant dense<0xFF800000> : vector<8xf32>
    %60 = vector.multi_reduction <maximumf>, %59, %cst_29 [1] : vector<8x8xf32> to vector<8xf32>
    %61 = vector.shape_cast %60 : vector<8xf32> to vector<8x1xf32>
    %62 = vector.broadcast %61 : vector<8x1xf32> to vector<8x8xf32>
    %63 = arith.subf %59, %62 : vector<8x8xf32>
    %64 = math.exp %63 : vector<8x8xf32>
    %cst_30 = arith.constant dense<0.000000e+00> : vector<8xf32>
    %65 = vector.multi_reduction <add>, %64, %cst_30 [1] : vector<8x8xf32> to vector<8xf32>
    %66 = vector.shape_cast %65 : vector<8xf32> to vector<8x1xf32>
    %67 = vector.broadcast %66 : vector<8x1xf32> to vector<8x8xf32>
    %68 = arith.divf %64, %67 : vector<8x8xf32>
    %69 = arith.truncf %68 : vector<8x8xf32> to vector<8x8xbf16>
    %cst_31 = arith.constant dense<0.000000e+00> : vector<8x16xf32>
    %70 = tpu.matmul %69, %50, %cst_31 {dimension_numbers = #tpu.dot_dimension_numbers<[1], [0], [0], [1], [0, 0, 1, 1], [], []>} : vector<8x8xbf16>, vector<8x16xbf16>, vector<8x16xf32> -> vector<8x16xf32>
    %c0_32 = arith.constant 0 : index
    %c48 = arith.constant 48 : index
    %71 = vector.load %arg1[%c0_32, %c48] : memref<8x192xbf16, #tpu.memory_space<vmem>>, vector<8x16xbf16>
    %c0_33 = arith.constant 0 : index
    %c112 = arith.constant 112 : index
    %72 = vector.load %arg1[%c0_33, %c112] : memref<8x192xbf16, #tpu.memory_space<vmem>>, vector<8x16xbf16>
    %c0_34 = arith.constant 0 : index
    %c176 = arith.constant 176 : index
    %73 = vector.load %arg1[%c0_34, %c176] : memref<8x192xbf16, #tpu.memory_space<vmem>>, vector<8x16xbf16>
    %cst_35 = arith.constant dense<0.000000e+00> : vector<8x8xf32>
    %74 = tpu.matmul %71, %72, %cst_35 {dimension_numbers = #tpu.dot_dimension_numbers<[1], [1], [0], [0], [0, 0, 1, 0], [], []>} : vector<8x16xbf16>, vector<8x16xbf16>, vector<8x8xf32> -> vector<8x8xf32>
    %cst_36 = arith.constant 2.500000e-01 : f32
    %75 = vector.broadcast %cst_36 : f32 to vector<8x8xf32>
    %76 = arith.mulf %74, %75 : vector<8x8xf32>
    %cst_37 = arith.constant 0.000000e+00 : f32
    %77 = vector.broadcast %cst_37 : f32 to vector<1x8xf32>
    %78 = arith.cmpf ogt, %1, %77 : vector<1x8xf32>
    %cst_38 = arith.constant -1.000000e+09 : f32
    %79 = vector.shape_cast %78 : vector<1x8xi1> to vector<1x8xi1>
    %80 = vector.broadcast %79 : vector<1x8xi1> to vector<8x8xi1>
    %81 = vector.broadcast %cst_38 : f32 to vector<8x8xf32>
    %82 = arith.select %80, %76, %81 : vector<8x8xi1>, vector<8x8xf32>
    %cst_39 = arith.constant dense<0xFF800000> : vector<8xf32>
    %83 = vector.multi_reduction <maximumf>, %82, %cst_39 [1] : vector<8x8xf32> to vector<8xf32>
    %84 = vector.shape_cast %83 : vector<8xf32> to vector<8x1xf32>
    %85 = vector.broadcast %84 : vector<8x1xf32> to vector<8x8xf32>
    %86 = arith.subf %82, %85 : vector<8x8xf32>
    %87 = math.exp %86 : vector<8x8xf32>
    %cst_40 = arith.constant dense<0.000000e+00> : vector<8xf32>
    %88 = vector.multi_reduction <add>, %87, %cst_40 [1] : vector<8x8xf32> to vector<8xf32>
    %89 = vector.shape_cast %88 : vector<8xf32> to vector<8x1xf32>
    %90 = vector.broadcast %89 : vector<8x1xf32> to vector<8x8xf32>
    %91 = arith.divf %87, %90 : vector<8x8xf32>
    %92 = arith.truncf %91 : vector<8x8xf32> to vector<8x8xbf16>
    %cst_41 = arith.constant dense<0.000000e+00> : vector<8x16xf32>
    %93 = tpu.matmul %92, %73, %cst_41 {dimension_numbers = #tpu.dot_dimension_numbers<[1], [0], [0], [1], [0, 0, 1, 1], [], []>} : vector<8x8xbf16>, vector<8x16xbf16>, vector<8x16xf32> -> vector<8x16xf32>
    %94 = tpu.concatenate %24, %47, %70, %93 in 1 : vector<8x16xf32>, vector<8x16xf32>, vector<8x16xf32>, vector<8x16xf32> -> vector<8x64xf32>
    %95 = arith.truncf %94 : vector<8x64xf32> to vector<8x64xbf16>
    %c0_42 = arith.constant 0 : index
    %c0_43 = arith.constant 0 : index
    %96 = vector.load %arg3[%c0_42, %c0_43] : memref<8x64xbf16, #tpu.memory_space<vmem>>, vector<8x64xbf16>
    tpu.vector_store %arg3[%c0_42, %c0_43], %95 {strides = array<i32>} : memref<8x64xbf16, #tpu.memory_space<vmem>>, vector<8x64xbf16>,
    return
  }
  func.func @transform_0(%arg0: i32) -> (i32, i32) {
    %c0_i32 = arith.constant 0 : i32
    %c0_i32_0 = arith.constant 0 : i32
    return %arg0, %c0_i32 : i32, i32
  }
  func.func @transform_1(%arg0: i32) -> (i32, i32, i32) {
    %c0_i32 = arith.constant 0 : i32
    %c0_i32_0 = arith.constant 0 : i32
    %c0_i32_1 = arith.constant 0 : i32
    return %arg0, %c0_i32, %c0_i32_0 : i32, i32, i32
  }
  func.func @transform_2(%arg0: i32) -> (i32, i32) {
    %c0_i32 = arith.constant 0 : i32
    %c0_i32_0 = arith.constant 0 : i32
    return %arg0, %c0_i32 : i32, i32
  }
}

module attributes {stable_mosaic.version = 11 : i64} {
  func.func @_linear_kernel(%arg0: i32, %arg1: i32, %arg2: memref<16x64xbf16, #tpu.memory_space<vmem>>, %arg3: memref<64x64xbf16, #tpu.memory_space<vmem>>, %arg4: memref<1x64xf32, #tpu.memory_space<vmem>>, %arg5: memref<16x64xbf16, #tpu.memory_space<vmem>>, %arg6: memref<1x64xf32, #tpu.memory_space<vmem>>, %arg7: memref<1x64xf32, #tpu.memory_space<vmem>>, %arg8: memref<16x64xbf16, #tpu.memory_space<vmem>>, %arg9: memref<16x64xf32, #tpu.memory_space<vmem>>) attributes {dimension_semantics = [#tpu.dimension_semantics<parallel>, #tpu.dimension_semantics<arbitrary>], iteration_bounds = array<i64: 1, 1>, scalar_prefetch = 0 : i64, scratch_operands = 1 : i64, tpu.core_type = #tpu.core_type<tc>, window_params = [{transform_indices = @transform_0, window_bounds = array<i64: 16, 64>}, {transform_indices = @transform_1, window_bounds = array<i64: 64, 64>}, {pipeline_mode = #tpu.pipeline_mode<synchronous>, transform_indices = @transform_2, window_bounds = array<i64: 1, 64>}, {transform_indices = @transform_3, window_bounds = array<i64: 16, 64>}, {pipeline_mode = #tpu.pipeline_mode<synchronous>, transform_indices = @transform_4, window_bounds = array<i64: 1, 64>}, {pipeline_mode = #tpu.pipeline_mode<synchronous>, transform_indices = @transform_5, window_bounds = array<i64: 1, 64>}, {transform_indices = @transform_6, window_bounds = array<i64: 16, 64>}]} {
    %c0_i32 = arith.constant 0 : i32
    %0 = arith.cmpi eq, %arg1, %c0_i32 : i32
    %1 = arith.extui %0 : i1 to i32
    %c0_i32_0 = arith.constant 0 : i32
    %2 = arith.cmpi ne, %1, %c0_i32_0 : i32
    scf.if %2 {
      %cst_10 = arith.constant 0.000000e+00 : f32
      %12 = vector.broadcast %cst_10 : f32 to vector<16x64xf32>
      %c0_11 = arith.constant 0 : index
      %c0_12 = arith.constant 0 : index
      %13 = vector.load %arg9[%c0_11, %c0_12] : memref<16x64xf32, #tpu.memory_space<vmem>>, vector<16x64xf32>
      tpu.vector_store %arg9[%c0_11, %c0_12], %12 {strides = array<i32>} : memref<16x64xf32, #tpu.memory_space<vmem>>, vector<16x64xf32>,
    } else {
    }
    %c0 = arith.constant 0 : index
    %c0_1 = arith.constant 0 : index
    %3 = vector.load %arg9[%c0, %c0_1] : memref<16x64xf32, #tpu.memory_space<vmem>>, vector<16x64xf32>
    %c0_2 = arith.constant 0 : index
    %c0_3 = arith.constant 0 : index
    %4 = vector.load %arg2[%c0_2, %c0_3] : memref<16x64xbf16, #tpu.memory_space<vmem>>, vector<16x64xbf16>
    %c0_4 = arith.constant 0 : index
    %c0_5 = arith.constant 0 : index
    %5 = vector.load %arg3[%c0_4, %c0_5] : memref<64x64xbf16, #tpu.memory_space<vmem>>, vector<64x64xbf16>
    %cst = arith.constant dense<0.000000e+00> : vector<16x64xf32>
    %6 = tpu.matmul %4, %5, %cst {dimension_numbers = #tpu.dot_dimension_numbers<[1], [0], [0], [1], [0, 0, 1, 1], [], []>} : vector<16x64xbf16>, vector<64x64xbf16>, vector<16x64xf32> -> vector<16x64xf32>
    %7 = arith.addf %3, %6 : vector<16x64xf32>
    %c0_6 = arith.constant 0 : index
    %c0_7 = arith.constant 0 : index
    %8 = vector.load %arg9[%c0_6, %c0_7] : memref<16x64xf32, #tpu.memory_space<vmem>>, vector<16x64xf32>
    tpu.vector_store %arg9[%c0_6, %c0_7], %7 {strides = array<i32>} : memref<16x64xf32, #tpu.memory_space<vmem>>, vector<16x64xf32>,
    %c0_i32_8 = arith.constant 0 : i32
    %9 = arith.cmpi eq, %arg1, %c0_i32_8 : i32
    %10 = arith.extui %9 : i1 to i32
    %c0_i32_9 = arith.constant 0 : i32
    %11 = arith.cmpi ne, %10, %c0_i32_9 : i32
    scf.if %11 {
      %c0_10 = arith.constant 0 : index
      %c0_11 = arith.constant 0 : index
      %12 = vector.load %arg9[%c0_10, %c0_11] : memref<16x64xf32, #tpu.memory_space<vmem>>, vector<16x64xf32>
      %c0_12 = arith.constant 0 : index
      %c0_13 = arith.constant 0 : index
      %13 = vector.load %arg4[%c0_12, %c0_13] : memref<1x64xf32, #tpu.memory_space<vmem>>, vector<1x64xf32>
      %14 = vector.broadcast %13 : vector<1x64xf32> to vector<16x64xf32>
      %15 = arith.addf %12, %14 : vector<16x64xf32>
      %c0_14 = arith.constant 0 : index
      %c0_15 = arith.constant 0 : index
      %16 = vector.load %arg5[%c0_14, %c0_15] : memref<16x64xbf16, #tpu.memory_space<vmem>>, vector<16x64xbf16>
      %17 = arith.extf %16 : vector<16x64xbf16> to vector<16x64xf32>
      %18 = arith.addf %15, %17 : vector<16x64xf32>
      %c0_16 = arith.constant 0 : index
      %c0_17 = arith.constant 0 : index
      %19 = vector.load %arg6[%c0_16, %c0_17] : memref<1x64xf32, #tpu.memory_space<vmem>>, vector<1x64xf32>
      %c0_18 = arith.constant 0 : index
      %c0_19 = arith.constant 0 : index
      %20 = vector.load %arg7[%c0_18, %c0_19] : memref<1x64xf32, #tpu.memory_space<vmem>>, vector<1x64xf32>
      %cst_20 = arith.constant dense<0.000000e+00> : vector<16xf32>
      %21 = vector.multi_reduction <add>, %18, %cst_20 [1] : vector<16x64xf32> to vector<16xf32>
      %22 = vector.shape_cast %21 : vector<16xf32> to vector<16x1xf32>
      %cst_21 = arith.constant 6.400000e+01 : f32
      %23 = vector.broadcast %cst_21 : f32 to vector<16x1xf32>
      %24 = arith.divf %22, %23 : vector<16x1xf32>
      %25 = vector.broadcast %24 : vector<16x1xf32> to vector<16x64xf32>
      %26 = arith.subf %18, %25 : vector<16x64xf32>
      %27 = arith.mulf %26, %26 : vector<16x64xf32>
      %cst_22 = arith.constant dense<0.000000e+00> : vector<16xf32>
      %28 = vector.multi_reduction <add>, %27, %cst_22 [1] : vector<16x64xf32> to vector<16xf32>
      %29 = vector.shape_cast %28 : vector<16xf32> to vector<16x1xf32>
      %cst_23 = arith.constant 6.400000e+01 : f32
      %30 = vector.broadcast %cst_23 : f32 to vector<16x1xf32>
      %31 = arith.divf %29, %30 : vector<16x1xf32>
      %32 = vector.broadcast %24 : vector<16x1xf32> to vector<16x64xf32>
      %33 = arith.subf %18, %32 : vector<16x64xf32>
      %cst_24 = arith.constant 9.99999996E-13 : f32
      %34 = vector.broadcast %cst_24 : f32 to vector<16x1xf32>
      %35 = arith.addf %31, %34 : vector<16x1xf32>
      %36 = math.rsqrt %35 : vector<16x1xf32>
      %37 = vector.broadcast %36 : vector<16x1xf32> to vector<16x64xf32>
      %38 = arith.mulf %33, %37 : vector<16x64xf32>
      %39 = vector.broadcast %19 : vector<1x64xf32> to vector<16x64xf32>
      %40 = arith.mulf %38, %39 : vector<16x64xf32>
      %41 = vector.broadcast %20 : vector<1x64xf32> to vector<16x64xf32>
      %42 = arith.addf %40, %41 : vector<16x64xf32>
      %43 = arith.truncf %42 : vector<16x64xf32> to vector<16x64xbf16>
      %c0_25 = arith.constant 0 : index
      %c0_26 = arith.constant 0 : index
      %44 = vector.load %arg8[%c0_25, %c0_26] : memref<16x64xbf16, #tpu.memory_space<vmem>>, vector<16x64xbf16>
      tpu.vector_store %arg8[%c0_25, %c0_26], %43 {strides = array<i32>} : memref<16x64xbf16, #tpu.memory_space<vmem>>, vector<16x64xbf16>,
    } else {
    }
    return
  }
  func.func @transform_0(%arg0: i32, %arg1: i32) -> (i32, i32) {
    %c0_i32 = arith.constant 0 : i32
    return %arg0, %arg1 : i32, i32
  }
  func.func @transform_1(%arg0: i32, %arg1: i32) -> (i32, i32) {
    %c0_i32 = arith.constant 0 : i32
    %c0_i32_0 = arith.constant 0 : i32
    return %arg1, %c0_i32 : i32, i32
  }
  func.func @transform_2(%arg0: i32, %arg1: i32) -> (i32, i32) {
    %c0_i32 = arith.constant 0 : i32
    %c0_i32_0 = arith.constant 0 : i32
    %c0_i32_1 = arith.constant 0 : i32
    return %c0_i32, %c0_i32_0 : i32, i32
  }
  func.func @transform_3(%arg0: i32, %arg1: i32) -> (i32, i32) {
    %c0_i32 = arith.constant 0 : i32
    %c0_i32_0 = arith.constant 0 : i32
    return %arg0, %c0_i32 : i32, i32
  }
  func.func @transform_4(%arg0: i32, %arg1: i32) -> (i32, i32) {
    %c0_i32 = arith.constant 0 : i32
    %c0_i32_0 = arith.constant 0 : i32
    %c0_i32_1 = arith.constant 0 : i32
    return %c0_i32, %c0_i32_0 : i32, i32
  }
  func.func @transform_5(%arg0: i32, %arg1: i32) -> (i32, i32) {
    %c0_i32 = arith.constant 0 : i32
    %c0_i32_0 = arith.constant 0 : i32
    %c0_i32_1 = arith.constant 0 : i32
    return %c0_i32, %c0_i32_0 : i32, i32
  }
  func.func @transform_6(%arg0: i32, %arg1: i32) -> (i32, i32) {
    %c0_i32 = arith.constant 0 : i32
    %c0_i32_0 = arith.constant 0 : i32
    return %arg0, %c0_i32 : i32, i32
  }
}

module attributes {stable_mosaic.version = 11 : i64} {
  func.func @_linear_kernel(%arg0: i32, %arg1: i32, %arg2: memref<16x64xbf16, #tpu.memory_space<vmem>>, %arg3: memref<64x128xbf16, #tpu.memory_space<vmem>>, %arg4: memref<1x128xf32, #tpu.memory_space<vmem>>, %arg5: memref<16x128xf32, #tpu.memory_space<vmem>>, %arg6: memref<16x128xf32, #tpu.memory_space<vmem>>) attributes {dimension_semantics = [#tpu.dimension_semantics<parallel>, #tpu.dimension_semantics<arbitrary>], iteration_bounds = array<i64: 1, 1>, scalar_prefetch = 0 : i64, scratch_operands = 1 : i64, tpu.core_type = #tpu.core_type<tc>, window_params = [{transform_indices = @transform_0, window_bounds = array<i64: 16, 64>}, {transform_indices = @transform_1, window_bounds = array<i64: 64, 128>}, {pipeline_mode = #tpu.pipeline_mode<synchronous>, transform_indices = @transform_2, window_bounds = array<i64: 1, 128>}, {transform_indices = @transform_3, window_bounds = array<i64: 16, 128>}]} {
    %c0_i32 = arith.constant 0 : i32
    %0 = arith.cmpi eq, %arg1, %c0_i32 : i32
    %1 = arith.extui %0 : i1 to i32
    %c0_i32_0 = arith.constant 0 : i32
    %2 = arith.cmpi ne, %1, %c0_i32_0 : i32
    scf.if %2 {
      %cst_10 = arith.constant 0.000000e+00 : f32
      %12 = vector.broadcast %cst_10 : f32 to vector<16x128xf32>
      %c0_11 = arith.constant 0 : index
      %c0_12 = arith.constant 0 : index
      %13 = vector.load %arg6[%c0_11, %c0_12] : memref<16x128xf32, #tpu.memory_space<vmem>>, vector<16x128xf32>
      tpu.vector_store %arg6[%c0_11, %c0_12], %12 {strides = array<i32>} : memref<16x128xf32, #tpu.memory_space<vmem>>, vector<16x128xf32>,
    } else {
    }
    %c0 = arith.constant 0 : index
    %c0_1 = arith.constant 0 : index
    %3 = vector.load %arg6[%c0, %c0_1] : memref<16x128xf32, #tpu.memory_space<vmem>>, vector<16x128xf32>
    %c0_2 = arith.constant 0 : index
    %c0_3 = arith.constant 0 : index
    %4 = vector.load %arg2[%c0_2, %c0_3] : memref<16x64xbf16, #tpu.memory_space<vmem>>, vector<16x64xbf16>
    %c0_4 = arith.constant 0 : index
    %c0_5 = arith.constant 0 : index
    %5 = vector.load %arg3[%c0_4, %c0_5] : memref<64x128xbf16, #tpu.memory_space<vmem>>, vector<64x128xbf16>
    %cst = arith.constant dense<0.000000e+00> : vector<16x128xf32>
    %6 = tpu.matmul %4, %5, %cst {dimension_numbers = #tpu.dot_dimension_numbers<[1], [0], [0], [1], [0, 0, 1, 1], [], []>} : vector<16x64xbf16>, vector<64x128xbf16>, vector<16x128xf32> -> vector<16x128xf32>
    %7 = arith.addf %3, %6 : vector<16x128xf32>
    %c0_6 = arith.constant 0 : index
    %c0_7 = arith.constant 0 : index
    %8 = vector.load %arg6[%c0_6, %c0_7] : memref<16x128xf32, #tpu.memory_space<vmem>>, vector<16x128xf32>
    tpu.vector_store %arg6[%c0_6, %c0_7], %7 {strides = array<i32>} : memref<16x128xf32, #tpu.memory_space<vmem>>, vector<16x128xf32>,
    %c0_i32_8 = arith.constant 0 : i32
    %9 = arith.cmpi eq, %arg1, %c0_i32_8 : i32
    %10 = arith.extui %9 : i1 to i32
    %c0_i32_9 = arith.constant 0 : i32
    %11 = arith.cmpi ne, %10, %c0_i32_9 : i32
    scf.if %11 {
      %c0_10 = arith.constant 0 : index
      %c0_11 = arith.constant 0 : index
      %12 = vector.load %arg6[%c0_10, %c0_11] : memref<16x128xf32, #tpu.memory_space<vmem>>, vector<16x128xf32>
      %c0_12 = arith.constant 0 : index
      %c0_13 = arith.constant 0 : index
      %13 = vector.load %arg4[%c0_12, %c0_13] : memref<1x128xf32, #tpu.memory_space<vmem>>, vector<1x128xf32>
      %14 = vector.broadcast %13 : vector<1x128xf32> to vector<16x128xf32>
      %15 = arith.addf %12, %14 : vector<16x128xf32>
      %c0_14 = arith.constant 0 : index
      %c0_15 = arith.constant 0 : index
      %16 = vector.load %arg5[%c0_14, %c0_15] : memref<16x128xf32, #tpu.memory_space<vmem>>, vector<16x128xf32>
      tpu.vector_store %arg5[%c0_14, %c0_15], %15 {strides = array<i32>} : memref<16x128xf32, #tpu.memory_space<vmem>>, vector<16x128xf32>,
    } else {
    }
    return
  }
  func.func @transform_0(%arg0: i32, %arg1: i32) -> (i32, i32) {
    %c0_i32 = arith.constant 0 : i32
    return %arg0, %arg1 : i32, i32
  }
  func.func @transform_1(%arg0: i32, %arg1: i32) -> (i32, i32) {
    %c0_i32 = arith.constant 0 : i32
    %c0_i32_0 = arith.constant 0 : i32
    return %arg1, %c0_i32 : i32, i32
  }
  func.func @transform_2(%arg0: i32, %arg1: i32) -> (i32, i32) {
    %c0_i32 = arith.constant 0 : i32
    %c0_i32_0 = arith.constant 0 : i32
    %c0_i32_1 = arith.constant 0 : i32
    return %c0_i32, %c0_i32_0 : i32, i32
  }
  func.func @transform_3(%arg0: i32, %arg1: i32) -> (i32, i32) {
    %c0_i32 = arith.constant 0 : i32
    %c0_i32_0 = arith.constant 0 : i32
    return %arg0, %c0_i32 : i32, i32
  }
}

module attributes {stable_mosaic.version = 11 : i64} {
  func.func @_ffn_kernel(%arg0: i32, %arg1: memref<16x64xbf16, #tpu.memory_space<vmem>>, %arg2: memref<64x128xbf16, #tpu.memory_space<vmem>>, %arg3: memref<1x128xf32, #tpu.memory_space<vmem>>, %arg4: memref<128x64xbf16, #tpu.memory_space<vmem>>, %arg5: memref<1x64xf32, #tpu.memory_space<vmem>>, %arg6: memref<1x64xf32, #tpu.memory_space<vmem>>, %arg7: memref<1x64xf32, #tpu.memory_space<vmem>>, %arg8: memref<16x64xbf16, #tpu.memory_space<vmem>>) attributes {dimension_semantics = [#tpu.dimension_semantics<parallel>], iteration_bounds = array<i64: 1>, scalar_prefetch = 0 : i64, scratch_operands = 0 : i64, tpu.core_type = #tpu.core_type<tc>, window_params = [{transform_indices = @transform_0, window_bounds = array<i64: 16, 64>}, {pipeline_mode = #tpu.pipeline_mode<synchronous>, transform_indices = @transform_1, window_bounds = array<i64: 64, 128>}, {pipeline_mode = #tpu.pipeline_mode<synchronous>, transform_indices = @transform_2, window_bounds = array<i64: 1, 128>}, {pipeline_mode = #tpu.pipeline_mode<synchronous>, transform_indices = @transform_3, window_bounds = array<i64: 128, 64>}, {pipeline_mode = #tpu.pipeline_mode<synchronous>, transform_indices = @transform_4, window_bounds = array<i64: 1, 64>}, {pipeline_mode = #tpu.pipeline_mode<synchronous>, transform_indices = @transform_5, window_bounds = array<i64: 1, 64>}, {pipeline_mode = #tpu.pipeline_mode<synchronous>, transform_indices = @transform_6, window_bounds = array<i64: 1, 64>}, {transform_indices = @transform_7, window_bounds = array<i64: 16, 64>}]} {
    %c0 = arith.constant 0 : index
    %c0_0 = arith.constant 0 : index
    %0 = vector.load %arg1[%c0, %c0_0] : memref<16x64xbf16, #tpu.memory_space<vmem>>, vector<16x64xbf16>
    %c0_1 = arith.constant 0 : index
    %c0_2 = arith.constant 0 : index
    %1 = vector.load %arg2[%c0_1, %c0_2] : memref<64x128xbf16, #tpu.memory_space<vmem>>, vector<64x128xbf16>
    %cst = arith.constant dense<0.000000e+00> : vector<16x128xf32>
    %2 = tpu.matmul %0, %1, %cst {dimension_numbers = #tpu.dot_dimension_numbers<[1], [0], [0], [1], [0, 0, 1, 1], [], []>} : vector<16x64xbf16>, vector<64x128xbf16>, vector<16x128xf32> -> vector<16x128xf32>
    %c0_3 = arith.constant 0 : index
    %c0_4 = arith.constant 0 : index
    %3 = vector.load %arg3[%c0_3, %c0_4] : memref<1x128xf32, #tpu.memory_space<vmem>>, vector<1x128xf32>
    %4 = vector.broadcast %3 : vector<1x128xf32> to vector<16x128xf32>
    %5 = arith.addf %2, %4 : vector<16x128xf32>
    %cst_5 = arith.constant 5.000000e-01 : f32
    %6 = vector.broadcast %cst_5 : f32 to vector<16x128xf32>
    %7 = arith.mulf %6, %5 : vector<16x128xf32>
    %cst_6 = arith.constant 4.471500e-02 : f32
    %8 = vector.broadcast %cst_6 : f32 to vector<16x128xf32>
    %9 = arith.mulf %8, %5 : vector<16x128xf32>
    %10 = arith.mulf %9, %5 : vector<16x128xf32>
    %11 = arith.mulf %10, %5 : vector<16x128xf32>
    %12 = arith.addf %5, %11 : vector<16x128xf32>
    %cst_7 = arith.constant 0.797884583 : f32
    %13 = vector.broadcast %cst_7 : f32 to vector<16x128xf32>
    %14 = arith.mulf %13, %12 : vector<16x128xf32>
    %15 = math.tanh %14 : vector<16x128xf32>
    %cst_8 = arith.constant 1.000000e+00 : f32
    %16 = vector.broadcast %cst_8 : f32 to vector<16x128xf32>
    %17 = arith.addf %16, %15 : vector<16x128xf32>
    %18 = arith.mulf %7, %17 : vector<16x128xf32>
    %19 = arith.truncf %18 : vector<16x128xf32> to vector<16x128xbf16>
    %c0_9 = arith.constant 0 : index
    %c0_10 = arith.constant 0 : index
    %20 = vector.load %arg4[%c0_9, %c0_10] : memref<128x64xbf16, #tpu.memory_space<vmem>>, vector<128x64xbf16>
    %cst_11 = arith.constant dense<0.000000e+00> : vector<16x64xf32>
    %21 = tpu.matmul %19, %20, %cst_11 {dimension_numbers = #tpu.dot_dimension_numbers<[1], [0], [0], [1], [0, 0, 1, 1], [], []>} : vector<16x128xbf16>, vector<128x64xbf16>, vector<16x64xf32> -> vector<16x64xf32>
    %c0_12 = arith.constant 0 : index
    %c0_13 = arith.constant 0 : index
    %22 = vector.load %arg5[%c0_12, %c0_13] : memref<1x64xf32, #tpu.memory_space<vmem>>, vector<1x64xf32>
    %23 = vector.broadcast %22 : vector<1x64xf32> to vector<16x64xf32>
    %24 = arith.addf %21, %23 : vector<16x64xf32>
    %c0_14 = arith.constant 0 : index
    %c0_15 = arith.constant 0 : index
    %25 = vector.load %arg1[%c0_14, %c0_15] : memref<16x64xbf16, #tpu.memory_space<vmem>>, vector<16x64xbf16>
    %26 = arith.extf %25 : vector<16x64xbf16> to vector<16x64xf32>
    %27 = arith.addf %24, %26 : vector<16x64xf32>
    %c0_16 = arith.constant 0 : index
    %c0_17 = arith.constant 0 : index
    %28 = vector.load %arg6[%c0_16, %c0_17] : memref<1x64xf32, #tpu.memory_space<vmem>>, vector<1x64xf32>
    %c0_18 = arith.constant 0 : index
    %c0_19 = arith.constant 0 : index
    %29 = vector.load %arg7[%c0_18, %c0_19] : memref<1x64xf32, #tpu.memory_space<vmem>>, vector<1x64xf32>
    %cst_20 = arith.constant dense<0.000000e+00> : vector<16xf32>
    %30 = vector.multi_reduction <add>, %27, %cst_20 [1] : vector<16x64xf32> to vector<16xf32>
    %31 = vector.shape_cast %30 : vector<16xf32> to vector<16x1xf32>
    %cst_21 = arith.constant 6.400000e+01 : f32
    %32 = vector.broadcast %cst_21 : f32 to vector<16x1xf32>
    %33 = arith.divf %31, %32 : vector<16x1xf32>
    %34 = vector.broadcast %33 : vector<16x1xf32> to vector<16x64xf32>
    %35 = arith.subf %27, %34 : vector<16x64xf32>
    %36 = arith.mulf %35, %35 : vector<16x64xf32>
    %cst_22 = arith.constant dense<0.000000e+00> : vector<16xf32>
    %37 = vector.multi_reduction <add>, %36, %cst_22 [1] : vector<16x64xf32> to vector<16xf32>
    %38 = vector.shape_cast %37 : vector<16xf32> to vector<16x1xf32>
    %cst_23 = arith.constant 6.400000e+01 : f32
    %39 = vector.broadcast %cst_23 : f32 to vector<16x1xf32>
    %40 = arith.divf %38, %39 : vector<16x1xf32>
    %41 = vector.broadcast %33 : vector<16x1xf32> to vector<16x64xf32>
    %42 = arith.subf %27, %41 : vector<16x64xf32>
    %cst_24 = arith.constant 9.99999996E-13 : f32
    %43 = vector.broadcast %cst_24 : f32 to vector<16x1xf32>
    %44 = arith.addf %40, %43 : vector<16x1xf32>
    %45 = math.rsqrt %44 : vector<16x1xf32>
    %46 = vector.broadcast %45 : vector<16x1xf32> to vector<16x64xf32>
    %47 = arith.mulf %42, %46 : vector<16x64xf32>
    %48 = vector.broadcast %28 : vector<1x64xf32> to vector<16x64xf32>
    %49 = arith.mulf %47, %48 : vector<16x64xf32>
    %50 = vector.broadcast %29 : vector<1x64xf32> to vector<16x64xf32>
    %51 = arith.addf %49, %50 : vector<16x64xf32>
    %52 = arith.truncf %51 : vector<16x64xf32> to vector<16x64xbf16>
    %c0_25 = arith.constant 0 : index
    %c0_26 = arith.constant 0 : index
    %53 = vector.load %arg8[%c0_25, %c0_26] : memref<16x64xbf16, #tpu.memory_space<vmem>>, vector<16x64xbf16>
    tpu.vector_store %arg8[%c0_25, %c0_26], %52 {strides = array<i32>} : memref<16x64xbf16, #tpu.memory_space<vmem>>, vector<16x64xbf16>,
    return
  }
  func.func @transform_0(%arg0: i32) -> (i32, i32) {
    %c0_i32 = arith.constant 0 : i32
    %c0_i32_0 = arith.constant 0 : i32
    return %arg0, %c0_i32 : i32, i32
  }
  func.func @transform_1(%arg0: i32) -> (i32, i32) {
    %c0_i32 = arith.constant 0 : i32
    %c0_i32_0 = arith.constant 0 : i32
    %c0_i32_1 = arith.constant 0 : i32
    return %c0_i32, %c0_i32_0 : i32, i32
  }
  func.func @transform_2(%arg0: i32) -> (i32, i32) {
    %c0_i32 = arith.constant 0 : i32
    %c0_i32_0 = arith.constant 0 : i32
    %c0_i32_1 = arith.constant 0 : i32
    return %c0_i32, %c0_i32_0 : i32, i32
  }
  func.func @transform_3(%arg0: i32) -> (i32, i32) {
    %c0_i32 = arith.constant 0 : i32
    %c0_i32_0 = arith.constant 0 : i32
    %c0_i32_1 = arith.constant 0 : i32
    return %c0_i32, %c0_i32_0 : i32, i32
  }
  func.func @transform_4(%arg0: i32) -> (i32, i32) {
    %c0_i32 = arith.constant 0 : i32
    %c0_i32_0 = arith.constant 0 : i32
    %c0_i32_1 = arith.constant 0 : i32
    return %c0_i32, %c0_i32_0 : i32, i32
  }
  func.func @transform_5(%arg0: i32) -> (i32, i32) {
    %c0_i32 = arith.constant 0 : i32
    %c0_i32_0 = arith.constant 0 : i32
    %c0_i32_1 = arith.constant 0 : i32
    return %c0_i32, %c0_i32_0 : i32, i32
  }
  func.func @transform_6(%arg0: i32) -> (i32, i32) {
    %c0_i32 = arith.constant 0 : i32
    %c0_i32_0 = arith.constant 0 : i32
    %c0_i32_1 = arith.constant 0 : i32
    return %c0_i32, %c0_i32_0 : i32, i32
  }
  func.func @transform_7(%arg0: i32) -> (i32, i32) {
    %c0_i32 = arith.constant 0 : i32
    %c0_i32_0 = arith.constant 0 : i32
    return %arg0, %c0_i32 : i32, i32
  }
}

module attributes {stable_mosaic.version = 11 : i64} {
  func.func @_lstm_fwd_kernel(%arg0: i32, %arg1: memref<2x8x128xf32, #tpu.memory_space<vmem>>, %arg2: memref<32x128xbf16, #tpu.memory_space<vmem>>, %arg3: memref<2x32xf32, #tpu.memory_space<vmem>>, %arg4: memref<2x32xf32, #tpu.memory_space<vmem>>, %arg5: memref<2x32xf32, #tpu.memory_space<vmem>>) attributes {dimension_semantics = [#tpu.dimension_semantics<arbitrary>], iteration_bounds = array<i64: 1>, scalar_prefetch = 0 : i64, scratch_operands = 2 : i64, tpu.core_type = #tpu.core_type<tc>, window_params = [{transform_indices = @transform_0, window_bounds = array<i64: 2, 8, 128>}, {pipeline_mode = #tpu.pipeline_mode<synchronous>, transform_indices = @transform_1, window_bounds = array<i64: 32, 128>}, {pipeline_mode = #tpu.pipeline_mode<synchronous>, transform_indices = @transform_2, window_bounds = array<i64: 2, 32>}]} {
    %c0_i32 = arith.constant 0 : i32
    %0 = arith.cmpi eq, %arg0, %c0_i32 : i32
    %1 = arith.extui %0 : i1 to i32
    %c0_i32_0 = arith.constant 0 : i32
    %2 = arith.cmpi ne, %1, %c0_i32_0 : i32
    scf.if %2 {
      %cst_94 = arith.constant 0.000000e+00 : f32
      %300 = vector.broadcast %cst_94 : f32 to vector<2x32xf32>
      %c0_95 = arith.constant 0 : index
      %c0_96 = arith.constant 0 : index
      %301 = vector.load %arg4[%c0_95, %c0_96] : memref<2x32xf32, #tpu.memory_space<vmem>>, vector<2x32xf32>
      tpu.vector_store %arg4[%c0_95, %c0_96], %300 {strides = array<i32>} : memref<2x32xf32, #tpu.memory_space<vmem>>, vector<2x32xf32>,
      %cst_97 = arith.constant 0.000000e+00 : f32
      %302 = vector.broadcast %cst_97 : f32 to vector<2x32xf32>
      %c0_98 = arith.constant 0 : index
      %c0_99 = arith.constant 0 : index
      %303 = vector.load %arg5[%c0_98, %c0_99] : memref<2x32xf32, #tpu.memory_space<vmem>>, vector<2x32xf32>
      tpu.vector_store %arg5[%c0_98, %c0_99], %302 {strides = array<i32>} : memref<2x32xf32, #tpu.memory_space<vmem>>, vector<2x32xf32>,
    } else {
    }
    %c0 = arith.constant 0 : index
    %c0_1 = arith.constant 0 : index
    %3 = vector.load %arg4[%c0, %c0_1] : memref<2x32xf32, #tpu.memory_space<vmem>>, vector<2x32xf32>
    %c0_2 = arith.constant 0 : index
    %c0_3 = arith.constant 0 : index
    %4 = vector.load %arg5[%c0_2, %c0_3] : memref<2x32xf32, #tpu.memory_space<vmem>>, vector<2x32xf32>
    %c0_4 = arith.constant 0 : index
    %c0_5 = arith.constant 0 : index
    %5 = vector.load %arg2[%c0_4, %c0_5] : memref<32x128xbf16, #tpu.memory_space<vmem>>, vector<32x128xbf16>
    %c0_6 = arith.constant 0 : index
    %c0_7 = arith.constant 0 : index
    %c0_8 = arith.constant 0 : index
    %6 = vector.load %arg1[%c0_6, %c0_7, %c0_8] : memref<2x8x128xf32, #tpu.memory_space<vmem>>, vector<2x8x128xf32>
    %7 = vector.extract_strided_slice %6 {offsets = [0, 0, 0], sizes = [2, 1, 128], strides = [1, 1, 1]} : vector<2x8x128xf32> to vector<2x1x128xf32>
    %8 = vector.shape_cast %7 : vector<2x1x128xf32> to vector<2x128xf32>
    %9 = arith.truncf %3 : vector<2x32xf32> to vector<2x32xbf16>
    %cst = arith.constant dense<0.000000e+00> : vector<2x128xf32>
    %10 = tpu.matmul %9, %5, %cst {dimension_numbers = #tpu.dot_dimension_numbers<[1], [0], [0], [1], [0, 0, 1, 1], [], []>} : vector<2x32xbf16>, vector<32x128xbf16>, vector<2x128xf32> -> vector<2x128xf32>
    %11 = arith.addf %8, %10 : vector<2x128xf32>
    %12 = vector.extract_strided_slice %11 {offsets = [0, 0], sizes = [2, 32], strides = [1, 1]} : vector<2x128xf32> to vector<2x32xf32>
    %cst_9 = arith.constant 0.000000e+00 : f32
    %13 = vector.broadcast %cst_9 : f32 to vector<2x32xf32>
    %14 = arith.subf %13, %12 : vector<2x32xf32>
    %15 = math.exp %14 : vector<2x32xf32>
    %cst_10 = arith.constant 1.000000e+00 : f32
    %16 = vector.broadcast %cst_10 : f32 to vector<2x32xf32>
    %17 = arith.addf %16, %15 : vector<2x32xf32>
    %cst_11 = arith.constant 1.000000e+00 : f32
    %18 = vector.broadcast %cst_11 : f32 to vector<2x32xf32>
    %19 = arith.divf %18, %17 : vector<2x32xf32>
    %20 = vector.extract_strided_slice %11 {offsets = [0, 32], sizes = [2, 32], strides = [1, 1]} : vector<2x128xf32> to vector<2x32xf32>
    %cst_12 = arith.constant 0.000000e+00 : f32
    %21 = vector.broadcast %cst_12 : f32 to vector<2x32xf32>
    %22 = arith.subf %21, %20 : vector<2x32xf32>
    %23 = math.exp %22 : vector<2x32xf32>
    %cst_13 = arith.constant 1.000000e+00 : f32
    %24 = vector.broadcast %cst_13 : f32 to vector<2x32xf32>
    %25 = arith.addf %24, %23 : vector<2x32xf32>
    %cst_14 = arith.constant 1.000000e+00 : f32
    %26 = vector.broadcast %cst_14 : f32 to vector<2x32xf32>
    %27 = arith.divf %26, %25 : vector<2x32xf32>
    %28 = vector.extract_strided_slice %11 {offsets = [0, 64], sizes = [2, 32], strides = [1, 1]} : vector<2x128xf32> to vector<2x32xf32>
    %29 = math.tanh %28 : vector<2x32xf32>
    %30 = vector.extract_strided_slice %11 {offsets = [0, 96], sizes = [2, 32], strides = [1, 1]} : vector<2x128xf32> to vector<2x32xf32>
    %cst_15 = arith.constant 0.000000e+00 : f32
    %31 = vector.broadcast %cst_15 : f32 to vector<2x32xf32>
    %32 = arith.subf %31, %30 : vector<2x32xf32>
    %33 = math.exp %32 : vector<2x32xf32>
    %cst_16 = arith.constant 1.000000e+00 : f32
    %34 = vector.broadcast %cst_16 : f32 to vector<2x32xf32>
    %35 = arith.addf %34, %33 : vector<2x32xf32>
    %cst_17 = arith.constant 1.000000e+00 : f32
    %36 = vector.broadcast %cst_17 : f32 to vector<2x32xf32>
    %37 = arith.divf %36, %35 : vector<2x32xf32>
    %38 = arith.mulf %27, %4 : vector<2x32xf32>
    %39 = arith.mulf %19, %29 : vector<2x32xf32>
    %40 = arith.addf %38, %39 : vector<2x32xf32>
    %41 = math.tanh %40 : vector<2x32xf32>
    %42 = arith.mulf %37, %41 : vector<2x32xf32>
    %43 = vector.extract_strided_slice %6 {offsets = [0, 1, 0], sizes = [2, 1, 128], strides = [1, 1, 1]} : vector<2x8x128xf32> to vector<2x1x128xf32>
    %44 = vector.shape_cast %43 : vector<2x1x128xf32> to vector<2x128xf32>
    %45 = arith.truncf %42 : vector<2x32xf32> to vector<2x32xbf16>
    %cst_18 = arith.constant dense<0.000000e+00> : vector<2x128xf32>
    %46 = tpu.matmul %45, %5, %cst_18 {dimension_numbers = #tpu.dot_dimension_numbers<[1], [0], [0], [1], [0, 0, 1, 1], [], []>} : vector<2x32xbf16>, vector<32x128xbf16>, vector<2x128xf32> -> vector<2x128xf32>
    %47 = arith.addf %44, %46 : vector<2x128xf32>
    %48 = vector.extract_strided_slice %47 {offsets = [0, 0], sizes = [2, 32], strides = [1, 1]} : vector<2x128xf32> to vector<2x32xf32>
    %cst_19 = arith.constant 0.000000e+00 : f32
    %49 = vector.broadcast %cst_19 : f32 to vector<2x32xf32>
    %50 = arith.subf %49, %48 : vector<2x32xf32>
    %51 = math.exp %50 : vector<2x32xf32>
    %cst_20 = arith.constant 1.000000e+00 : f32
    %52 = vector.broadcast %cst_20 : f32 to vector<2x32xf32>
    %53 = arith.addf %52, %51 : vector<2x32xf32>
    %cst_21 = arith.constant 1.000000e+00 : f32
    %54 = vector.broadcast %cst_21 : f32 to vector<2x32xf32>
    %55 = arith.divf %54, %53 : vector<2x32xf32>
    %56 = vector.extract_strided_slice %47 {offsets = [0, 32], sizes = [2, 32], strides = [1, 1]} : vector<2x128xf32> to vector<2x32xf32>
    %cst_22 = arith.constant 0.000000e+00 : f32
    %57 = vector.broadcast %cst_22 : f32 to vector<2x32xf32>
    %58 = arith.subf %57, %56 : vector<2x32xf32>
    %59 = math.exp %58 : vector<2x32xf32>
    %cst_23 = arith.constant 1.000000e+00 : f32
    %60 = vector.broadcast %cst_23 : f32 to vector<2x32xf32>
    %61 = arith.addf %60, %59 : vector<2x32xf32>
    %cst_24 = arith.constant 1.000000e+00 : f32
    %62 = vector.broadcast %cst_24 : f32 to vector<2x32xf32>
    %63 = arith.divf %62, %61 : vector<2x32xf32>
    %64 = vector.extract_strided_slice %47 {offsets = [0, 64], sizes = [2, 32], strides = [1, 1]} : vector<2x128xf32> to vector<2x32xf32>
    %65 = math.tanh %64 : vector<2x32xf32>
    %66 = vector.extract_strided_slice %47 {offsets = [0, 96], sizes = [2, 32], strides = [1, 1]} : vector<2x128xf32> to vector<2x32xf32>
    %cst_25 = arith.constant 0.000000e+00 : f32
    %67 = vector.broadcast %cst_25 : f32 to vector<2x32xf32>
    %68 = arith.subf %67, %66 : vector<2x32xf32>
    %69 = math.exp %68 : vector<2x32xf32>
    %cst_26 = arith.constant 1.000000e+00 : f32
    %70 = vector.broadcast %cst_26 : f32 to vector<2x32xf32>
    %71 = arith.addf %70, %69 : vector<2x32xf32>
    %cst_27 = arith.constant 1.000000e+00 : f32
    %72 = vector.broadcast %cst_27 : f32 to vector<2x32xf32>
    %73 = arith.divf %72, %71 : vector<2x32xf32>
    %74 = arith.mulf %63, %40 : vector<2x32xf32>
    %75 = arith.mulf %55, %65 : vector<2x32xf32>
    %76 = arith.addf %74, %75 : vector<2x32xf32>
    %77 = math.tanh %76 : vector<2x32xf32>
    %78 = arith.mulf %73, %77 : vector<2x32xf32>
    %79 = vector.extract_strided_slice %6 {offsets = [0, 2, 0], sizes = [2, 1, 128], strides = [1, 1, 1]} : vector<2x8x128xf32> to vector<2x1x128xf32>
    %80 = vector.shape_cast %79 : vector<2x1x128xf32> to vector<2x128xf32>
    %81 = arith.truncf %78 : vector<2x32xf32> to vector<2x32xbf16>
    %cst_28 = arith.constant dense<0.000000e+00> : vector<2x128xf32>
    %82 = tpu.matmul %81, %5, %cst_28 {dimension_numbers = #tpu.dot_dimension_numbers<[1], [0], [0], [1], [0, 0, 1, 1], [], []>} : vector<2x32xbf16>, vector<32x128xbf16>, vector<2x128xf32> -> vector<2x128xf32>
    %83 = arith.addf %80, %82 : vector<2x128xf32>
    %84 = vector.extract_strided_slice %83 {offsets = [0, 0], sizes = [2, 32], strides = [1, 1]} : vector<2x128xf32> to vector<2x32xf32>
    %cst_29 = arith.constant 0.000000e+00 : f32
    %85 = vector.broadcast %cst_29 : f32 to vector<2x32xf32>
    %86 = arith.subf %85, %84 : vector<2x32xf32>
    %87 = math.exp %86 : vector<2x32xf32>
    %cst_30 = arith.constant 1.000000e+00 : f32
    %88 = vector.broadcast %cst_30 : f32 to vector<2x32xf32>
    %89 = arith.addf %88, %87 : vector<2x32xf32>
    %cst_31 = arith.constant 1.000000e+00 : f32
    %90 = vector.broadcast %cst_31 : f32 to vector<2x32xf32>
    %91 = arith.divf %90, %89 : vector<2x32xf32>
    %92 = vector.extract_strided_slice %83 {offsets = [0, 32], sizes = [2, 32], strides = [1, 1]} : vector<2x128xf32> to vector<2x32xf32>
    %cst_32 = arith.constant 0.000000e+00 : f32
    %93 = vector.broadcast %cst_32 : f32 to vector<2x32xf32>
    %94 = arith.subf %93, %92 : vector<2x32xf32>
    %95 = math.exp %94 : vector<2x32xf32>
    %cst_33 = arith.constant 1.000000e+00 : f32
    %96 = vector.broadcast %cst_33 : f32 to vector<2x32xf32>
    %97 = arith.addf %96, %95 : vector<2x32xf32>
    %cst_34 = arith.constant 1.000000e+00 : f32
    %98 = vector.broadcast %cst_34 : f32 to vector<2x32xf32>
    %99 = arith.divf %98, %97 : vector<2x32xf32>
    %100 = vector.extract_strided_slice %83 {offsets = [0, 64], sizes = [2, 32], strides = [1, 1]} : vector<2x128xf32> to vector<2x32xf32>
    %101 = math.tanh %100 : vector<2x32xf32>
    %102 = vector.extract_strided_slice %83 {offsets = [0, 96], sizes = [2, 32], strides = [1, 1]} : vector<2x128xf32> to vector<2x32xf32>
    %cst_35 = arith.constant 0.000000e+00 : f32
    %103 = vector.broadcast %cst_35 : f32 to vector<2x32xf32>
    %104 = arith.subf %103, %102 : vector<2x32xf32>
    %105 = math.exp %104 : vector<2x32xf32>
    %cst_36 = arith.constant 1.000000e+00 : f32
    %106 = vector.broadcast %cst_36 : f32 to vector<2x32xf32>
    %107 = arith.addf %106, %105 : vector<2x32xf32>
    %cst_37 = arith.constant 1.000000e+00 : f32
    %108 = vector.broadcast %cst_37 : f32 to vector<2x32xf32>
    %109 = arith.divf %108, %107 : vector<2x32xf32>
    %110 = arith.mulf %99, %76 : vector<2x32xf32>
    %111 = arith.mulf %91, %101 : vector<2x32xf32>
    %112 = arith.addf %110, %111 : vector<2x32xf32>
    %113 = math.tanh %112 : vector<2x32xf32>
    %114 = arith.mulf %109, %113 : vector<2x32xf32>
    %115 = vector.extract_strided_slice %6 {offsets = [0, 3, 0], sizes = [2, 1, 128], strides = [1, 1, 1]} : vector<2x8x128xf32> to vector<2x1x128xf32>
    %116 = vector.shape_cast %115 : vector<2x1x128xf32> to vector<2x128xf32>
    %117 = arith.truncf %114 : vector<2x32xf32> to vector<2x32xbf16>
    %cst_38 = arith.constant dense<0.000000e+00> : vector<2x128xf32>
    %118 = tpu.matmul %117, %5, %cst_38 {dimension_numbers = #tpu.dot_dimension_numbers<[1], [0], [0], [1], [0, 0, 1, 1], [], []>} : vector<2x32xbf16>, vector<32x128xbf16>, vector<2x128xf32> -> vector<2x128xf32>
    %119 = arith.addf %116, %118 : vector<2x128xf32>
    %120 = vector.extract_strided_slice %119 {offsets = [0, 0], sizes = [2, 32], strides = [1, 1]} : vector<2x128xf32> to vector<2x32xf32>
    %cst_39 = arith.constant 0.000000e+00 : f32
    %121 = vector.broadcast %cst_39 : f32 to vector<2x32xf32>
    %122 = arith.subf %121, %120 : vector<2x32xf32>
    %123 = math.exp %122 : vector<2x32xf32>
    %cst_40 = arith.constant 1.000000e+00 : f32
    %124 = vector.broadcast %cst_40 : f32 to vector<2x32xf32>
    %125 = arith.addf %124, %123 : vector<2x32xf32>
    %cst_41 = arith.constant 1.000000e+00 : f32
    %126 = vector.broadcast %cst_41 : f32 to vector<2x32xf32>
    %127 = arith.divf %126, %125 : vector<2x32xf32>
    %128 = vector.extract_strided_slice %119 {offsets = [0, 32], sizes = [2, 32], strides = [1, 1]} : vector<2x128xf32> to vector<2x32xf32>
    %cst_42 = arith.constant 0.000000e+00 : f32
    %129 = vector.broadcast %cst_42 : f32 to vector<2x32xf32>
    %130 = arith.subf %129, %128 : vector<2x32xf32>
    %131 = math.exp %130 : vector<2x32xf32>
    %cst_43 = arith.constant 1.000000e+00 : f32
    %132 = vector.broadcast %cst_43 : f32 to vector<2x32xf32>
    %133 = arith.addf %132, %131 : vector<2x32xf32>
    %cst_44 = arith.constant 1.000000e+00 : f32
    %134 = vector.broadcast %cst_44 : f32 to vector<2x32xf32>
    %135 = arith.divf %134, %133 : vector<2x32xf32>
    %136 = vector.extract_strided_slice %119 {offsets = [0, 64], sizes = [2, 32], strides = [1, 1]} : vector<2x128xf32> to vector<2x32xf32>
    %137 = math.tanh %136 : vector<2x32xf32>
    %138 = vector.extract_strided_slice %119 {offsets = [0, 96], sizes = [2, 32], strides = [1, 1]} : vector<2x128xf32> to vector<2x32xf32>
    %cst_45 = arith.constant 0.000000e+00 : f32
    %139 = vector.broadcast %cst_45 : f32 to vector<2x32xf32>
    %140 = arith.subf %139, %138 : vector<2x32xf32>
    %141 = math.exp %140 : vector<2x32xf32>
    %cst_46 = arith.constant 1.000000e+00 : f32
    %142 = vector.broadcast %cst_46 : f32 to vector<2x32xf32>
    %143 = arith.addf %142, %141 : vector<2x32xf32>
    %cst_47 = arith.constant 1.000000e+00 : f32
    %144 = vector.broadcast %cst_47 : f32 to vector<2x32xf32>
    %145 = arith.divf %144, %143 : vector<2x32xf32>
    %146 = arith.mulf %135, %112 : vector<2x32xf32>
    %147 = arith.mulf %127, %137 : vector<2x32xf32>
    %148 = arith.addf %146, %147 : vector<2x32xf32>
    %149 = math.tanh %148 : vector<2x32xf32>
    %150 = arith.mulf %145, %149 : vector<2x32xf32>
    %151 = vector.extract_strided_slice %6 {offsets = [0, 4, 0], sizes = [2, 1, 128], strides = [1, 1, 1]} : vector<2x8x128xf32> to vector<2x1x128xf32>
    %152 = vector.shape_cast %151 : vector<2x1x128xf32> to vector<2x128xf32>
    %153 = arith.truncf %150 : vector<2x32xf32> to vector<2x32xbf16>
    %cst_48 = arith.constant dense<0.000000e+00> : vector<2x128xf32>
    %154 = tpu.matmul %153, %5, %cst_48 {dimension_numbers = #tpu.dot_dimension_numbers<[1], [0], [0], [1], [0, 0, 1, 1], [], []>} : vector<2x32xbf16>, vector<32x128xbf16>, vector<2x128xf32> -> vector<2x128xf32>
    %155 = arith.addf %152, %154 : vector<2x128xf32>
    %156 = vector.extract_strided_slice %155 {offsets = [0, 0], sizes = [2, 32], strides = [1, 1]} : vector<2x128xf32> to vector<2x32xf32>
    %cst_49 = arith.constant 0.000000e+00 : f32
    %157 = vector.broadcast %cst_49 : f32 to vector<2x32xf32>
    %158 = arith.subf %157, %156 : vector<2x32xf32>
    %159 = math.exp %158 : vector<2x32xf32>
    %cst_50 = arith.constant 1.000000e+00 : f32
    %160 = vector.broadcast %cst_50 : f32 to vector<2x32xf32>
    %161 = arith.addf %160, %159 : vector<2x32xf32>
    %cst_51 = arith.constant 1.000000e+00 : f32
    %162 = vector.broadcast %cst_51 : f32 to vector<2x32xf32>
    %163 = arith.divf %162, %161 : vector<2x32xf32>
    %164 = vector.extract_strided_slice %155 {offsets = [0, 32], sizes = [2, 32], strides = [1, 1]} : vector<2x128xf32> to vector<2x32xf32>
    %cst_52 = arith.constant 0.000000e+00 : f32
    %165 = vector.broadcast %cst_52 : f32 to vector<2x32xf32>
    %166 = arith.subf %165, %164 : vector<2x32xf32>
    %167 = math.exp %166 : vector<2x32xf32>
    %cst_53 = arith.constant 1.000000e+00 : f32
    %168 = vector.broadcast %cst_53 : f32 to vector<2x32xf32>
    %169 = arith.addf %168, %167 : vector<2x32xf32>
    %cst_54 = arith.constant 1.000000e+00 : f32
    %170 = vector.broadcast %cst_54 : f32 to vector<2x32xf32>
    %171 = arith.divf %170, %169 : vector<2x32xf32>
    %172 = vector.extract_strided_slice %155 {offsets = [0, 64], sizes = [2, 32], strides = [1, 1]} : vector<2x128xf32> to vector<2x32xf32>
    %173 = math.tanh %172 : vector<2x32xf32>
    %174 = vector.extract_strided_slice %155 {offsets = [0, 96], sizes = [2, 32], strides = [1, 1]} : vector<2x128xf32> to vector<2x32xf32>
    %cst_55 = arith.constant 0.000000e+00 : f32
    %175 = vector.broadcast %cst_55 : f32 to vector<2x32xf32>
    %176 = arith.subf %175, %174 : vector<2x32xf32>
    %177 = math.exp %176 : vector<2x32xf32>
    %cst_56 = arith.constant 1.000000e+00 : f32
    %178 = vector.broadcast %cst_56 : f32 to vector<2x32xf32>
    %179 = arith.addf %178, %177 : vector<2x32xf32>
    %cst_57 = arith.constant 1.000000e+00 : f32
    %180 = vector.broadcast %cst_57 : f32 to vector<2x32xf32>
    %181 = arith.divf %180, %179 : vector<2x32xf32>
    %182 = arith.mulf %171, %148 : vector<2x32xf32>
    %183 = arith.mulf %163, %173 : vector<2x32xf32>
    %184 = arith.addf %182, %183 : vector<2x32xf32>
    %185 = math.tanh %184 : vector<2x32xf32>
    %186 = arith.mulf %181, %185 : vector<2x32xf32>
    %187 = vector.extract_strided_slice %6 {offsets = [0, 5, 0], sizes = [2, 1, 128], strides = [1, 1, 1]} : vector<2x8x128xf32> to vector<2x1x128xf32>
    %188 = vector.shape_cast %187 : vector<2x1x128xf32> to vector<2x128xf32>
    %189 = arith.truncf %186 : vector<2x32xf32> to vector<2x32xbf16>
    %cst_58 = arith.constant dense<0.000000e+00> : vector<2x128xf32>
    %190 = tpu.matmul %189, %5, %cst_58 {dimension_numbers = #tpu.dot_dimension_numbers<[1], [0], [0], [1], [0, 0, 1, 1], [], []>} : vector<2x32xbf16>, vector<32x128xbf16>, vector<2x128xf32> -> vector<2x128xf32>
    %191 = arith.addf %188, %190 : vector<2x128xf32>
    %192 = vector.extract_strided_slice %191 {offsets = [0, 0], sizes = [2, 32], strides = [1, 1]} : vector<2x128xf32> to vector<2x32xf32>
    %cst_59 = arith.constant 0.000000e+00 : f32
    %193 = vector.broadcast %cst_59 : f32 to vector<2x32xf32>
    %194 = arith.subf %193, %192 : vector<2x32xf32>
    %195 = math.exp %194 : vector<2x32xf32>
    %cst_60 = arith.constant 1.000000e+00 : f32
    %196 = vector.broadcast %cst_60 : f32 to vector<2x32xf32>
    %197 = arith.addf %196, %195 : vector<2x32xf32>
    %cst_61 = arith.constant 1.000000e+00 : f32
    %198 = vector.broadcast %cst_61 : f32 to vector<2x32xf32>
    %199 = arith.divf %198, %197 : vector<2x32xf32>
    %200 = vector.extract_strided_slice %191 {offsets = [0, 32], sizes = [2, 32], strides = [1, 1]} : vector<2x128xf32> to vector<2x32xf32>
    %cst_62 = arith.constant 0.000000e+00 : f32
    %201 = vector.broadcast %cst_62 : f32 to vector<2x32xf32>
    %202 = arith.subf %201, %200 : vector<2x32xf32>
    %203 = math.exp %202 : vector<2x32xf32>
    %cst_63 = arith.constant 1.000000e+00 : f32
    %204 = vector.broadcast %cst_63 : f32 to vector<2x32xf32>
    %205 = arith.addf %204, %203 : vector<2x32xf32>
    %cst_64 = arith.constant 1.000000e+00 : f32
    %206 = vector.broadcast %cst_64 : f32 to vector<2x32xf32>
    %207 = arith.divf %206, %205 : vector<2x32xf32>
    %208 = vector.extract_strided_slice %191 {offsets = [0, 64], sizes = [2, 32], strides = [1, 1]} : vector<2x128xf32> to vector<2x32xf32>
    %209 = math.tanh %208 : vector<2x32xf32>
    %210 = vector.extract_strided_slice %191 {offsets = [0, 96], sizes = [2, 32], strides = [1, 1]} : vector<2x128xf32> to vector<2x32xf32>
    %cst_65 = arith.constant 0.000000e+00 : f32
    %211 = vector.broadcast %cst_65 : f32 to vector<2x32xf32>
    %212 = arith.subf %211, %210 : vector<2x32xf32>
    %213 = math.exp %212 : vector<2x32xf32>
    %cst_66 = arith.constant 1.000000e+00 : f32
    %214 = vector.broadcast %cst_66 : f32 to vector<2x32xf32>
    %215 = arith.addf %214, %213 : vector<2x32xf32>
    %cst_67 = arith.constant 1.000000e+00 : f32
    %216 = vector.broadcast %cst_67 : f32 to vector<2x32xf32>
    %217 = arith.divf %216, %215 : vector<2x32xf32>
    %218 = arith.mulf %207, %184 : vector<2x32xf32>
    %219 = arith.mulf %199, %209 : vector<2x32xf32>
    %220 = arith.addf %218, %219 : vector<2x32xf32>
    %221 = math.tanh %220 : vector<2x32xf32>
    %222 = arith.mulf %217, %221 : vector<2x32xf32>
    %223 = vector.extract_strided_slice %6 {offsets = [0, 6, 0], sizes = [2, 1, 128], strides = [1, 1, 1]} : vector<2x8x128xf32> to vector<2x1x128xf32>
    %224 = vector.shape_cast %223 : vector<2x1x128xf32> to vector<2x128xf32>
    %225 = arith.truncf %222 : vector<2x32xf32> to vector<2x32xbf16>
    %cst_68 = arith.constant dense<0.000000e+00> : vector<2x128xf32>
    %226 = tpu.matmul %225, %5, %cst_68 {dimension_numbers = #tpu.dot_dimension_numbers<[1], [0], [0], [1], [0, 0, 1, 1], [], []>} : vector<2x32xbf16>, vector<32x128xbf16>, vector<2x128xf32> -> vector<2x128xf32>
    %227 = arith.addf %224, %226 : vector<2x128xf32>
    %228 = vector.extract_strided_slice %227 {offsets = [0, 0], sizes = [2, 32], strides = [1, 1]} : vector<2x128xf32> to vector<2x32xf32>
    %cst_69 = arith.constant 0.000000e+00 : f32
    %229 = vector.broadcast %cst_69 : f32 to vector<2x32xf32>
    %230 = arith.subf %229, %228 : vector<2x32xf32>
    %231 = math.exp %230 : vector<2x32xf32>
    %cst_70 = arith.constant 1.000000e+00 : f32
    %232 = vector.broadcast %cst_70 : f32 to vector<2x32xf32>
    %233 = arith.addf %232, %231 : vector<2x32xf32>
    %cst_71 = arith.constant 1.000000e+00 : f32
    %234 = vector.broadcast %cst_71 : f32 to vector<2x32xf32>
    %235 = arith.divf %234, %233 : vector<2x32xf32>
    %236 = vector.extract_strided_slice %227 {offsets = [0, 32], sizes = [2, 32], strides = [1, 1]} : vector<2x128xf32> to vector<2x32xf32>
    %cst_72 = arith.constant 0.000000e+00 : f32
    %237 = vector.broadcast %cst_72 : f32 to vector<2x32xf32>
    %238 = arith.subf %237, %236 : vector<2x32xf32>
    %239 = math.exp %238 : vector<2x32xf32>
    %cst_73 = arith.constant 1.000000e+00 : f32
    %240 = vector.broadcast %cst_73 : f32 to vector<2x32xf32>
    %241 = arith.addf %240, %239 : vector<2x32xf32>
    %cst_74 = arith.constant 1.000000e+00 : f32
    %242 = vector.broadcast %cst_74 : f32 to vector<2x32xf32>
    %243 = arith.divf %242, %241 : vector<2x32xf32>
    %244 = vector.extract_strided_slice %227 {offsets = [0, 64], sizes = [2, 32], strides = [1, 1]} : vector<2x128xf32> to vector<2x32xf32>
    %245 = math.tanh %244 : vector<2x32xf32>
    %246 = vector.extract_strided_slice %227 {offsets = [0, 96], sizes = [2, 32], strides = [1, 1]} : vector<2x128xf32> to vector<2x32xf32>
    %cst_75 = arith.constant 0.000000e+00 : f32
    %247 = vector.broadcast %cst_75 : f32 to vector<2x32xf32>
    %248 = arith.subf %247, %246 : vector<2x32xf32>
    %249 = math.exp %248 : vector<2x32xf32>
    %cst_76 = arith.constant 1.000000e+00 : f32
    %250 = vector.broadcast %cst_76 : f32 to vector<2x32xf32>
    %251 = arith.addf %250, %249 : vector<2x32xf32>
    %cst_77 = arith.constant 1.000000e+00 : f32
    %252 = vector.broadcast %cst_77 : f32 to vector<2x32xf32>
    %253 = arith.divf %252, %251 : vector<2x32xf32>
    %254 = arith.mulf %243, %220 : vector<2x32xf32>
    %255 = arith.mulf %235, %245 : vector<2x32xf32>
    %256 = arith.addf %254, %255 : vector<2x32xf32>
    %257 = math.tanh %256 : vector<2x32xf32>
    %258 = arith.mulf %253, %257 : vector<2x32xf32>
    %259 = vector.extract_strided_slice %6 {offsets = [0, 7, 0], sizes = [2, 1, 128], strides = [1, 1, 1]} : vector<2x8x128xf32> to vector<2x1x128xf32>
    %260 = vector.shape_cast %259 : vector<2x1x128xf32> to vector<2x128xf32>
    %261 = arith.truncf %258 : vector<2x32xf32> to vector<2x32xbf16>
    %cst_78 = arith.constant dense<0.000000e+00> : vector<2x128xf32>
    %262 = tpu.matmul %261, %5, %cst_78 {dimension_numbers = #tpu.dot_dimension_numbers<[1], [0], [0], [1], [0, 0, 1, 1], [], []>} : vector<2x32xbf16>, vector<32x128xbf16>, vector<2x128xf32> -> vector<2x128xf32>
    %263 = arith.addf %260, %262 : vector<2x128xf32>
    %264 = vector.extract_strided_slice %263 {offsets = [0, 0], sizes = [2, 32], strides = [1, 1]} : vector<2x128xf32> to vector<2x32xf32>
    %cst_79 = arith.constant 0.000000e+00 : f32
    %265 = vector.broadcast %cst_79 : f32 to vector<2x32xf32>
    %266 = arith.subf %265, %264 : vector<2x32xf32>
    %267 = math.exp %266 : vector<2x32xf32>
    %cst_80 = arith.constant 1.000000e+00 : f32
    %268 = vector.broadcast %cst_80 : f32 to vector<2x32xf32>
    %269 = arith.addf %268, %267 : vector<2x32xf32>
    %cst_81 = arith.constant 1.000000e+00 : f32
    %270 = vector.broadcast %cst_81 : f32 to vector<2x32xf32>
    %271 = arith.divf %270, %269 : vector<2x32xf32>
    %272 = vector.extract_strided_slice %263 {offsets = [0, 32], sizes = [2, 32], strides = [1, 1]} : vector<2x128xf32> to vector<2x32xf32>
    %cst_82 = arith.constant 0.000000e+00 : f32
    %273 = vector.broadcast %cst_82 : f32 to vector<2x32xf32>
    %274 = arith.subf %273, %272 : vector<2x32xf32>
    %275 = math.exp %274 : vector<2x32xf32>
    %cst_83 = arith.constant 1.000000e+00 : f32
    %276 = vector.broadcast %cst_83 : f32 to vector<2x32xf32>
    %277 = arith.addf %276, %275 : vector<2x32xf32>
    %cst_84 = arith.constant 1.000000e+00 : f32
    %278 = vector.broadcast %cst_84 : f32 to vector<2x32xf32>
    %279 = arith.divf %278, %277 : vector<2x32xf32>
    %280 = vector.extract_strided_slice %263 {offsets = [0, 64], sizes = [2, 32], strides = [1, 1]} : vector<2x128xf32> to vector<2x32xf32>
    %281 = math.tanh %280 : vector<2x32xf32>
    %282 = vector.extract_strided_slice %263 {offsets = [0, 96], sizes = [2, 32], strides = [1, 1]} : vector<2x128xf32> to vector<2x32xf32>
    %cst_85 = arith.constant 0.000000e+00 : f32
    %283 = vector.broadcast %cst_85 : f32 to vector<2x32xf32>
    %284 = arith.subf %283, %282 : vector<2x32xf32>
    %285 = math.exp %284 : vector<2x32xf32>
    %cst_86 = arith.constant 1.000000e+00 : f32
    %286 = vector.broadcast %cst_86 : f32 to vector<2x32xf32>
    %287 = arith.addf %286, %285 : vector<2x32xf32>
    %cst_87 = arith.constant 1.000000e+00 : f32
    %288 = vector.broadcast %cst_87 : f32 to vector<2x32xf32>
    %289 = arith.divf %288, %287 : vector<2x32xf32>
    %290 = arith.mulf %279, %256 : vector<2x32xf32>
    %291 = arith.mulf %271, %281 : vector<2x32xf32>
    %292 = arith.addf %290, %291 : vector<2x32xf32>
    %293 = math.tanh %292 : vector<2x32xf32>
    %294 = arith.mulf %289, %293 : vector<2x32xf32>
    %c0_88 = arith.constant 0 : index
    %c0_89 = arith.constant 0 : index
    %295 = vector.load %arg4[%c0_88, %c0_89] : memref<2x32xf32, #tpu.memory_space<vmem>>, vector<2x32xf32>
    tpu.vector_store %arg4[%c0_88, %c0_89], %294 {strides = array<i32>} : memref<2x32xf32, #tpu.memory_space<vmem>>, vector<2x32xf32>,
    %c0_90 = arith.constant 0 : index
    %c0_91 = arith.constant 0 : index
    %296 = vector.load %arg5[%c0_90, %c0_91] : memref<2x32xf32, #tpu.memory_space<vmem>>, vector<2x32xf32>
    tpu.vector_store %arg5[%c0_90, %c0_91], %292 {strides = array<i32>} : memref<2x32xf32, #tpu.memory_space<vmem>>, vector<2x32xf32>,
    %c0_i32_92 = arith.constant 0 : i32
    %297 = arith.cmpi eq, %arg0, %c0_i32_92 : i32
    %298 = arith.extui %297 : i1 to i32
    %c0_i32_93 = arith.constant 0 : i32
    %299 = arith.cmpi ne, %298, %c0_i32_93 : i32
    scf.if %299 {
      %c0_94 = arith.constant 0 : index
      %c0_95 = arith.constant 0 : index
      %300 = vector.load %arg3[%c0_94, %c0_95] : memref<2x32xf32, #tpu.memory_space<vmem>>, vector<2x32xf32>
      tpu.vector_store %arg3[%c0_94, %c0_95], %294 {strides = array<i32>} : memref<2x32xf32, #tpu.memory_space<vmem>>, vector<2x32xf32>,
    } else {
    }
    return
  }
  func.func @transform_0(%arg0: i32) -> (i32, i32, i32) {
    %c0_i32 = arith.constant 0 : i32
    %c0_i32_0 = arith.constant 0 : i32
    %c0_i32_1 = arith.constant 0 : i32
    return %c0_i32, %arg0, %c0_i32_0 : i32, i32, i32
  }
  func.func @transform_1(%arg0: i32) -> (i32, i32) {
    %c0_i32 = arith.constant 0 : i32
    %c0_i32_0 = arith.constant 0 : i32
    %c0_i32_1 = arith.constant 0 : i32
    return %c0_i32, %c0_i32_0 : i32, i32
  }
  func.func @transform_2(%arg0: i32) -> (i32, i32) {
    %c0_i32 = arith.constant 0 : i32
    %c0_i32_0 = arith.constant 0 : i32
    %c0_i32_1 = arith.constant 0 : i32
    return %c0_i32, %c0_i32_0 : i32, i32
  }
}

module attributes {stable_mosaic.version = 11 : i64} {
  func.func @_head_kernel(%arg0: memref<2x64xbf16, #tpu.memory_space<vmem>>, %arg1: memref<2x32xf32, #tpu.memory_space<vmem>>, %arg2: memref<64x128xbf16, #tpu.memory_space<vmem>>, %arg3: memref<1x128xf32, #tpu.memory_space<vmem>>, %arg4: memref<64x2xbf16, #tpu.memory_space<vmem>>, %arg5: memref<1x2xf32, #tpu.memory_space<vmem>>, %arg6: memref<2x2xf32, #tpu.memory_space<vmem>>) attributes {dimension_semantics = [], scalar_prefetch = 0 : i64, scratch_operands = 0 : i64, tpu.core_type = #tpu.core_type<tc>} {
    %c0 = arith.constant 0 : index
    %c0_0 = arith.constant 0 : index
    %0 = vector.load %arg0[%c0, %c0_0] : memref<2x64xbf16, #tpu.memory_space<vmem>>, vector<2x64xbf16>
    %c0_1 = arith.constant 0 : index
    %c0_2 = arith.constant 0 : index
    %1 = vector.load %arg2[%c0_1, %c0_2] : memref<64x128xbf16, #tpu.memory_space<vmem>>, vector<64x128xbf16>
    %cst = arith.constant dense<0.000000e+00> : vector<2x128xf32>
    %2 = tpu.matmul %0, %1, %cst {dimension_numbers = #tpu.dot_dimension_numbers<[1], [0], [0], [1], [0, 0, 1, 1], [], []>} : vector<2x64xbf16>, vector<64x128xbf16>, vector<2x128xf32> -> vector<2x128xf32>
    %c0_3 = arith.constant 0 : index
    %c0_4 = arith.constant 0 : index
    %3 = vector.load %arg3[%c0_3, %c0_4] : memref<1x128xf32, #tpu.memory_space<vmem>>, vector<1x128xf32>
    %4 = vector.broadcast %3 : vector<1x128xf32> to vector<2x128xf32>
    %5 = arith.addf %2, %4 : vector<2x128xf32>
    %6 = vector.extract_strided_slice %5 {offsets = [0, 0], sizes = [2, 32], strides = [1, 1]} : vector<2x128xf32> to vector<2x32xf32>
    %cst_5 = arith.constant 0.000000e+00 : f32
    %7 = vector.broadcast %cst_5 : f32 to vector<2x32xf32>
    %8 = arith.subf %7, %6 : vector<2x32xf32>
    %9 = math.exp %8 : vector<2x32xf32>
    %cst_6 = arith.constant 1.000000e+00 : f32
    %10 = vector.broadcast %cst_6 : f32 to vector<2x32xf32>
    %11 = arith.addf %10, %9 : vector<2x32xf32>
    %cst_7 = arith.constant 1.000000e+00 : f32
    %12 = vector.broadcast %cst_7 : f32 to vector<2x32xf32>
    %13 = arith.divf %12, %11 : vector<2x32xf32>
    %14 = vector.extract_strided_slice %5 {offsets = [0, 64], sizes = [2, 32], strides = [1, 1]} : vector<2x128xf32> to vector<2x32xf32>
    %15 = math.tanh %14 : vector<2x32xf32>
    %16 = vector.extract_strided_slice %5 {offsets = [0, 96], sizes = [2, 32], strides = [1, 1]} : vector<2x128xf32> to vector<2x32xf32>
    %cst_8 = arith.constant 0.000000e+00 : f32
    %17 = vector.broadcast %cst_8 : f32 to vector<2x32xf32>
    %18 = arith.subf %17, %16 : vector<2x32xf32>
    %19 = math.exp %18 : vector<2x32xf32>
    %cst_9 = arith.constant 1.000000e+00 : f32
    %20 = vector.broadcast %cst_9 : f32 to vector<2x32xf32>
    %21 = arith.addf %20, %19 : vector<2x32xf32>
    %cst_10 = arith.constant 1.000000e+00 : f32
    %22 = vector.broadcast %cst_10 : f32 to vector<2x32xf32>
    %23 = arith.divf %22, %21 : vector<2x32xf32>
    %24 = arith.mulf %13, %15 : vector<2x32xf32>
    %25 = math.tanh %24 : vector<2x32xf32>
    %26 = arith.mulf %23, %25 : vector<2x32xf32>
    %c0_11 = arith.constant 0 : index
    %c0_12 = arith.constant 0 : index
    %27 = vector.load %arg1[%c0_11, %c0_12] : memref<2x32xf32, #tpu.memory_space<vmem>>, vector<2x32xf32>
    %28 = arith.truncf %27 : vector<2x32xf32> to vector<2x32xbf16>
    %c0_13 = arith.constant 0 : index
    %c0_14 = arith.constant 0 : index
    %29 = vector.load %arg4[%c0_13, %c0_14] : memref<64x2xbf16, #tpu.memory_space<vmem>>, vector<32x2xbf16>
    %cst_15 = arith.constant dense<0.000000e+00> : vector<2x2xf32>
    %30 = tpu.matmul %28, %29, %cst_15 {dimension_numbers = #tpu.dot_dimension_numbers<[1], [0], [0], [1], [0, 0, 1, 1], [], []>} : vector<2x32xbf16>, vector<32x2xbf16>, vector<2x2xf32> -> vector<2x2xf32>
    %31 = arith.truncf %26 : vector<2x32xf32> to vector<2x32xbf16>
    %c32 = arith.constant 32 : index
    %c0_16 = arith.constant 0 : index
    %32 = vector.load %arg4[%c32, %c0_16] : memref<64x2xbf16, #tpu.memory_space<vmem>>, vector<32x2xbf16>
    %cst_17 = arith.constant dense<0.000000e+00> : vector<2x2xf32>
    %33 = tpu.matmul %31, %32, %cst_17 {dimension_numbers = #tpu.dot_dimension_numbers<[1], [0], [0], [1], [0, 0, 1, 1], [], []>} : vector<2x32xbf16>, vector<32x2xbf16>, vector<2x2xf32> -> vector<2x2xf32>
    %34 = arith.addf %30, %33 : vector<2x2xf32>
    %c0_18 = arith.constant 0 : index
    %c0_19 = arith.constant 0 : index
    %35 = vector.load %arg5[%c0_18, %c0_19] : memref<1x2xf32, #tpu.memory_space<vmem>>, vector<1x2xf32>
    %36 = vector.broadcast %35 : vector<1x2xf32> to vector<2x2xf32>
    %37 = arith.addf %34, %36 : vector<2x2xf32>
    %c0_20 = arith.constant 0 : index
    %c0_21 = arith.constant 0 : index
    %38 = vector.load %arg6[%c0_20, %c0_21] : memref<2x2xf32, #tpu.memory_space<vmem>>, vector<2x2xf32>
    tpu.vector_store %arg6[%c0_20, %c0_21], %37 {strides = array<i32>} : memref<2x2xf32, #tpu.memory_space<vmem>>, vector<2x2xf32>,
    return
  }
}

</mosaic_0001>

<bundles_post_ra>
// kernel: run.12
= control target key start
LH: loop header
LB: loop body
LE: loop exit
PB: predicated region body
PF: predicated region fallthrough
CT: control target
= control target key end

     0   :  { %vm18_vm0 = vcmask 523264   ;;  %vm70_vm1 = vcmask 519168   ;;  %s129_s0 = inlined_call_operand.vmem [shape: f32[16,64], index: 0, kind: input, shape index: {}]   ;;  %s130_s1 = inlined_call_operand.vmem [shape: f32[1,64], index: 1, kind: input, shape index: {}]   ;;  %s131_s2 = inlined_call_operand.vmem [shape: f32[1,64], index: 2, kind: input, shape index: {}]   ;;  %s132_s3 = inlined_call_operand.vmem [shape: bf16[16,64], index: 3, kind: output, shape index: {}]  }
   0x1   :  { %v14_v0 = vld [vmem:[%s129_s0] sm:$0xff]  ;;  %v15_v1 = vld [vmem:[%s129_s0 + $0x8] sm:$0xff] }
   0x2   :  { %v19_v2 = vsel %vm18_vm0, %v14_v0, 0.0  ;;  %v22_v3 = vsel %vm18_vm0, %v15_v1, 0.0  ;;  %v77_v21 = vld [vmem:[%s130_s1] ss:$0 sm:$0xff] }
   0x3   :  { %20 = vadd.xlane.f32.xlu0 %v19_v2  ;;  %v78_v23 = vld [vmem:[%s131_s2] ss:$0 sm:$0xff] }
   0x7   :  { %23 = vadd.xlane.f32.xlu0 %v22_v3 }
  0x90   :  { %v21_v4 = vpop.xlane.xlu0 %20 }
  0x91   :  { %v26_v5 = vmul.f32 0.015625, %v21_v4 }
  0x93   :  { %v28_v6 = vsub.f32 %v14_v0, %v26_v5 }
  0x94   :  { %v24_v7 = vpop.xlane.xlu0 %23 }
  0x95   :  { %v27_v8 = vmul.f32 0.015625, %v24_v7  ;;  %v30_v9 = vmul.f32 %v28_v6, %v28_v6 }
  0x97   :  { %v29_v10 = vsub.f32 %v15_v1, %v27_v8  ;;  %v32_v11 = vsel %vm18_vm0, %v30_v9, 0.0 }
  0x98   :  { %33 = vadd.xlane.f32.xlu1 %v32_v11 }
  0x99   :  { %v31_v12 = vmul.f32 %v29_v10, %v29_v10 }
  0x9b   :  { %v35_v13 = vsel %vm18_vm0, %v31_v12, 0.0 }
  0x9c   :  { %36 = vadd.xlane.f32.xlu1 %v35_v13 }
 0x125   :  { %v34_v14 = vpop.xlane.xlu1 %33 }
 0x126   :  { %v38_v15 = vmul.f32 0.015625, %v34_v14 }
 0x128   :  { %v40_v16 = vadd.f32 1e-12, %v38_v15 }
 0x129   :  { %v37_v17 = vpop.xlane.xlu1 %36 }
 0x12a   :  { %83 = vrsqrt.f32 %v40_v16  ;;  %v39_v18 = vmul.f32 0.015625, %v37_v17 }
 0x12c   :  { %v41_v19 = vadd.f32 1e-12, %v39_v18 }
 0x12e   :  { %85 = vrsqrt.f32 %v41_v19 }
 0x134   :  { %v84_v20 = vpop.eup %83 }
 0x135   :  { %v44_v22 = vmul.f32 %v84_v20, %v28_v6 }
 0x137   :  { %v52_v24 = vmul.f32 %v77_v21, %v44_v22 }
 0x138   :  { %v86_v25 = vpop.eup %85 }
 0x139   :  { %v60_v26 = vadd.f32 %v78_v23, %v52_v24  ;;  %v45_v27 = vmul.f32 %v86_v25, %v29_v10 }
 0x13b   :  { %v81_v28 = vpack.c.bf16 %v60_v26, %v60_v26  ;;  %v53_v29 = vmul.f32 %v77_v21, %v45_v27 }
 0x13d   :  { %71 = vst.msk [vmem:[%s132_s3] sm:$0xf] %vm70_vm1, %v81_v28  ;;  %v61_v30 = vadd.f32 %v78_v23, %v53_v29 }
 0x13f   :  { %v82_v31 = vpack.c.bf16 %v61_v30, %v61_v30 }
 0x141   :  { %72 = vst.msk [vmem:[%s132_s3 + $0x4] sm:$0xf] %vm70_vm1, %v82_v31 }

// kernel: run.15
= control target key start
LH: loop header
LB: loop body
LE: loop exit
PB: predicated region body
PF: predicated region fallthrough
CT: control target
= control target key end

     0   :  { %vm28_vm0 = vcmask 523264   ;;  %v246_v0 = vmov 0.0   ;;  %vm247_vm1 = vmmov 0   ;;  %vm194_vm2 = vcmask 519168   ;;  %s325_s1 = inlined_call_operand.vmem [shape: bf16[64,64], index: 1, kind: input, shape index: {}]   ;;  %s326_s0 = inlined_call_operand.vmem [shape: bf16[16,64], index: 0, kind: input, shape index: {}]   ;;  %s327_s3 = inlined_call_operand.vmem [shape: bf16[16,64], index: 3, kind: input, shape index: {}]   ;;  %s328_s2 = inlined_call_operand.vmem [shape: f32[1,64], index: 2, kind: input, shape index: {}]   ;;  %s329_s4 = inlined_call_operand.vmem [shape: f32[1,64], index: 4, kind: input, shape index: {}]   ;;  %s330_s5 = inlined_call_operand.vmem [shape: f32[1,64], index: 5, kind: input, shape index: {}]   ;;  %s331_s6 = inlined_call_operand.vmem [shape: bf16[16,64], index: 6, kind: output, shape index: {}]  }
   0x1   :  { %223 = vmatprep.subr.bf16.mxu0 %v246_v0  ;;  %v237_v1 = vld [vmem:[%s325_s1] sm:$0xff]   ;;  %231 = vmatprep.mubr.msk.bf16.mxu0 %vm247_vm1, %v246_v0  ;;  %29 = vst.msk [vmem:[#allocation2] sm:$0xff] %vm28_vm0, %v246_v0  ;;  %30 = vst.msk [vmem:[#allocation2 + $0x8] sm:$0xff] %vm28_vm0, %v246_v0  ;;  %v238_v2 = vld [vmem:[%s325_s1 + $0x8] sm:$0xff]  }
   0x2   :  { %224 = vmatpush3.bf16.msra.mxu0 %v237_v1  ;;  %v239_v3 = vld [vmem:[%s325_s1 + $0x10] sm:$0xff]   ;;  %v240_v4 = vld [vmem:[%s325_s1 + $0x18] sm:$0xff]   ;;  %v241_v5 = vld [vmem:[%s326_s0] sm:$0xff]  }
   0x3   :  { %225 = vmatprep.subr.bf16.mxu0 %v246_v0  ;;  %v215_v14 = vld [vmem:[%s327_s3] sm:$0xff]  }
   0x4   :  { %v207_v15 = vld [vmem:[%s328_s2] ss:$0 sm:$0xff]  ;;  %v216_v16 = vunpack.c.l.bf16 %v215_v14  ;;  %v217_v19 = vunpack.c.h.bf16 %v215_v14 }
   0x5   :  { %v208_v43 = vld [vmem:[%s329_s4] ss:$0 sm:$0xff] }
   0x6   :  { %226 = vmatpush3.bf16.msra.mxu0 %v238_v2  ;;  %v209_v45 = vld [vmem:[%s330_s5] ss:$0 sm:$0xff] }
   0x7   :  { %227 = vmatprep.subr.bf16.mxu0 %v246_v0 }
   0x8   :  { %v31_v6 = vld [vmem:[#allocation2] sm:$0xff]  ;;  %v32_v8 = vld [vmem:[#allocation2 + $0x8] sm:$0xff] }
   0xa   :  { %228 = vmatpush3.bf16.msra.mxu0 %v239_v3 }
   0xb   :  { %229 = vmatprep.subr.bf16.mxu0 %v246_v0 }
   0xe   :  { %230 = vmatpush3.bf16.msra.mxu0 %v240_v4 }
  0x11   :  { %232 = vmatmul.mubr.msk.bf16.vlgmr.msra.gmra.mrb[0].mxu0 %vm28_vm0, %v241_v5 }
  0xe4   :  { %v110_v7 = vpop.f32.mrb[0].mxu0 }
  0xe5   :  { %v117_v9 = vadd.f32 %v110_v7, %v31_v6  ;;  %v233_v10 = vpop.f32.mrb[1].mxu0 }
  0xe6   :  { %v113_v11 = vpop.f32.mrb[2].mxu0 }
  0xe7   :  { %119 = vst.msk [vmem:[#allocation2] sm:$0xff] %vm28_vm0, %v117_v9  ;;  %v118_v12 = vadd.f32 %v113_v11, %v32_v8  ;;  %v234_v13 = vpop.f32.mrb[3].mxu0 }
  0xe9   :  { %120 = vst.msk [vmem:[#allocation2 + $0x8] sm:$0xff] %vm28_vm0, %v118_v12 }
  0xee   :  { %v124_v17 = vld [vmem:[#allocation2] sm:$0xff] }
  0xef   :  { %v133_v18 = vadd.f32 %v207_v15, %v124_v17 }
  0xf0   :  { %v125_v20 = vld [vmem:[#allocation2 + $0x8] sm:$0xff] }
  0xf1   :  { %v139_v21 = vadd.f32 %v216_v16, %v133_v18  ;;  %v134_v22 = vadd.f32 %v207_v15, %v125_v20 }
  0xf3   :  { %v143_v23 = vsel %vm28_vm0, %v139_v21, 0.0  ;;  %v140_v24 = vadd.f32 %v217_v19, %v134_v22 }
  0xf4   :  { %144 = vadd.xlane.f32.xlu0 %v143_v23 }
  0xf5   :  { %v146_v25 = vsel %vm28_vm0, %v140_v24, 0.0 }
  0xf8   :  { %147 = vadd.xlane.f32.xlu0 %v146_v25 }
 0x181   :  { %v145_v26 = vpop.xlane.xlu0 %144 }
 0x182   :  { %v150_v27 = vmul.f32 0.015625, %v145_v26 }
 0x184   :  { %v152_v28 = vsub.f32 %v139_v21, %v150_v27 }
 0x185   :  { %v148_v29 = vpop.xlane.xlu0 %147 }
 0x186   :  { %v151_v30 = vmul.f32 0.015625, %v148_v29  ;;  %v154_v31 = vmul.f32 %v152_v28, %v152_v28 }
 0x188   :  { %v153_v32 = vsub.f32 %v140_v24, %v151_v30  ;;  %v156_v33 = vsel %vm28_vm0, %v154_v31, 0.0 }
 0x189   :  { %157 = vadd.xlane.f32.xlu1 %v156_v33 }
 0x18a   :  { %v155_v34 = vmul.f32 %v153_v32, %v153_v32 }
 0x18c   :  { %v159_v35 = vsel %vm28_vm0, %v155_v34, 0.0 }
 0x18d   :  { %160 = vadd.xlane.f32.xlu1 %v159_v35 }
 0x216   :  { %v158_v36 = vpop.xlane.xlu1 %157 }
 0x217   :  { %v162_v37 = vmul.f32 0.015625, %v158_v36 }
 0x219   :  { %v164_v38 = vadd.f32 1e-12, %v162_v37 }
 0x21a   :  { %v161_v39 = vpop.xlane.xlu1 %160 }
 0x21b   :  { %242 = vrsqrt.f32 %v164_v38  ;;  %v163_v40 = vmul.f32 0.015625, %v161_v39 }
 0x21d   :  { %v165_v41 = vadd.f32 1e-12, %v163_v40 }
 0x21f   :  { %244 = vrsqrt.f32 %v165_v41 }
 0x225   :  { %v243_v42 = vpop.eup %242 }
 0x226   :  { %v168_v44 = vmul.f32 %v243_v42, %v152_v28 }
 0x228   :  { %v176_v46 = vmul.f32 %v208_v43, %v168_v44 }
 0x229   :  { %v245_v47 = vpop.eup %244 }
 0x22a   :  { %v184_v48 = vadd.f32 %v209_v45, %v176_v46  ;;  %v169_v49 = vmul.f32 %v245_v47, %v153_v32 }
 0x22c   :  { %v212_v50 = vpack.c.bf16 %v184_v48, %v184_v48  ;;  %v177_v51 = vmul.f32 %v208_v43, %v169_v49 }
 0x22e   :  { %195 = vst.msk [vmem:[%s331_s6] sm:$0xf] %vm194_vm2, %v212_v50  ;;  %v185_v52 = vadd.f32 %v209_v45, %v177_v51 }
 0x230   :  { %v213_v53 = vpack.c.bf16 %v185_v52, %v185_v52 }
 0x232   :  { %196 = vst.msk [vmem:[%s331_s6 + $0x4] sm:$0xf] %vm194_vm2, %v213_v53 }

// kernel: run.13
= control target key start
LH: loop header
LB: loop body
LE: loop exit
PB: predicated region body
PF: predicated region fallthrough
CT: control target
= control target key end

     0   :  { %vm20_vm0 = vcmask 523264   ;;  %v211_v1 = vmov 0   ;;  %v212_v2 = vmov 0.0   ;;  %v147_v11 = vlaneseq  ;;  %s274_s1 = inlined_call_operand.vmem [shape: bf16[64,192], index: 1, kind: input, shape index: {}]   ;;  %s275_s0 = inlined_call_operand.vmem [shape: bf16[16,64], index: 0, kind: input, shape index: {}]   ;;  %s276_s2 = inlined_call_operand.vmem [shape: f32[1,192], index: 2, kind: input, shape index: {}]   ;;  %s277_s3 = inlined_call_operand.vmem [shape: bf16[16,192], index: 3, kind: output, shape index: {}]  }
   0x1   :  { %v198_v0 = vld [vmem:[%s274_s1 + $0x4] ss:$8 sps:$4 sm:$0xff]   ;;  %119 = vmatprep.mubr.bf16.mxu0 %v211_v1  ;;  %21 = vst.msk [vmem:[#allocation2 + $0x8] sm:$0xff] %vm20_vm0, %v212_v2  ;;  %23 = vst.msk [vmem:[#allocation2 + $0x18] sm:$0xff] %vm20_vm0, %v212_v2  ;;  %v200_v3 = vld [vmem:[%s274_s1] ss:$8 sps:$4 sm:$0xff]  }
   0x2   :  { %87 = vmatprep.subr.bf16.mxu0 %v198_v0  ;;  %v201_v4 = vld [vmem:[%s274_s1 + $0x14] ss:$8 sps:$4 sm:$0xff]   ;;  %v203_v5 = vld [vmem:[%s274_s1 + $0x10] ss:$8 sps:$4 sm:$0xff]   ;;  %v204_v6 = vld [vmem:[%s274_s1 + $0x24] ss:$8 sps:$4 sm:$0xff]  }
   0x3   :  { %88 = vmatpush1.bf16.msra.mxu0 %v200_v3  ;;  %v206_v7 = vld [vmem:[%s274_s1 + $0x20] ss:$8 sps:$4 sm:$0xff]   ;;  %v207_v8 = vld [vmem:[%s274_s1 + $0x34] ss:$8 sps:$4 sm:$0xff]   ;;  %v209_v9 = vld [vmem:[%s274_s1 + $0x30] ss:$8 sps:$4 sm:$0xff]  }
   0x4   :  { %89 = vmatprep.subr.bf16.mxu0 %v201_v4  ;;  %v210_v10 = vld [vmem:[%s275_s0] sm:$0xff]   ;;  %v148_v14 = vshrl.u32 %v147_v11, 7  ;;  %vm173_vm1 = vcmask 1043456   ;;  %vm174_vm2 = vcmask 523268  }
   0x5   :  { %v145_v23 = vld [vmem:[%s276_s2] sm:$0x3]  ;;  %vm175_vm3 = vmor %vm174_vm2, %vm173_vm1 }
   0x6   :  { %v149_v20 = vsub.s32 0, %v148_v14  ;;  %v153_v21 = vsub.s32 1, %v148_v14 }
   0x7   :  { %90 = vmatpush1.bf16.msra.mxu0 %v203_v5 }
   0x8   :  { %91 = vmatprep.subr.bf16.mxu0 %v204_v6  ;;  %v25_v12 = vld [vmem:[#allocation2 + $0x8] sm:$0xff]  ;;  %v27_v16 = vld [vmem:[#allocation2 + $0x18] sm:$0xff]  ;;  %v150_v24 = vrot.slane %v145_v23, %v149_v20  ;;  %v154_v25 = vrot.slane %v145_v23, %v153_v21 }
   0xb   :  { %92 = vmatpush1.bf16.msra.mxu0 %v206_v7 }
   0xc   :  { %93 = vmatprep.subr.bf16.mxu0 %v207_v8 }
   0xf   :  { %94 = vmatpush1.bf16.msra.mxu0 %v209_v9 }
  0x12   :  { %191 = vmatmul.mubr.msk.bf16.vlgmr.msra.gmra.mrb[0].mxu0 %vm20_vm0, %v210_v10 }
  0xe5   :  { %v121_v13 = vpop.f32.mrb[0].mxu0 }
  0xe6   :  { %v123_v15 = vpop.f32.mrb[1].mxu0  ;;  %v157_v27 = vadd.f32 %v150_v24, %v121_v13 }
  0xe7   :  { %v131_v17 = vadd.f32 %v123_v15, %v25_v12  ;;  %v125_v18 = vpop.f32.mrb[2].mxu0 }
  0xe8   :  { %v127_v19 = vpop.f32.mrb[3].mxu0  ;;  %v159_v31 = vadd.f32 %v150_v24, %v125_v18 }
  0xe9   :  { %135 = vst.msk [vmem:[#allocation2 + $0x8] sm:$0xff] %vm20_vm0, %v131_v17  ;;  %v133_v22 = vadd.f32 %v127_v19, %v27_v16 }
  0xeb   :  { %137 = vst.msk [vmem:[#allocation2 + $0x18] sm:$0xff] %vm20_vm0, %v133_v22 }
  0xf0   :  { %v142_v26 = vld [vmem:[#allocation2 + $0x8] sm:$0xff] }
  0xf1   :  { %v158_v28 = vadd.f32 %v154_v25, %v142_v26 }
  0xf2   :  { %v144_v29 = vld [vmem:[#allocation2 + $0x18] sm:$0xff] }
  0xf3   :  { %v194_v30 = vpack.c.bf16 %v158_v28, %v157_v27  ;;  %v160_v32 = vadd.f32 %v154_v25, %v144_v29 }
  0xf5   :  { %176 = vst.msk [vmem:[%s277_s3] sm:$0xff] %vm175_vm3, %v194_v30  ;;  %v195_v33 = vpack.c.bf16 %v160_v32, %v159_v31 }
  0xf7   :  { %177 = vst.msk [vmem:[%s277_s3 + $0x8] sm:$0xff] %vm175_vm3, %v195_v33 }

// kernel: run.14
= control target key start
LH: loop header
LB: loop body
LE: loop exit
PB: predicated region body
PF: predicated region fallthrough
CT: control target
= control target key end

     0   :  { %s856_s9 = smov 0   ;;  %s965_s0 = inlined_call_operand.vmem [shape: bf16[16,192], index: 0, kind: input, shape index: {}]   ;;  %s966_s1 = inlined_call_operand.vmem [shape: f32[2,1,8], index: 1, kind: input, shape index: {}]   ;;  %s967_s2 = inlined_call_operand.vmem [shape: bf16[16,64], index: 2, kind: output, shape index: {}]  }
   0x1 LB: > { %s702_s10 = sadd.s32 4294967295, %s829_s9   ;;  %p706_p0 = scmp.ge.s32.totalorder %s829_s9, 1  ;;  %s829_s9 = sphi %s856_s9, %s12_s9  }
   0x2   : > { %p120_p1 = scmp.lt.s32.totalorder %s829_s9, 3 }
   0x4   : > { %p121_p2 = pnand %p706_p0, %p120_p1 }
   0x5   : > { %p144_p3 = scmp.lt.s32.totalorder (!%p121_p2), %s702_s10, 1  ;;  %v831_v0 = vmov (!%p121_p2), 0.0   ;;  %vm832_vm0 = vmmov (!%p121_p2), 0   ;;  %s833_s15 = smov (!%p121_p2), 64   ;;  %vm165_vm1 = vcmask (!%p121_p2), 130048   ;;  %v215_v5 = vlaneseq (!%p121_p2) }
   0x6   : > { %124 = sbr.rel (%p121_p2) target bundleno = 1559 (0x617), region = 28  ;;  %739 = vmatprep.subr.bf16.mxu0 (!%p121_p2), %v831_v0  ;;  %741 = vmatprep.mubr.msk.bf16.mxu0 (!%p121_p2), %vm832_vm0, %v831_v0  ;;  %s834_s16 = smov (!%p121_p2), 48   ;;  %v835_v9 = vmov (!%p121_p2), 0   ;;  %vm221_vm4 = vcmask (!%p121_p2), 64512   ;;  %vm237_vm5 = vcmask (!%p121_p2), 1043456   ;;  %vm633_vm6 = vcmask (!%p121_p2), 261120  }
   0x7   : > { %745 = vmatprep.subr.bf16.mxu1 (!%p121_p2), %v831_v0  ;;  %747 = vmatprep.mubr.msk.bf16.mxu1 (!%p121_p2), %vm832_vm0, %v831_v0  ;;  %v216_v7 = vshrl.u32 (!%p121_p2), %v215_v5, 7  ;;  %s836_s20 = smov (!%p121_p2), 80   ;;  %s837_s21 = smov (!%p121_p2), 112   ;;  %vm635_vm7 = vcmask (!%p121_p2), 392192   ;;  %vm638_vm8 = vcmask (!%p121_p2), 519168  }
   0x8   : > { %s838_s22 = smov (!%p121_p2), 32   ;;  %s839_s23 = smov (!%p121_p2), 96  }
   0x9   : > { %v217_v8 = vsub.s32 (!%p121_p2), 0, %v216_v7  ;;  %s840_s24 = smov (!%p121_p2), 16  }
   0xd   : > { %s969_s10 = smov (!%p144_p3, %s702_s10), 1 }
   0xe   : > { %s722_s11 = sshll.u32 %s969_s10, 3  ;;  %s151_s19 = scalar_lea.vmem %s966_s1, %s969_s10 }
   0xf   : > { %s876_s14 = scalar_lea.vmem %s965_s0, %s722_s11  ;;  %v157_v6 = vld [vmem:[%s151_s19] sm:$0x1]  ;;  %s709_s25 = sshll.u32 %s969_s10, 2 }
  0x10   : > { %v158_v1 = vld [vmem:[%s876_s14] sm:$0xf]  ;;  %vm213_vm2 = vcmp.gt.f32.partialorder %v157_v6, 0.0  ;;  %v898_v24 = vld [vmem:[%s876_s14 + $0x4] sm:$0xf]  ;;  %s155_s28 = scalar_lea.vmem %s967_s2, %s709_s25 }
  0x11   : > { %v710_v2 = vcombine.low %v158_v1, %v158_v1  ;;  %v214_v10 = vsel %vm213_vm2, 1, %v835_v9  ;;  %v239_v25 = vsel %vm237_vm5, %v898_v24, 0 }
  0x12   : > { %v889_v11 = vrot.slane %v214_v10, %v217_v8  ;;  %746 = vmatpush3.bf16.msra.mxu1 %v239_v25 }
  0x13   : > { %163 = vrot.lane.b32.xlu0 %v710_v2, %s833_s15  ;;  %283 = vrot.lane.b32.xlu1 %v710_v2, %s834_s16 }
  0x14   : > { %vm219_vm3 = vcmp.eq.s32.totalorder %v889_v11, 1  ;;  %751 = vmatprep.subr.bf16.mxu1 %v831_v0 }
  0x85   : > { %v164_v3 = vpop.permute.xlu0 %163  ;;  %v284_v26 = vpop.permute.xlu1 %283 }
  0x86   : > { %v170_v4 = vsel %vm165_vm1, %v164_v3, 0  ;;  %v289_v33 = vsel %vm165_vm1, %v284_v26, 0 }
  0x87   : > { %740 = vmatpush3.bf16.xpose.msra.mxu0 %v170_v4 }
  0x88   : > { %757 = vmatprep.subr.bf16.mxu0 %v831_v0 }
  0x8e   : > { %742 = vmatmul.mubr.msk.bf16.vlgmr.msra.gmra.mrb[0].mxu0 %vm165_vm1, %v158_v1  ;;  %v714_v1 = vcombine.low %v898_v24, %v898_v24 }
  0x8f   : > { %759 = vmatprep.mubr.msk.bf16.mxu0 %vm832_vm0, %v831_v0 }
 0x161   : > { %v206_v12 = vpop.f32.mrb[0].mxu0 }
 0x162   : > { %v212_v13 = vmul.f32 0.25, %v206_v12  ;;  %v743_v14 = vpop.f32.mrb[1].mxu0 }
 0x163   : > { %v209_v15 = vpop.f32.mrb[2].mxu0 }
 0x164   : > { %v744_v16 = vpop.f32.mrb[3].mxu0  ;;  %v220_v17 = vsel %vm219_vm3, %v212_v13, -1e+09 }
 0x165   : > { %v222_v18 = vsel %vm221_vm4, %v220_v17, -inf }
 0x166   : > { %223 = vmax.xlane.f32.xlu0 %v222_v18 }
 0x17c   : > { %508 = vrot.lane.b32.xlu0 %v710_v2, %s836_s20 }
 0x1f3   : > { %v224_v19 = vpop.xlane.xlu0 %223 }
 0x1f4   : > { %v225_v20 = vsub.f32 %v220_v17, %v224_v19 }
 0x1f6   : > { %v226_v21 = vmul.f32 1.442695, %v225_v20 }
 0x1f7   : > { %v509_v38 = vpop.permute.xlu0 %508 }
 0x1f8   : > { %807 = vpow2.f32 %v226_v21 }
 0x202   : > { %v808_v22 = vpop.eup %807 }
 0x203   : > { %v228_v23 = vsel %vm221_vm4, %v808_v22, 0.0 }
 0x204   : > { %229 = vadd.xlane.f32.xlu1 %v228_v23 }
 0x215   : > { %281 = vrot.lane.b32.xlu1 %v710_v2, %s837_s21 }
 0x219   : > { %398 = vrot.lane.b32.xlu1 %v710_v2, %s838_s22 }
 0x21d   : > { %396 = vrot.lane.b32.xlu1 %v710_v2, %s839_s23 }
 0x221   : > { %510 = vrot.lane.b32.xlu1 %v710_v2, %s840_s24 }
 0x291   : > { %v230_v27 = vpop.xlane.xlu1 %229 }
 0x292   : > { %809 = vrcp.f32 %v230_v27 }
 0x295   : > { %v282_v28 = vpop.permute.xlu1 %281 }
 0x299   : > { %v399_v32 = vpop.permute.xlu1 %398 }
 0x29a   : > { %v404_v35 = vsel %vm165_vm1, %v399_v32, 0 }
 0x29c   : > { %v810_v29 = vpop.eup %809 }
 0x29d   : > { %v232_v30 = vmul.f32 %v810_v29, %v808_v22  ;;  %v397_v34 = vpop.permute.xlu1 %396 }
 0x29f   : > { %v233_v31 = vpack.c.bf16 %v232_v30, %v232_v30 }
 0x2a1   : > { %748 = vmatmul.mubr.msk.bf16.vlgmr.msra.gmra.mrb[0].mxu1 %vm221_vm4, %v233_v31  ;;  %v511_v36 = vpop.permute.xlu1 %510 }
 0x2a2   : > { %752 = vmatpush3.bf16.xpose.msra.mxu1 %v289_v33  ;;  %753 = vmatprep.mubr.msk.bf16.mxu1 %vm832_vm0, %v831_v0  ;;  %v516_v37 = vsel %vm165_vm1, %v511_v36, 0 }
 0x2a3   : > { %763 = vmatprep.subr.bf16.mxu1 %v831_v0 }
 0x2a9   : > { %754 = vmatmul.mubr.msk.bf16.vlgmr.msra.gmra.mrb[4].mxu1 %vm165_vm1, %v282_v28 }
 0x2aa   : > { %764 = vmatpush3.bf16.xpose.msra.mxu1 %v404_v35  ;;  %765 = vmatprep.mubr.msk.bf16.mxu1 %vm832_vm0, %v831_v0 }
 0x2ab   : > { %775 = vmatprep.subr.bf16.mxu1 %v831_v0 }
 0x2b1   : > { %766 = vmatmul.mubr.msk.bf16.vlgmr.msra.gmra.mrb[8].mxu1 %vm165_vm1, %v397_v34 }
 0x2b2   : > { %776 = vmatpush3.bf16.xpose.msra.mxu1 %v516_v37  ;;  %777 = vmatprep.mubr.msk.bf16.mxu1 %vm832_vm0, %v831_v0 }
 0x2b9   : > { %778 = vmatmul.mubr.msk.bf16.vlgmr.msra.gmra.mrb[12].mxu1 %vm165_vm1, %v509_v38 }
 0x374   : > { %v922_v39 = vpop.f32.mrb[0].mxu1 }
 0x375   : > { %v749_v40 = vpop.f32.mrb[1].mxu1 }
 0x376   : > { %v278_v41 = vpop.f32.mrb[2].mxu1 }
 0x377   : > { %v750_v42 = vpop.f32.mrb[3].mxu1 }
 0x37c   : > { %v325_v43 = vpop.f32.mrb[4].mxu1 }
 0x37d   : > { %v331_v44 = vmul.f32 0.25, %v325_v43  ;;  %v755_v45 = vpop.f32.mrb[5].mxu1 }
 0x37e   : > { %v328_v46 = vpop.f32.mrb[6].mxu1 }
 0x37f   : > { %v756_v47 = vpop.f32.mrb[7].mxu1  ;;  %v332_v48 = vsel %vm219_vm3, %v331_v44, -1e+09 }
 0x380   : > { %v333_v49 = vsel %vm221_vm4, %v332_v48, -inf }
 0x381   : > { %334 = vmax.xlane.f32.xlu1 %v333_v49 }
 0x384   : > { %v440_v50 = vpop.f32.mrb[8].mxu1 }
 0x385   : > { %v446_v51 = vmul.f32 0.25, %v440_v50  ;;  %v767_v52 = vpop.f32.mrb[9].mxu1 }
 0x386   : > { %v443_v53 = vpop.f32.mrb[10].mxu1 }
 0x387   : > { %v768_v54 = vpop.f32.mrb[11].mxu1  ;;  %v447_v55 = vsel %vm219_vm3, %v446_v51, -1e+09 }
 0x388   : > { %v448_v56 = vsel %vm221_vm4, %v447_v55, -inf }
 0x389   : > { %449 = vmax.xlane.f32.xlu0 %v448_v56 }
 0x38c   : > { %v552_v57 = vpop.f32.mrb[12].mxu1 }
 0x38d   : > { %v558_v58 = vmul.f32 0.25, %v552_v57  ;;  %v779_v59 = vpop.f32.mrb[13].mxu1 }
 0x38e   : > { %v555_v60 = vpop.f32.mrb[14].mxu1 }
 0x38f   : > { %v780_v61 = vpop.f32.mrb[15].mxu1  ;;  %v559_v62 = vsel %vm219_vm3, %v558_v58, -1e+09 }
 0x390   : > { %v560_v63 = vsel %vm221_vm4, %v559_v62, -inf }
 0x391   : > { %561 = vmax.xlane.f32.xlu1 %v560_v63 }
 0x39f   : > { %348 = vrot.lane.b32.xlu0 %v714_v1, %s837_s21 }
 0x3a2   : > { %460 = vrot.lane.b32.xlu1 %v714_v1, %s839_s23 }
 0x40e   : > { %v335_v2 = vpop.xlane.xlu1 %334 }
 0x40f   : > { %v336_v3 = vsub.f32 %v332_v48, %v335_v2 }
 0x411   : > { %v337_v4 = vmul.f32 1.442695, %v336_v3 }
 0x413   : > { %811 = vpow2.f32 %v337_v4 }
 0x416   : > { %v450_v5 = vpop.xlane.xlu0 %449 }
 0x417   : > { %v451_v6 = vsub.f32 %v447_v55, %v450_v5 }
 0x419   : > { %v452_v7 = vmul.f32 1.442695, %v451_v6 }
 0x41a   : > { %v349_v17 = vpop.permute.xlu0 %348 }
 0x41b   : > { %813 = vpow2.f32 %v452_v7  ;;  %v354_v18 = vsel %vm237_vm5, %v349_v17, 0 }
 0x41c   : > { %758 = vmatpush3.bf16.msra.mxu0 %v354_v18 }
 0x41d   : > { %v812_v8 = vpop.eup %811  ;;  %769 = vmatprep.subr.bf16.mxu0 %v831_v0 }
 0x41e   : > { %v562_v9 = vpop.xlane.xlu1 %561  ;;  %v339_v10 = vsel %vm221_vm4, %v812_v8, 0.0 }
 0x41f   : > { %v563_v11 = vsub.f32 %v559_v62, %v562_v9  ;;  %340 = vadd.xlane.f32.xlu1 %v339_v10 }
 0x421   : > { %v564_v12 = vmul.f32 1.442695, %v563_v11 }
 0x422   : > { %v461_v19 = vpop.permute.xlu1 %460 }
 0x423   : > { %815 = vpow2.f32 %v564_v12  ;;  %v466_v25 = vsel %vm237_vm5, %v461_v19, 0 }
 0x425   : > { %v814_v13 = vpop.eup %813 }
 0x426   : > { %v454_v14 = vsel %vm221_vm4, %v814_v13, 0.0 }
 0x427   : > { %455 = vadd.xlane.f32.xlu1 %v454_v14 }
 0x42d   : > { %v816_v15 = vpop.eup %815 }
 0x42e   : > { %v566_v16 = vsel %vm221_vm4, %v816_v15, 0.0 }
 0x42f   : > { %567 = vadd.xlane.f32.xlu1 %v566_v16 }
 0x440   : > { %572 = vrot.lane.b32.xlu1 %v714_v1, %s836_s20 }
 0x4ac   : > { %v341_v20 = vpop.xlane.xlu1 %340 }
 0x4ad   : > { %817 = vrcp.f32 %v341_v20 }
 0x4b4   : > { %v456_v21 = vpop.xlane.xlu1 %455 }
 0x4b5   : > { %819 = vrcp.f32 %v456_v21 }
 0x4b7   : > { %v818_v22 = vpop.eup %817 }
 0x4b8   : > { %v343_v23 = vmul.f32 %v818_v22, %v812_v8 }
 0x4ba   : > { %v344_v24 = vpack.c.bf16 %v343_v23, %v343_v23 }
 0x4bc   : > { %v568_v26 = vpop.xlane.xlu1 %567  ;;  %760 = vmatmul.mubr.msk.bf16.vlgmr.msra.gmra.mrb[4].mxu0 %vm221_vm4, %v344_v24 }
 0x4bd   : > { %821 = vrcp.f32 %v568_v26  ;;  %770 = vmatpush3.bf16.msra.mxu0 %v466_v25  ;;  %771 = vmatprep.mubr.msk.bf16.mxu0 %vm832_vm0, %v831_v0 }
 0x4be   : > { %781 = vmatprep.subr.bf16.mxu0 %v831_v0 }
 0x4bf   : > { %v820_v27 = vpop.eup %819 }
 0x4c0   : > { %v458_v28 = vmul.f32 %v820_v27, %v814_v13  ;;  %v573_v29 = vpop.permute.xlu1 %572 }
 0x4c1   : > { %v578_v30 = vsel %vm237_vm5, %v573_v29, 0 }
 0x4c2   : > { %v459_v31 = vpack.c.bf16 %v458_v28, %v458_v28 }
 0x4c4   : > { %772 = vmatmul.mubr.msk.bf16.vlgmr.msra.gmra.mrb[8].mxu0 %vm221_vm4, %v459_v31 }
 0x4c5   : > { %782 = vmatpush3.bf16.msra.mxu0 %v578_v30  ;;  %783 = vmatprep.mubr.msk.bf16.mxu0 %vm832_vm0, %v831_v0 }
 0x4c7   : > { %v822_v32 = vpop.eup %821 }
 0x4c8   : > { %v570_v33 = vmul.f32 %v822_v32, %v816_v15 }
 0x4ca   : > { %v571_v34 = vpack.c.bf16 %v570_v33, %v570_v33 }
 0x4cc   : > { %784 = vmatmul.mubr.msk.bf16.vlgmr.msra.gmra.mrb[12].mxu0 %vm221_vm4, %v571_v34 }
 0x58f   : > { %v390_v35 = vpop.f32.mrb[4].mxu0 }
 0x590   : > { %621 = vrot.lane.b32.xlu0 %v390_v35, %s840_s24  ;;  %v761_v36 = vpop.f32.mrb[5].mxu0 }
 0x591   : > { %v393_v37 = vpop.f32.mrb[6].mxu0 }
 0x592   : > { %v762_v38 = vpop.f32.mrb[7].mxu0 }
 0x597   : > { %v502_v40 = vpop.f32.mrb[8].mxu0 }
 0x598   : > { %625 = vrot.lane.b32.xlu1 %v502_v40, %s838_s22  ;;  %v773_v41 = vpop.f32.mrb[9].mxu0 }
 0x599   : > { %v505_v42 = vpop.f32.mrb[10].mxu0 }
 0x59a   : > { %v774_v43 = vpop.f32.mrb[11].mxu0 }
 0x59f   : > { %v614_v44 = vpop.f32.mrb[12].mxu0 }
 0x5a0   : > { %629 = vrot.lane.b32.xlu0 %v614_v44, %s834_s16  ;;  %v785_v0 = vpop.f32.mrb[13].mxu0 }
 0x5a1   : > { %v617_v45 = vpop.f32.mrb[14].mxu0 }
 0x5a2   : > { %v786_v46 = vpop.f32.mrb[15].mxu0 }
 0x602   : > { %v622_v47 = vpop.permute.xlu0 %621 }
 0x603   : > { %v632_v49 = vsel %vm165_vm1, %v922_v39, %v622_v47 }
 0x60a   : > { %v626_v48 = vpop.permute.xlu1 %625 }
 0x60b   : > { %v634_v50 = vsel %vm633_vm6, %v632_v49, %v626_v48 }
 0x612   : > { %v630_v51 = vpop.permute.xlu0 %629 }
 0x613   : > { %v636_v52 = vsel %vm635_vm7, %v634_v50, %v630_v51 }
 0x614   : > { %v637_v53 = vpack.c.bf16 %v636_v52, %v636_v52 }
 0x616   : > { %639 = vst.msk [vmem:[%s155_s28] sm:$0xf] %vm638_vm8, %v637_v53 }
 0x617 PF: > { %s12_s9 = sadd.s32 1, %s829_s9  }
 0x618   : > { %p9_p4 = scmp.ge.s32.totalorder %s12_s9, 4  }
 0x61a   :  { %11 = sbr.rel (!%p9_p4) target bundleno = 1 (0x1), region = 61 }

// kernel: run.21
= control target key start
LH: loop header
LB: loop body
LE: loop exit
PB: predicated region body
PF: predicated region fallthrough
CT: control target
= control target key end

     0   :  { %v162_v0 = vmov 0.0   ;;  %vm163_vm0 = vmmov 0   ;;  %vm62_vm1 = vcmask 523264   ;;  %s208_s1 = inlined_call_operand.vmem [shape: bf16[64,128], index: 1, kind: input, shape index: {}]   ;;  %s209_s0 = inlined_call_operand.vmem [shape: bf16[16,64], index: 0, kind: input, shape index: {}]   ;;  %s210_s2 = inlined_call_operand.vmem [shape: f32[1,128], index: 2, kind: input, shape index: {}]   ;;  %s211_s3 = inlined_call_operand.vmem [shape: f32[16,128], index: 3, kind: output, shape index: {}]  }
   0x1   :  { %143 = vmatprep.subr.bf16.mxu0 %v162_v0  ;;  %v157_v1 = vld [vmem:[%s208_s1] sm:$0xff]   ;;  %151 = vmatprep.mubr.msk.bf16.mxu0 %vm163_vm0, %v162_v0  ;;  %v158_v2 = vld [vmem:[%s208_s1 + $0x8] sm:$0xff]   ;;  %v159_v3 = vld [vmem:[%s208_s1 + $0x10] sm:$0xff]  }
   0x2   :  { %144 = vmatpush3.bf16.msra.mxu0 %v157_v1  ;;  %v160_v4 = vld [vmem:[%s208_s1 + $0x18] sm:$0xff]   ;;  %v161_v5 = vld [vmem:[%s209_s0] sm:$0xff]  }
   0x3   :  { %145 = vmatprep.subr.bf16.mxu0 %v162_v0  ;;  %v137_v6 = vld [vmem:[%s210_s2] ss:$0 sm:$0xff] }
   0x6   :  { %146 = vmatpush3.bf16.msra.mxu0 %v158_v2 }
   0x7   :  { %147 = vmatprep.subr.bf16.mxu0 %v162_v0 }
   0xa   :  { %148 = vmatpush3.bf16.msra.mxu0 %v159_v3 }
   0xb   :  { %149 = vmatprep.subr.bf16.mxu0 %v162_v0 }
   0xe   :  { %150 = vmatpush3.bf16.msra.mxu0 %v160_v4 }
  0x11   :  { %152 = vmatmul.mubr.msk.bf16.vlgmr.msra.gmra.mrb[0].mxu0 %vm62_vm1, %v161_v5 }
  0xe4   :  { %v100_v7 = vpop.f32.mrb[0].mxu0 }
  0xe5   :  { %v123_v8 = vadd.f32 %v137_v6, %v100_v7  ;;  %v153_v9 = vpop.f32.mrb[1].mxu0 }
  0xe6   :  { %v103_v10 = vpop.f32.mrb[2].mxu0 }
  0xe7   :  { %125 = vst [vmem:[%s211_s3] sm:$0xff] %v123_v8  ;;  %v124_v11 = vadd.f32 %v137_v6, %v103_v10  ;;  %v154_v12 = vpop.f32.mrb[3].mxu0 }
  0xe9   :  { %126 = vst [vmem:[%s211_s3 + $0x8] sm:$0xff] %v124_v11 }

// kernel: run.16
= control target key start
LH: loop header
LB: loop body
LE: loop exit
PB: predicated region body
PF: predicated region fallthrough
CT: control target
= control target key end

     0   :  { %v405_v0 = vmov 0.0   ;;  %vm406_vm0 = vmmov 0   ;;  %vm73_vm1 = vcmask 523264   ;;  %vm306_vm2 = vcmask 519168   ;;  %s514_s1 = inlined_call_operand.vmem [shape: bf16[64,128], index: 1, kind: input, shape index: {}]   ;;  %s515_s0 = inlined_call_operand.vmem [shape: bf16[16,64], index: 0, kind: input, shape index: {}]   ;;  %s516_s3 = inlined_call_operand.vmem [shape: bf16[128,64], index: 3, kind: input, shape index: {}]   ;;  %s517_s2 = inlined_call_operand.vmem [shape: f32[1,128], index: 2, kind: input, shape index: {}]   ;;  %s518_s4 = inlined_call_operand.vmem [shape: f32[1,64], index: 4, kind: input, shape index: {}]   ;;  %s519_s5 = inlined_call_operand.vmem [shape: f32[1,64], index: 5, kind: input, shape index: {}]   ;;  %s520_s6 = inlined_call_operand.vmem [shape: f32[1,64], index: 6, kind: input, shape index: {}]   ;;  %s521_s7 = inlined_call_operand.vmem [shape: bf16[16,64], index: 7, kind: output, shape index: {}]  }
   0x1   :  { %349 = vmatprep.subr.bf16.mxu0 %v405_v0  ;;  %v383_v1 = vld [vmem:[%s514_s1] sm:$0xff]   ;;  %357 = vmatprep.mubr.msk.bf16.mxu0 %vm406_vm0, %v405_v0  ;;  %v384_v2 = vld [vmem:[%s514_s1 + $0x8] sm:$0xff]   ;;  %v385_v3 = vld [vmem:[%s514_s1 + $0x10] sm:$0xff]  }
   0x2   :  { %361 = vmatprep.subr.bf16.mxu1 %v405_v0  ;;  %377 = vmatprep.mubr.msk.bf16.mxu1 %vm406_vm0, %v405_v0  ;;  %v386_v4 = vld [vmem:[%s514_s1 + $0x18] sm:$0xff]   ;;  %v462_v5 = vld [vmem:[%s515_s0] sm:$0xff]   ;;  %v389_v7 = vld [vmem:[%s516_s3 + $0x8] sm:$0xff]  }
   0x3   :  { %350 = vmatpush3.bf16.msra.mxu0 %v383_v1  ;;  %v388_v6 = vld [vmem:[%s516_s3] sm:$0xff]   ;;  %v390_v8 = vld [vmem:[%s516_s3 + $0x10] sm:$0xff]   ;;  %v391_v9 = vld [vmem:[%s516_s3 + $0x18] sm:$0xff]   ;;  %v249_v41 = vunpack.c.l.bf16 %v462_v5  ;;  %v250_v45 = vunpack.c.h.bf16 %v462_v5 }
   0x4   :  { %351 = vmatprep.subr.bf16.mxu0 %v405_v0  ;;  %362 = vmatpush3.bf16.msra.mxu1 %v388_v6  ;;  %v392_v10 = vld [vmem:[%s516_s3 + $0x20] sm:$0xff]   ;;  %v393_v11 = vld [vmem:[%s516_s3 + $0x28] sm:$0xff]   ;;  %v394_v12 = vld [vmem:[%s516_s3 + $0x30] sm:$0xff]  }
   0x5   :  { %363 = vmatprep.subr.bf16.mxu1 %v405_v0  ;;  %v395_v13 = vld [vmem:[%s516_s3 + $0x38] sm:$0xff]   ;;  %v313_v14 = vld [vmem:[%s517_s2] ss:$0 sm:$0xff] }
   0x6   :  { %v320_v40 = vld [vmem:[%s518_s4] ss:$0 sm:$0xff] }
   0x7   :  { %352 = vmatpush3.bf16.msra.mxu0 %v384_v2  ;;  %v329_v6 = vld [vmem:[%s519_s5] ss:$0 sm:$0xff] }
   0x8   :  { %353 = vmatprep.subr.bf16.mxu0 %v405_v0  ;;  %364 = vmatpush3.bf16.msra.mxu1 %v389_v7 }
   0x9   :  { %365 = vmatprep.subr.bf16.mxu1 %v405_v0 }
   0xb   :  { %354 = vmatpush3.bf16.msra.mxu0 %v385_v3 }
   0xc   :  { %355 = vmatprep.subr.bf16.mxu0 %v405_v0  ;;  %366 = vmatpush3.bf16.msra.mxu1 %v390_v8  ;;  %v330_v8 = vld [vmem:[%s520_s6] ss:$0 sm:$0xff] }
   0xd   :  { %367 = vmatprep.subr.bf16.mxu1 %v405_v0 }
   0xf   :  { %356 = vmatpush3.bf16.msra.mxu0 %v386_v4 }
  0x10   :  { %368 = vmatpush3.bf16.msra.mxu1 %v391_v9 }
  0x11   :  { %369 = vmatprep.subr.bf16.mxu1 %v405_v0 }
  0x12   :  { %358 = vmatmul.mubr.msk.bf16.vlgmr.msra.gmra.mrb[0].mxu0 %vm73_vm1, %v462_v5 }
  0x14   :  { %370 = vmatpush3.bf16.msra.mxu1 %v392_v10 }
  0x15   :  { %371 = vmatprep.subr.bf16.mxu1 %v405_v0 }
  0x18   :  { %372 = vmatpush3.bf16.msra.mxu1 %v393_v11 }
  0x19   :  { %373 = vmatprep.subr.bf16.mxu1 %v405_v0 }
  0x1c   :  { %374 = vmatpush3.bf16.msra.mxu1 %v394_v12 }
  0x1d   :  { %375 = vmatprep.subr.bf16.mxu1 %v405_v0 }
  0x20   :  { %376 = vmatpush3.bf16.msra.mxu1 %v395_v13 }
  0xe5   :  { %v111_v15 = vpop.f32.mrb[0].mxu0 }
  0xe6   :  { %v112_v16 = vadd.f32 %v313_v14, %v111_v15  ;;  %v359_v17 = vpop.f32.mrb[1].mxu0 }
  0xe7   :  { %v114_v18 = vpop.f32.mrb[2].mxu0 }
  0xe8   :  { %v120_v19 = vmul.f32 0.044715, %v112_v16  ;;  %v115_v20 = vadd.f32 %v313_v14, %v114_v18  ;;  %v360_v21 = vpop.f32.mrb[3].mxu0  ;;  %v118_v34 = vmul.f32 0.5, %v112_v16 }
  0xea   :  { %v122_v22 = vmul.f32 %v120_v19, %v112_v16  ;;  %v121_v23 = vmul.f32 0.044715, %v115_v20  ;;  %v119_v35 = vmul.f32 0.5, %v115_v20 }
  0xec   :  { %v124_v24 = vmul.f32 %v122_v22, %v112_v16  ;;  %v123_v25 = vmul.f32 %v121_v23, %v115_v20 }
  0xee   :  { %v125_v26 = vmul.f32 %v123_v25, %v115_v20  ;;  %v126_v27 = vadd.f32 %v124_v24, %v112_v16 }
  0xf0   :  { %v127_v28 = vadd.f32 %v125_v26, %v115_v20  ;;  %v128_v29 = vmul.f32 0.7978846, %v126_v27 }
  0xf2   :  { %v129_v30 = vmul.f32 0.7978846, %v127_v28  ;;  %397 = vtanh.f32 %v128_v29 }
  0xf4   :  { %399 = vtanh.f32 %v129_v30 }
  0xfc   :  { %v398_v31 = vpop.eup %397 }
  0xfd   :  { %v132_v32 = vadd.f32 1.0, %v398_v31 }
  0xfe   :  { %v400_v33 = vpop.eup %399 }
  0xff   :  { %v133_v36 = vadd.f32 1.0, %v400_v33  ;;  %v134_v37 = vmul.f32 %v132_v32, %v118_v34 }
 0x101   :  { %v135_v38 = vmul.f32 %v133_v36, %v119_v35 }
 0x103   :  { %v136_v39 = vpack.c.bf16 %v135_v38, %v134_v37 }
 0x105   :  { %378 = vmatmul.mubr.bf16.vlgmr.msra.gmra.mrb[0].mxu1 %v136_v39 }
 0x1d8   :  { %v242_v42 = vpop.f32.mrb[0].mxu1 }
 0x1d9   :  { %v243_v43 = vadd.f32 %v320_v40, %v242_v42  ;;  %v379_v44 = vpop.f32.mrb[1].mxu1 }
 0x1da   :  { %v245_v46 = vpop.f32.mrb[2].mxu1 }
 0x1db   :  { %v246_v47 = vadd.f32 %v320_v40, %v245_v46  ;;  %v380_v48 = vpop.f32.mrb[3].mxu1  ;;  %v251_v49 = vadd.f32 %v249_v41, %v243_v43 }
 0x1dd   :  { %v255_v50 = vsel %vm73_vm1, %v251_v49, 0.0  ;;  %v252_v51 = vadd.f32 %v250_v45, %v246_v47 }
 0x1de   :  { %256 = vadd.xlane.f32.xlu0 %v255_v50 }
 0x1df   :  { %v258_v52 = vsel %vm73_vm1, %v252_v51, 0.0 }
 0x1e2   :  { %259 = vadd.xlane.f32.xlu0 %v258_v52 }
 0x26b   :  { %v257_v53 = vpop.xlane.xlu0 %256 }
 0x26c   :  { %v262_v54 = vmul.f32 0.015625, %v257_v53 }
 0x26e   :  { %v264_v55 = vsub.f32 %v251_v49, %v262_v54 }
 0x26f   :  { %v260_v56 = vpop.xlane.xlu0 %259 }
 0x270   :  { %v263_v57 = vmul.f32 0.015625, %v260_v56  ;;  %v266_v58 = vmul.f32 %v264_v55, %v264_v55 }
 0x272   :  { %v265_v59 = vsub.f32 %v252_v51, %v263_v57  ;;  %v268_v60 = vsel %vm73_vm1, %v266_v58, 0.0 }
 0x273   :  { %269 = vadd.xlane.f32.xlu1 %v268_v60 }
 0x274   :  { %v267_v61 = vmul.f32 %v265_v59, %v265_v59 }
 0x276   :  { %v271_v62 = vsel %vm73_vm1, %v267_v61, 0.0 }
 0x277   :  { %272 = vadd.xlane.f32.xlu1 %v271_v62 }
 0x300   :  { %v270_v63 = vpop.xlane.xlu1 %269 }
 0x301   :  { %v274_v0 = vmul.f32 0.015625, %v270_v63 }
 0x303   :  { %v276_v1 = vadd.f32 1e-12, %v274_v0 }
 0x304   :  { %v273_v2 = vpop.xlane.xlu1 %272 }
 0x305   :  { %401 = vrsqrt.f32 %v276_v1  ;;  %v275_v3 = vmul.f32 0.015625, %v273_v2 }
 0x307   :  { %v277_v4 = vadd.f32 1e-12, %v275_v3 }
 0x309   :  { %403 = vrsqrt.f32 %v277_v4 }
 0x30f   :  { %v402_v5 = vpop.eup %401 }
 0x310   :  { %v280_v7 = vmul.f32 %v402_v5, %v264_v55 }
 0x312   :  { %v288_v9 = vmul.f32 %v329_v6, %v280_v7 }
 0x313   :  { %v404_v10 = vpop.eup %403 }
 0x314   :  { %v296_v11 = vadd.f32 %v330_v8, %v288_v9  ;;  %v281_v12 = vmul.f32 %v404_v10, %v265_v59 }
 0x316   :  { %v333_v13 = vpack.c.bf16 %v296_v11, %v296_v11  ;;  %v289_v14 = vmul.f32 %v329_v6, %v281_v12 }
 0x318   :  { %307 = vst.msk [vmem:[%s521_s7] sm:$0xf] %vm306_vm2, %v333_v13  ;;  %v297_v15 = vadd.f32 %v330_v8, %v289_v14 }
 0x31a   :  { %v334_v16 = vpack.c.bf16 %v297_v15, %v297_v15 }
 0x31c   :  { %308 = vst.msk [vmem:[%s521_s7 + $0x4] sm:$0xf] %vm306_vm2, %v334_v16 }

// kernel: run.23
= control target key start
LH: loop header
LB: loop body
LE: loop exit
PB: predicated region body
PF: predicated region fallthrough
CT: control target
= control target key end

     0   :  { %v374_v1 = vmov 0.0   ;;  %vm375_vm0 = vmmov 0   ;;  %s466_s0 = inlined_call_operand.vmem [shape: bf16[2,64], index: 0, kind: input, shape index: {}]   ;;  %s467_s1 = inlined_call_operand.vmem [shape: f32[2,32], index: 1, kind: input, shape index: {}]   ;;  %s468_s2 = inlined_call_operand.vmem [shape: bf16[64,128], index: 2, kind: input, shape index: {}]   ;;  %s469_s3 = inlined_call_operand.vmem [shape: f32[1,128], index: 3, kind: input, shape index: {}]   ;;  %s470_s4 = inlined_call_operand.vmem [shape: bf16[64,2], index: 4, kind: input, shape index: {}]   ;;  %s471_s5 = inlined_call_operand.vmem [shape: f32[1,2], index: 5, kind: input, shape index: {}]   ;;  %s472_s6 = inlined_call_operand.hbm [shape: f32[2,2], index: 6, kind: output, shape index: {}]  }
   0x1   :  { %v334_v0 = vld [vmem:[%s468_s2] sm:$0xff]   ;;  %300 = vmatprep.subr.bf16.mxu0 %v374_v1  ;;  %312 = vmatprep.subr.bf16.mxu1 %v374_v1  ;;  %v335_v2 = vld [vmem:[%s468_s2 + $0x8] sm:$0xff]   ;;  %v336_v3 = vld [vmem:[%s468_s2 + $0x10] sm:$0xff]  }
   0x2   :  { %301 = vmatpush3.bf16.msra.mxu0 %v334_v0  ;;  %308 = vmatprep.mubr.msk.bf16.mxu0 %vm375_vm0, %v374_v1 }
   0x3   :  { %302 = vmatprep.subr.bf16.mxu0 %v374_v1  ;;  %316 = vmatprep.mubr.msk.bf16.mxu1 %vm375_vm0, %v374_v1 }
   0x6   :  { %303 = vmatpush3.bf16.msra.mxu0 %v335_v2 }
   0x7   :  { %304 = vmatprep.subr.bf16.mxu0 %v374_v1 }
   0x8   :  { %11 = vsyncpa [#allocation3], 0  ;;  %v337_v4 = vld [vmem:[%s468_s2 + $0x18] sm:$0xff]   ;;  %v25_v5 = vld [vmem:[%s466_s0] sm:$0x1]  ;;  %vm65_vm1 = vcmask 523264  }
   0x9   :  { %v276_v6 = vld [vmem:[%s469_s3] ss:$0 sm:$0xff]  ;;  %s376_s2 = smov 64   ;;  %v338_v20 = vld [vmem:[%s470_s4 + $0x10] sm:$0xff]   ;;  %v339_v21 = vld [vmem:[%s470_s4 + $0x18] sm:$0xff]   ;;  %s377_s11 = smov 96  }
   0xa   :  { %305 = vmatpush3.bf16.msra.mxu0 %v336_v3  ;;  %313 = vmatpush3.bf16.msra.mxu1 %v338_v20  ;;  %s378_s12 = smov 32   ;;  %vm153_vm2 = vcmask 261120   ;;  %v340_v26 = vld [vmem:[%s470_s4] sm:$0xff]   ;;  %v341_v28 = vld [vmem:[%s470_s4 + $0x8] sm:$0xff]   ;;  %s379_s4 = smov [#allocation2]   ;;  %vm260_vm3 = vcmask 9216  }
   0xb   :  { %306 = vmatprep.subr.bf16.mxu0 %v374_v1  ;;  %314 = vmatprep.subr.bf16.mxu1 %v374_v1  ;;  %v127_v29 = vld [vmem:[%s467_s1] sm:$0x3]  ;;  %s268_s21 = sshll.u32 %s379_s4, 4  ;;  %s269_s21 = int_to_ptr.vmem [resolvable:$true] %s268_s21 }
   0xc   :  { %v128_v30 = vpack.c.bf16 %v127_v29, %v127_v29  ;;  %v288_v36 = vld [vmem:[%s471_s5] ss:$0 sm:$0xff]  ;;  %s350_s1 = scalar_lea.vmem %s269_s21, 32  ;;  %p355_p1 = scmp.lt.s32.totalorder %s269_s21, %s269_s21 }
   0xd   :  { %p351_p0 = scmp.ne.s32.totalorder %s269_s21, %s350_s1  ;;  %p356_p2 = scmp.lt.s32.totalorder %s350_s1, %s350_s1 }
   0xe   :  { %307 = vmatpush3.bf16.msra.mxu0 %v337_v4  ;;  %315 = vmatpush3.bf16.msra.mxu1 %v339_v21 }
   0xf   :  { %320 = vmatprep.subr.bf16.mxu1 %v374_v1  ;;  %p357_p3 = por %p356_p2, %p355_p1 }
  0x11   :  { %309 = vmatmul.mubr.msk.bf16.vlgmr.msra.gmra.mrb[0].mxu0 %vm65_vm1, %v25_v5  ;;  %p358_p4 = pnand %p357_p3, %p351_p0 }
  0xe4   :  { %v103_v7 = vpop.f32.mrb[0].mxu0 }
  0xe5   :  { %v104_v8 = vadd.f32 %v276_v6, %v103_v7  ;;  %v310_v9 = vpop.f32.mrb[1].mxu0 }
  0xe6   :  { %v106_v10 = vpop.f32.mrb[2].mxu0 }
  0xe7   :  { %342 = vtanh.f32 %v104_v8  ;;  %v311_v11 = vpop.f32.mrb[3].mxu0  ;;  %v109_v13 = vsub.f32 0.0, %v104_v8 }
  0xe9   :  { %v110_v14 = vmul.f32 1.442695, %v109_v13 }
  0xeb   :  { %344 = vpow2.f32 %v110_v14 }
  0xf1   :  { %v343_v12 = vpop.eup %342 }
  0xf2   :  { %117 = vrot.lane.b32.xlu0 %v343_v12, %s376_s2 }
  0xf5   :  { %v345_v15 = vpop.eup %344 }
  0xf6   :  { %v112_v16 = vadd.f32 1.0, %v345_v15 }
  0xf8   :  { %346 = vrcp.f32 %v112_v16 }
 0x102   :  { %v347_v17 = vpop.eup %346 }
 0x164   :  { %v118_v18 = vpop.permute.xlu0 %117 }
 0x165   :  { %v120_v19 = vmul.f32 %v347_v17, %v118_v18 }
 0x167   :  { %348 = vtanh.f32 %v120_v19 }
 0x171   :  { %v349_v22 = vpop.eup %348 }
 0x172   :  { %123 = vrot.lane.b32.xlu0 %v349_v22, %s377_s11 }
 0x1e4   :  { %v124_v23 = vpop.permute.xlu0 %123 }
 0x1e5   :  { %v126_v24 = vmul.f32 %v347_v17, %v124_v23 }
 0x1e7   :  { %v133_v25 = vpack.c.bf16 %v126_v24, %v126_v24 }
 0x1e9   :  { %139 = vrot.lane.b32.xlu1 %v133_v25, %s378_s12 }
 0x25b   :  { %v140_v27 = vpop.permute.xlu1 %139 }
 0x25c   :  { %317 = vmatmul.mubr.msk.bf16.vlgmr.msra.gmra.mrb[0].mxu1 %vm153_vm2, %v140_v27 }
 0x25d   :  { %321 = vmatpush3.bf16.msra.mxu1 %v340_v26  ;;  %324 = vmatprep.mubr.msk.bf16.mxu1 %vm375_vm0, %v374_v1 }
 0x25e   :  { %322 = vmatprep.subr.bf16.mxu1 %v374_v1 }
 0x261   :  { %323 = vmatpush3.bf16.msra.mxu1 %v341_v28 }
 0x264   :  { %325 = vmatmul.mubr.msk.bf16.vlgmr.msra.gmra.mrb[4].mxu1 %vm153_vm2, %v128_v30 }
 0x32f   :  { %v191_v31 = vpop.f32.mrb[0].mxu1 }
 0x330   :  { %v318_v32 = vpop.f32.mrb[1].mxu1 }
 0x331   :  { %v194_v33 = vpop.f32.mrb[2].mxu1 }
 0x332   :  { %v319_v34 = vpop.f32.mrb[3].mxu1 }
 0x337   :  { %v246_v35 = vpop.f32.mrb[4].mxu1 }
 0x338   :  { %v247_v37 = vadd.f32 %v246_v35, %v191_v31  ;;  %v326_v38 = vpop.f32.mrb[5].mxu1 }
 0x339   :  { %v249_v39 = vpop.f32.mrb[6].mxu1 }
 0x33a   :  { %v259_v40 = vadd.f32 %v288_v36, %v247_v37  ;;  %v327_v41 = vpop.f32.mrb[7].mxu1 }
 0x33c   :  { %261 = vst.msk [vmem:[#allocation2] sm:$0x3] %vm260_vm3, %v259_v40 }
 0x33d   :  { %361 = shalt.err (!%p358_p4)
}
 0x33e   :  { %s362_s5 = scalar_lea.hbm %s472_s6, 32 }
 0x33f   :  { %p363_p5 = scmp.ne.s32.totalorder %s472_s6, %s362_s5  ;;  %p366_p6 = scmp.lt.u32.totalorder %s362_s5, %s472_s6 }
 0x341   :  { %p368_p7 = pnand %p366_p6, %p363_p5 }
 0x343   :  { %371 = shalt.err (!%p368_p7)
}
 0x344   :  { %271 = dma.vmem_to_hbm [thread:$0]  %s269_s21, 32, %s472_s6, [#allocation3]  }
 0x345   :  { %372 = dma.done.wait [#allocation3], 32  }
 0x346   :  { %373 = vsyncadd [#allocation3], 4294967264 }
 0x347   :  { %275 = vsyncpa [#allocation3], 1 }

// kernel: run.22
= control target key start
LH: loop header
LB: loop body
LE: loop exit
PB: predicated region body
PF: predicated region fallthrough
CT: control target
= control target key end

     0   :  { %vm16_vm0 = vcmask 254976   ;;  %v1222_v0 = vmov 0.0   ;;  %vm1223_vm1 = vmmov 0   ;;  %vm40_vm2 = vcmask 261120   ;;  %s1225_s17 = smov 64   ;;  %s1444_s1 = inlined_call_operand.vmem [shape: bf16[32,128], index: 1, kind: input, shape index: {}]   ;;  %s1445_s0 = inlined_call_operand.vmem [shape: f32[2,8,128], index: 0, kind: input, shape index: {}]   ;;  %s1446_s2 = inlined_call_operand.vmem [shape: f32[2,32], index: 2, kind: output, shape index: {}]  }
   0x1   :  { %1023 = vmatprep.subr.bf16.mxu0 %v1222_v0  ;;  %v1246_v1 = vld [vmem:[%s1444_s1] sm:$0xff]   ;;  %1027 = vmatprep.mubr.msk.bf16.mxu0 %vm1223_vm1, %v1222_v0  ;;  %17 = vst.msk [vmem:[#allocation2] sm:$0x3] %vm16_vm0, %v1222_v0  ;;  %18 = vst.msk [vmem:[#allocation3] sm:$0x3] %vm16_vm0, %v1222_v0  ;;  %v1259_v2 = vld [vmem:[%s1444_s1 + $0x8] sm:$0xff]  }
   0x2   :  { %1031 = vmatprep.subr.bf16.mxu1 %v1222_v0  ;;  %1035 = vmatprep.mubr.msk.bf16.mxu1 %vm1223_vm1, %v1222_v0  ;;  %s1224_s1 = smov 32   ;;  %v1280_v7 = vld [vmem:[%s1445_s0 + $0x8] sm:$0xff]  ;;  %v1285_v11 = vld [vmem:[%s1445_s0] sm:$0xff]  ;;  %vm153_vm3 = vcmask 1041409   ;;  %s1226_s0 = smov 96   ;;  %vm965_vm4 = vcmask 261127  }
   0x3   :  { %1024 = vmatpush3.bf16.msra.mxu0 %v1246_v1  ;;  %1032 = vmatpush3.bf16.msra.mxu1 %v1246_v1  ;;  %vm967_vm5 = vcmask 253952  }
   0x4   :  { %1025 = vmatprep.subr.bf16.mxu0 %v1222_v0  ;;  %1033 = vmatprep.subr.bf16.mxu1 %v1222_v0 }
   0x7   :  { %1026 = vmatpush3.bf16.msra.mxu0 %v1259_v2  ;;  %1034 = vmatpush3.bf16.msra.mxu1 %v1259_v2 }
   0x8   :  { %v19_v3 = vld [vmem:[#allocation2] sm:$0x3]  ;;  %v20_v4 = vld [vmem:[#allocation3] sm:$0x3]  ;;  %1039 = vmatprep.subr.bf16.mxu0 %v1222_v0  ;;  %1047 = vmatprep.subr.bf16.mxu1 %v1222_v0 }
   0x9   :  { %v27_v5 = vpack.c.bf16 %v19_v3, %v19_v3  ;;  %v105_v6 = vrot.slane %v20_v4, 1 }
   0xb   :  { %1028 = vmatmul.mubr.msk.bf16.vlgmr.msra.gmra.mrb[0].mxu0 %vm40_vm2, %v27_v5  ;;  %108 = vrot.lane.b32.xlu1 %v105_v6, %s1224_s1 }
   0xc   :  { %1040 = vmatpush3.bf16.msra.mxu0 %v1246_v1  ;;  %1043 = vmatprep.mubr.msk.bf16.mxu0 %vm1223_vm1, %v1222_v0 }
   0xd   :  { %1041 = vmatprep.subr.bf16.mxu0 %v1222_v0 }
   0xf   :  { %106 = vrot.lane.b32.xlu1 %v20_v4, %s1224_s1 }
  0x10   :  { %1042 = vmatpush3.bf16.msra.mxu0 %v1259_v2 }
  0x11   :  { %1055 = vmatprep.subr.bf16.mxu0 %v1222_v0 }
  0x7d   :  { %v109_v32 = vpop.permute.xlu1 %108 }
  0x81   :  { %v107_v34 = vpop.permute.xlu1 %106 }
  0xde   :  { %v78_v8 = vpop.f32.mrb[0].mxu0 }
  0xdf   :  { %v85_v9 = vrot.slane %v78_v8, 1  ;;  %v1029_v10 = vpop.f32.mrb[1].mxu0  ;;  %v88_v15 = vadd.f32 %v78_v8, %v1285_v11 }
  0xe0   :  { %v81_v12 = vpop.f32.mrb[2].mxu0 }
  0xe1   :  { %v89_v13 = vadd.f32 %v85_v9, %v1280_v7  ;;  %v1030_v14 = vpop.f32.mrb[3].mxu0  ;;  %v90_v19 = vsub.f32 0.0, %v88_v15 }
  0xe3   :  { %1094 = vtanh.f32 %v89_v13  ;;  %v91_v18 = vsub.f32 0.0, %v89_v13  ;;  %v92_v21 = vmul.f32 1.442695, %v90_v19 }
  0xe4   :  { %1096 = vtanh.f32 %v88_v15 }
  0xe5   :  { %v94_v20 = vmul.f32 1.442695, %v91_v18 }
  0xe7   :  { %1098 = vpow2.f32 %v94_v20 }
  0xe8   :  { %1100 = vpow2.f32 %v92_v21 }
  0xed   :  { %v1095_v16 = vpop.eup %1094 }
  0xee   :  { %118 = vrot.lane.b32.xlu0 %v1095_v16, %s1225_s17  ;;  %v1097_v17 = vpop.eup %1096 }
  0xf1   :  { %v1099_v22 = vpop.eup %1098 }
  0xf2   :  { %116 = vrot.lane.b32.xlu0 %v1097_v17, %s1225_s17  ;;  %v97_v23 = vadd.f32 1.0, %v1099_v22  ;;  %v1101_v24 = vpop.eup %1100 }
  0xf3   :  { %v96_v25 = vadd.f32 1.0, %v1101_v24 }
  0xf4   :  { %1102 = vrcp.f32 %v97_v23 }
  0xf5   :  { %1104 = vrcp.f32 %v96_v25 }
  0xfe   :  { %v1103_v26 = vpop.eup %1102 }
  0xff   :  { %v1105_v29 = vpop.eup %1104  ;;  %v113_v33 = vmul.f32 %v1103_v26, %v109_v32 }
 0x100   :  { %v112_v37 = vmul.f32 %v1105_v29, %v107_v34 }
 0x160   :  { %v119_v27 = vpop.permute.xlu0 %118 }
 0x161   :  { %v123_v28 = vmul.f32 %v1103_v26, %v119_v27 }
 0x163   :  { %128 = vrot.lane.b32.xlu0 %v123_v28, %s1224_s1 }
 0x164   :  { %v117_v30 = vpop.permute.xlu0 %116 }
 0x165   :  { %v122_v31 = vmul.f32 %v1105_v29, %v117_v30 }
 0x167   :  { %126 = vrot.lane.b32.xlu1 %v122_v31, %s1224_s1 }
 0x1d5   :  { %v129_v35 = vpop.permute.xlu0 %128 }
 0x1d6   :  { %v1293_v36 = vadd.f32 %v129_v35, %v113_v33 }
 0x1d8   :  { %1106 = vtanh.f32 %v1293_v36  ;;  %v224_v18 = vrot.slane %v1293_v36, 7 }
 0x1d9   :  { %v127_v38 = vpop.permute.xlu1 %126 }
 0x1da   :  { %v1296_v39 = vadd.f32 %v127_v38, %v112_v37 }
 0x1dc   :  { %1108 = vtanh.f32 %v1296_v39  ;;  %v223_v19 = vrot.slane %v1296_v39, 7 }
 0x1e2   :  { %v1107_v40 = vpop.eup %1106 }
 0x1e3   :  { %140 = vrot.lane.b32.xlu0 %v1107_v40, %s1225_s17 }
 0x1e6   :  { %v1109_v41 = vpop.eup %1108 }
 0x1e7   :  { %138 = vrot.lane.b32.xlu1 %v1109_v41, %s1225_s17 }
 0x255   :  { %v141_v42 = vpop.permute.xlu0 %140 }
 0x256   :  { %v145_v43 = vmul.f32 %v1103_v26, %v141_v42 }
 0x258   :  { %v147_v44 = vpack.c.bf16 %v145_v43, %v145_v43 }
 0x259   :  { %v139_v45 = vpop.permute.xlu1 %138 }
 0x25a   :  { %v151_v46 = vunpack.c.l.b16 %v147_v44  ;;  %v144_v47 = vmul.f32 %v1105_v29, %v139_v45 }
 0x25c   :  { %v146_v48 = vpack.c.bf16 %v144_v47, %v144_v47  ;;  %v152_v49 = vrot.slane %v151_v46, 7 }
 0x25e   :  { %v150_v50 = vunpack.c.l.b16 %v146_v48 }
 0x260   :  { %v154_v51 = vsel %vm153_vm3, %v152_v49, %v150_v50 }
 0x261   :  { %v155_v52 = vpack.c.b16 %v154_v51, %v154_v51 }
 0x263   :  { %156 = vrot.lane.b32.xlu0 %v155_v52, %s1224_s1 }
 0x2d5   :  { %v157_v53 = vpop.permute.xlu0 %156 }
 0x2d6   :  { %1036 = vmatmul.mubr.msk.bf16.vlgmr.msra.gmra.mrb[0].mxu1 %vm40_vm2, %v157_v53 }
 0x2d7   :  { %1048 = vmatpush3.bf16.msra.mxu1 %v1246_v1  ;;  %1051 = vmatprep.mubr.msk.bf16.mxu1 %vm1223_vm1, %v1222_v0 }
 0x2d8   :  { %1049 = vmatprep.subr.bf16.mxu1 %v1222_v0 }
 0x2db   :  { %1050 = vmatpush3.bf16.msra.mxu1 %v1259_v2 }
 0x2dc   :  { %1063 = vmatprep.subr.bf16.mxu1 %v1222_v0 }
 0x3a9   :  { %v195_v54 = vpop.f32.mrb[0].mxu1 }
 0x3aa   :  { %v202_v55 = vrot.slane %v195_v54, 7  ;;  %v206_v56 = vadd.f32 %v195_v54, %v1280_v7  ;;  %v1037_v57 = vpop.f32.mrb[1].mxu1 }
 0x3ab   :  { %v198_v58 = vpop.f32.mrb[2].mxu1 }
 0x3ac   :  { %v205_v59 = vadd.f32 %v202_v55, %v1285_v11  ;;  %1110 = vtanh.f32 %v206_v56  ;;  %v1038_v60 = vpop.f32.mrb[3].mxu1  ;;  %v208_v63 = vsub.f32 0.0, %v206_v56 }
 0x3ae   :  { %1112 = vtanh.f32 %v205_v59  ;;  %v207_v3 = vsub.f32 0.0, %v205_v59  ;;  %v211_v4 = vmul.f32 1.442695, %v208_v63 }
 0x3b0   :  { %v209_v5 = vmul.f32 1.442695, %v207_v3  ;;  %1114 = vpow2.f32 %v211_v4 }
 0x3b2   :  { %1116 = vpow2.f32 %v209_v5 }
 0x3b6   :  { %v1111_v61 = vpop.eup %1110 }
 0x3b7   :  { %233 = vrot.lane.b32.xlu0 %v1111_v61, %s1225_s17 }
 0x3b8   :  { %v1113_v62 = vpop.eup %1112 }
 0x3b9   :  { %231 = vrot.lane.b32.xlu1 %v1113_v62, %s1225_s17 }
 0x3ba   :  { %v1115_v6 = vpop.eup %1114 }
 0x3bb   :  { %v214_v9 = vadd.f32 1.0, %v1115_v6 }
 0x3bc   :  { %v1117_v8 = vpop.eup %1116 }
 0x3bd   :  { %v213_v10 = vadd.f32 1.0, %v1117_v8  ;;  %1118 = vrcp.f32 %v214_v9 }
 0x3bf   :  { %1120 = vrcp.f32 %v213_v10 }
 0x3c7   :  { %v1119_v12 = vpop.eup %1118 }
 0x3c8   :  { %v228_v20 = vmul.f32 %v1119_v12, %v224_v18 }
 0x3c9   :  { %v1121_v15 = vpop.eup %1120 }
 0x3ca   :  { %v227_v23 = vmul.f32 %v1121_v15, %v223_v19 }
 0x429   :  { %v234_v13 = vpop.permute.xlu0 %233 }
 0x42a   :  { %v238_v14 = vmul.f32 %v1119_v12, %v234_v13 }
 0x42b   :  { %v232_v16 = vpop.permute.xlu1 %231 }
 0x42c   :  { %v237_v17 = vmul.f32 %v1121_v15, %v232_v16  ;;  %243 = vrot.lane.b32.xlu0 %v238_v14, %s1224_s1 }
 0x42e   :  { %241 = vrot.lane.b32.xlu1 %v237_v17, %s1224_s1 }
 0x49e   :  { %v244_v21 = vpop.permute.xlu0 %243 }
 0x49f   :  { %v1318_v22 = vadd.f32 %v244_v21, %v228_v20 }
 0x4a0   :  { %v242_v24 = vpop.permute.xlu1 %241 }
 0x4a1   :  { %1122 = vtanh.f32 %v1318_v22  ;;  %v247_v25 = vadd.f32 %v242_v24, %v227_v23  ;;  %v339_v4 = vrot.slane %v1318_v22, 7 }
 0x4a3   :  { %1124 = vtanh.f32 %v247_v25  ;;  %v338_v3 = vrot.slane %v247_v25, 7 }
 0x4ab   :  { %v1123_v26 = vpop.eup %1122 }
 0x4ac   :  { %255 = vrot.lane.b32.xlu0 %v1123_v26, %s1225_s17 }
 0x4ad   :  { %v1125_v27 = vpop.eup %1124 }
 0x4ae   :  { %253 = vrot.lane.b32.xlu1 %v1125_v27, %s1225_s17 }
 0x51e   :  { %v256_v28 = vpop.permute.xlu0 %255 }
 0x51f   :  { %v260_v29 = vmul.f32 %v1119_v12, %v256_v28 }
 0x520   :  { %v254_v30 = vpop.permute.xlu1 %253 }
 0x521   :  { %v259_v31 = vmul.f32 %v1121_v15, %v254_v30  ;;  %v262_v32 = vpack.c.bf16 %v260_v29, %v260_v29 }
 0x523   :  { %v261_v33 = vpack.c.bf16 %v259_v31, %v259_v31  ;;  %v266_v35 = vunpack.c.l.b16 %v262_v32 }
 0x525   :  { %v265_v34 = vunpack.c.l.b16 %v261_v33 }
 0x527   :  { %v267_v36 = vrot.slane %v265_v34, 1 }
 0x529   :  { %v268_v37 = vsel %vm153_vm3, %v266_v35, %v267_v36 }
 0x52a   :  { %v269_v38 = vpack.c.b16 %v268_v37, %v268_v37 }
 0x52c   :  { %270 = vrot.lane.b32.xlu1 %v269_v38, %s1224_s1 }
 0x59e   :  { %v271_v39 = vpop.permute.xlu1 %270 }
 0x59f   :  { %1044 = vmatmul.mubr.msk.bf16.vlgmr.msra.gmra.mrb[4].mxu0 %vm40_vm2, %v271_v39 }
 0x5a0   :  { %1056 = vmatpush3.bf16.msra.mxu0 %v1246_v1  ;;  %1059 = vmatprep.mubr.msk.bf16.mxu0 %vm1223_vm1, %v1222_v0 }
 0x5a1   :  { %1057 = vmatprep.subr.bf16.mxu0 %v1222_v0 }
 0x5a4   :  { %1058 = vmatpush3.bf16.msra.mxu0 %v1259_v2 }
 0x5a5   :  { %1071 = vmatprep.subr.bf16.mxu0 %v1222_v0 }
 0x672   :  { %v309_v40 = vpop.f32.mrb[4].mxu0 }
 0x673   :  { %v316_v41 = vrot.slane %v309_v40, 6  ;;  %v317_v42 = vrot.slane %v309_v40, 7  ;;  %v1045_v43 = vpop.f32.mrb[5].mxu0 }
 0x674   :  { %v312_v44 = vpop.f32.mrb[6].mxu0 }
 0x675   :  { %v320_v45 = vadd.f32 %v316_v41, %v1285_v11  ;;  %v321_v46 = vadd.f32 %v317_v42, %v1280_v7  ;;  %v1046_v47 = vpop.f32.mrb[7].mxu0 }
 0x677   :  { %1126 = vtanh.f32 %v320_v45  ;;  %v322_v50 = vsub.f32 0.0, %v320_v45  ;;  %v323_v51 = vsub.f32 0.0, %v321_v46 }
 0x678   :  { %1128 = vtanh.f32 %v321_v46 }
 0x679   :  { %v324_v52 = vmul.f32 1.442695, %v322_v50  ;;  %v326_v53 = vmul.f32 1.442695, %v323_v51 }
 0x67b   :  { %1130 = vpow2.f32 %v324_v52 }
 0x67c   :  { %1132 = vpow2.f32 %v326_v53 }
 0x681   :  { %v1127_v48 = vpop.eup %1126 }
 0x682   :  { %v1129_v49 = vpop.eup %1128  ;;  %346 = vrot.lane.b32.xlu0 %v1127_v48, %s1225_s17 }
 0x683   :  { %348 = vrot.lane.b32.xlu1 %v1129_v49, %s1225_s17 }
 0x685   :  { %v1131_v54 = vpop.eup %1130 }
 0x686   :  { %v1133_v55 = vpop.eup %1132  ;;  %v328_v56 = vadd.f32 1.0, %v1131_v54 }
 0x687   :  { %v329_v57 = vadd.f32 1.0, %v1133_v55 }
 0x688   :  { %1134 = vrcp.f32 %v328_v56 }
 0x689   :  { %1136 = vrcp.f32 %v329_v57 }
 0x692   :  { %v1135_v58 = vpop.eup %1134 }
 0x693   :  { %v1137_v60 = vpop.eup %1136  ;;  %v342_v5 = vmul.f32 %v1135_v58, %v338_v3 }
 0x694   :  { %v343_v6 = vmul.f32 %v1137_v60, %v339_v4 }
 0x6f4   :  { %v347_v59 = vpop.permute.xlu0 %346 }
 0x6f5   :  { %v349_v61 = vpop.permute.xlu1 %348  ;;  %v352_v62 = vmul.f32 %v1135_v58, %v347_v59 }
 0x6f6   :  { %v353_v63 = vmul.f32 %v1137_v60, %v349_v61 }
 0x6f7   :  { %356 = vrot.lane.b32.xlu0 %v352_v62, %s1224_s1 }
 0x6f8   :  { %358 = vrot.lane.b32.xlu1 %v353_v63, %s1224_s1 }
 0x769   :  { %v357_v8 = vpop.permute.xlu0 %356 }
 0x76a   :  { %v359_v9 = vpop.permute.xlu1 %358  ;;  %v1339_v10 = vadd.f32 %v357_v8, %v342_v5 }
 0x76b   :  { %v1341_v12 = vadd.f32 %v359_v9, %v343_v6 }
 0x76c   :  { %1138 = vtanh.f32 %v1339_v10  ;;  %v454_v52 = vrot.slane %v1339_v10, 7 }
 0x76d   :  { %1140 = vtanh.f32 %v1341_v12  ;;  %v455_v53 = vrot.slane %v1341_v12, 7 }
 0x776   :  { %v1139_v13 = vpop.eup %1138 }
 0x777   :  { %v1141_v14 = vpop.eup %1140  ;;  %368 = vrot.lane.b32.xlu0 %v1139_v13, %s1225_s17 }
 0x778   :  { %370 = vrot.lane.b32.xlu1 %v1141_v14, %s1225_s17 }
 0x7e9   :  { %v369_v15 = vpop.permute.xlu0 %368 }
 0x7ea   :  { %v371_v16 = vpop.permute.xlu1 %370  ;;  %v374_v17 = vmul.f32 %v1135_v58, %v369_v15 }
 0x7eb   :  { %v375_v18 = vmul.f32 %v1137_v60, %v371_v16 }
 0x7ec   :  { %v376_v19 = vpack.c.bf16 %v374_v17, %v374_v17 }
 0x7ed   :  { %v377_v20 = vpack.c.bf16 %v375_v18, %v375_v18 }
 0x7ee   :  { %v380_v21 = vunpack.c.l.b16 %v376_v19 }
 0x7ef   :  { %v381_v22 = vunpack.c.l.b16 %v377_v20 }
 0x7f0   :  { %v382_v23 = vrot.slane %v380_v21, 2 }
 0x7f1   :  { %v383_v24 = vrot.slane %v381_v22, 1 }
 0x7f3   :  { %v384_v25 = vsel %vm153_vm3, %v383_v24, %v382_v23 }
 0x7f4   :  { %v385_v26 = vpack.c.b16 %v384_v25, %v384_v25 }
 0x7f6   :  { %386 = vrot.lane.b32.xlu0 %v385_v26, %s1224_s1 }
 0x868   :  { %v387_v27 = vpop.permute.xlu0 %386 }
 0x869   :  { %1052 = vmatmul.mubr.msk.bf16.vlgmr.msra.gmra.mrb[4].mxu1 %vm40_vm2, %v387_v27 }
 0x86a   :  { %1064 = vmatpush3.bf16.msra.mxu1 %v1246_v1  ;;  %1067 = vmatprep.mubr.msk.bf16.mxu1 %vm1223_vm1, %v1222_v0 }
 0x86b   :  { %1065 = vmatprep.subr.bf16.mxu1 %v1222_v0 }
 0x86e   :  { %1066 = vmatpush3.bf16.msra.mxu1 %v1259_v2 }
 0x86f   :  { %1079 = vmatprep.subr.bf16.mxu1 %v1222_v0 }
 0x93c   :  { %v425_v28 = vpop.f32.mrb[4].mxu1 }
 0x93d   :  { %v432_v29 = vrot.slane %v425_v28, 5  ;;  %v433_v30 = vrot.slane %v425_v28, 6  ;;  %v1053_v31 = vpop.f32.mrb[5].mxu1 }
 0x93e   :  { %v428_v32 = vpop.f32.mrb[6].mxu1 }
 0x93f   :  { %v436_v33 = vadd.f32 %v432_v29, %v1285_v11  ;;  %v437_v34 = vadd.f32 %v433_v30, %v1280_v7  ;;  %v1054_v35 = vpop.f32.mrb[7].mxu1 }
 0x941   :  { %1142 = vtanh.f32 %v436_v33  ;;  %v438_v38 = vsub.f32 0.0, %v436_v33  ;;  %v439_v39 = vsub.f32 0.0, %v437_v34 }
 0x942   :  { %1144 = vtanh.f32 %v437_v34 }
 0x943   :  { %v440_v40 = vmul.f32 1.442695, %v438_v38  ;;  %v442_v41 = vmul.f32 1.442695, %v439_v39 }
 0x945   :  { %1146 = vpow2.f32 %v440_v40 }
 0x946   :  { %1148 = vpow2.f32 %v442_v41 }
 0x94b   :  { %v1143_v36 = vpop.eup %1142 }
 0x94c   :  { %v1145_v37 = vpop.eup %1144  ;;  %462 = vrot.lane.b32.xlu1 %v1143_v36, %s1225_s17 }
 0x94d   :  { %464 = vrot.lane.b32.xlu0 %v1145_v37, %s1225_s17 }
 0x94f   :  { %v1147_v42 = vpop.eup %1146 }
 0x950   :  { %v1149_v43 = vpop.eup %1148  ;;  %v444_v44 = vadd.f32 1.0, %v1147_v42 }
 0x951   :  { %v445_v45 = vadd.f32 1.0, %v1149_v43 }
 0x952   :  { %1150 = vrcp.f32 %v444_v44 }
 0x953   :  { %1152 = vrcp.f32 %v445_v45 }
 0x95c   :  { %v1151_v46 = vpop.eup %1150 }
 0x95d   :  { %v1153_v48 = vpop.eup %1152  ;;  %v458_v54 = vmul.f32 %v1151_v46, %v454_v52 }
 0x95e   :  { %v459_v55 = vmul.f32 %v1153_v48, %v455_v53 }
 0x9be   :  { %v463_v47 = vpop.permute.xlu1 %462 }
 0x9bf   :  { %v465_v49 = vpop.permute.xlu0 %464  ;;  %v468_v50 = vmul.f32 %v1151_v46, %v463_v47 }
 0x9c0   :  { %v469_v51 = vmul.f32 %v1153_v48, %v465_v49 }
 0x9c1   :  { %472 = vrot.lane.b32.xlu1 %v468_v50, %s1224_s1 }
 0x9c2   :  { %474 = vrot.lane.b32.xlu0 %v469_v51, %s1224_s1 }
 0xa33   :  { %v473_v56 = vpop.permute.xlu1 %472 }
 0xa34   :  { %v475_v57 = vpop.permute.xlu0 %474  ;;  %v1364_v58 = vadd.f32 %v473_v56, %v458_v54 }
 0xa35   :  { %v1366_v59 = vadd.f32 %v475_v57, %v459_v55 }
 0xa36   :  { %1154 = vtanh.f32 %v1364_v58  ;;  %v570_v40 = vrot.slane %v1364_v58, 7 }
 0xa37   :  { %1156 = vtanh.f32 %v1366_v59  ;;  %v571_v41 = vrot.slane %v1366_v59, 7 }
 0xa40   :  { %v1155_v60 = vpop.eup %1154 }
 0xa41   :  { %v1157_v61 = vpop.eup %1156  ;;  %484 = vrot.lane.b32.xlu1 %v1155_v60, %s1225_s17 }
 0xa42   :  { %486 = vrot.lane.b32.xlu0 %v1157_v61, %s1225_s17 }
 0xab3   :  { %v485_v62 = vpop.permute.xlu1 %484 }
 0xab4   :  { %v487_v63 = vpop.permute.xlu0 %486  ;;  %v490_v3 = vmul.f32 %v1151_v46, %v485_v62 }
 0xab5   :  { %v491_v4 = vmul.f32 %v1153_v48, %v487_v63 }
 0xab6   :  { %v492_v5 = vpack.c.bf16 %v490_v3, %v490_v3 }
 0xab7   :  { %v493_v6 = vpack.c.bf16 %v491_v4, %v491_v4 }
 0xab8   :  { %v496_v8 = vunpack.c.l.b16 %v492_v5 }
 0xab9   :  { %v497_v9 = vunpack.c.l.b16 %v493_v6 }
 0xaba   :  { %v498_v10 = vrot.slane %v496_v8, 3 }
 0xabb   :  { %v499_v12 = vrot.slane %v497_v9, 2 }
 0xabd   :  { %v500_v13 = vsel %vm153_vm3, %v499_v12, %v498_v10 }
 0xabe   :  { %v501_v14 = vpack.c.b16 %v500_v13, %v500_v13 }
 0xac0   :  { %502 = vrot.lane.b32.xlu1 %v501_v14, %s1224_s1 }
 0xb32   :  { %v503_v15 = vpop.permute.xlu1 %502 }
 0xb33   :  { %1060 = vmatmul.mubr.msk.bf16.vlgmr.msra.gmra.mrb[8].mxu0 %vm40_vm2, %v503_v15 }
 0xb34   :  { %1072 = vmatpush3.bf16.msra.mxu0 %v1246_v1  ;;  %1075 = vmatprep.mubr.msk.bf16.mxu0 %vm1223_vm1, %v1222_v0 }
 0xb35   :  { %1073 = vmatprep.subr.bf16.mxu0 %v1222_v0 }
 0xb38   :  { %1074 = vmatpush3.bf16.msra.mxu0 %v1259_v2 }
 0xc06   :  { %v541_v16 = vpop.f32.mrb[8].mxu0 }
 0xc07   :  { %v548_v17 = vrot.slane %v541_v16, 4  ;;  %v549_v18 = vrot.slane %v541_v16, 5  ;;  %v1061_v19 = vpop.f32.mrb[9].mxu0 }
 0xc08   :  { %v544_v20 = vpop.f32.mrb[10].mxu0 }
 0xc09   :  { %v552_v21 = vadd.f32 %v548_v17, %v1285_v11  ;;  %v553_v22 = vadd.f32 %v549_v18, %v1280_v7  ;;  %v1062_v23 = vpop.f32.mrb[11].mxu0 }
 0xc0b   :  { %1158 = vtanh.f32 %v552_v21  ;;  %v554_v26 = vsub.f32 0.0, %v552_v21  ;;  %v555_v27 = vsub.f32 0.0, %v553_v22 }
 0xc0c   :  { %1160 = vtanh.f32 %v553_v22 }
 0xc0d   :  { %v556_v28 = vmul.f32 1.442695, %v554_v26  ;;  %v558_v29 = vmul.f32 1.442695, %v555_v27 }
 0xc0f   :  { %1162 = vpow2.f32 %v556_v28 }
 0xc10   :  { %1164 = vpow2.f32 %v558_v29 }
 0xc15   :  { %v1159_v24 = vpop.eup %1158 }
 0xc16   :  { %v1161_v25 = vpop.eup %1160  ;;  %578 = vrot.lane.b32.xlu0 %v1159_v24, %s1225_s17 }
 0xc17   :  { %580 = vrot.lane.b32.xlu1 %v1161_v25, %s1225_s17 }
 0xc19   :  { %v1163_v30 = vpop.eup %1162 }
 0xc1a   :  { %v1165_v31 = vpop.eup %1164  ;;  %v560_v32 = vadd.f32 1.0, %v1163_v30 }
 0xc1b   :  { %v561_v33 = vadd.f32 1.0, %v1165_v31 }
 0xc1c   :  { %1166 = vrcp.f32 %v560_v32 }
 0xc1d   :  { %1168 = vrcp.f32 %v561_v33 }
 0xc26   :  { %v1167_v34 = vpop.eup %1166 }
 0xc27   :  { %v1169_v36 = vpop.eup %1168  ;;  %v574_v42 = vmul.f32 %v1167_v34, %v570_v40 }
 0xc28   :  { %v575_v43 = vmul.f32 %v1169_v36, %v571_v41 }
 0xc88   :  { %v579_v35 = vpop.permute.xlu0 %578 }
 0xc89   :  { %v581_v37 = vpop.permute.xlu1 %580  ;;  %v584_v38 = vmul.f32 %v1167_v34, %v579_v35 }
 0xc8a   :  { %v585_v39 = vmul.f32 %v1169_v36, %v581_v37 }
 0xc8b   :  { %588 = vrot.lane.b32.xlu0 %v584_v38, %s1224_s1 }
 0xc8c   :  { %590 = vrot.lane.b32.xlu1 %v585_v39, %s1224_s1 }
 0xcfd   :  { %v589_v44 = vpop.permute.xlu0 %588 }
 0xcfe   :  { %v591_v45 = vpop.permute.xlu1 %590  ;;  %v1388_v46 = vadd.f32 %v589_v44, %v574_v42 }
 0xcff   :  { %v1390_v47 = vadd.f32 %v591_v45, %v575_v43 }
 0xd00   :  { %1170 = vtanh.f32 %v1388_v46  ;;  %v686_v25 = vrot.slane %v1388_v46, 7 }
 0xd01   :  { %1172 = vtanh.f32 %v1390_v47  ;;  %v687_v26 = vrot.slane %v1390_v47, 7 }
 0xd0a   :  { %v1171_v48 = vpop.eup %1170 }
 0xd0b   :  { %v1173_v49 = vpop.eup %1172  ;;  %600 = vrot.lane.b32.xlu0 %v1171_v48, %s1225_s17 }
 0xd0c   :  { %602 = vrot.lane.b32.xlu1 %v1173_v49, %s1225_s17 }
 0xd7d   :  { %v601_v50 = vpop.permute.xlu0 %600 }
 0xd7e   :  { %v603_v51 = vpop.permute.xlu1 %602  ;;  %v606_v52 = vmul.f32 %v1167_v34, %v601_v50 }
 0xd7f   :  { %v607_v53 = vmul.f32 %v1169_v36, %v603_v51 }
 0xd80   :  { %v608_v54 = vpack.c.bf16 %v606_v52, %v606_v52 }
 0xd81   :  { %v609_v55 = vpack.c.bf16 %v607_v53, %v607_v53 }
 0xd82   :  { %v612_v56 = vunpack.c.l.b16 %v608_v54 }
 0xd83   :  { %v613_v57 = vunpack.c.l.b16 %v609_v55 }
 0xd84   :  { %v614_v58 = vrot.slane %v612_v56, 4 }
 0xd85   :  { %v615_v59 = vrot.slane %v613_v57, 3 }
 0xd87   :  { %v616_v60 = vsel %vm153_vm3, %v615_v59, %v614_v58 }
 0xd88   :  { %v617_v61 = vpack.c.b16 %v616_v60, %v616_v60 }
 0xd8a   :  { %618 = vrot.lane.b32.xlu0 %v617_v61, %s1224_s1 }
 0xdfc   :  { %v619_v62 = vpop.permute.xlu0 %618 }
 0xdfd   :  { %1068 = vmatmul.mubr.msk.bf16.vlgmr.msra.gmra.mrb[8].mxu1 %vm40_vm2, %v619_v62 }
 0xdfe   :  { %1080 = vmatpush3.bf16.msra.mxu1 %v1246_v1  ;;  %1083 = vmatprep.mubr.msk.bf16.mxu1 %vm1223_vm1, %v1222_v0 }
 0xdff   :  { %1081 = vmatprep.subr.bf16.mxu1 %v1222_v0 }
 0xe02   :  { %1082 = vmatpush3.bf16.msra.mxu1 %v1259_v2 }
 0xed0   :  { %v657_v63 = vpop.f32.mrb[8].mxu1 }
 0xed1   :  { %v664_v3 = vrot.slane %v657_v63, 3  ;;  %v665_v4 = vrot.slane %v657_v63, 4  ;;  %v1069_v5 = vpop.f32.mrb[9].mxu1 }
 0xed2   :  { %v660_v6 = vpop.f32.mrb[10].mxu1 }
 0xed3   :  { %v668_v8 = vadd.f32 %v664_v3, %v1285_v11  ;;  %v669_v9 = vadd.f32 %v665_v4, %v1280_v7  ;;  %v1070_v10 = vpop.f32.mrb[11].mxu1 }
 0xed5   :  { %1174 = vtanh.f32 %v668_v8  ;;  %v670_v0 = vsub.f32 0.0, %v668_v8  ;;  %v671_v2 = vsub.f32 0.0, %v669_v9 }
 0xed6   :  { %1176 = vtanh.f32 %v669_v9 }
 0xed7   :  { %v672_v13 = vmul.f32 1.442695, %v670_v0  ;;  %v674_v14 = vmul.f32 1.442695, %v671_v2 }
 0xed9   :  { %1178 = vpow2.f32 %v672_v13 }
 0xeda   :  { %1180 = vpow2.f32 %v674_v14 }
 0xedf   :  { %v1175_v1 = vpop.eup %1174 }
 0xee0   :  { %v1177_v12 = vpop.eup %1176  ;;  %694 = vrot.lane.b32.xlu1 %v1175_v1, %s1225_s17 }
 0xee1   :  { %696 = vrot.lane.b32.xlu0 %v1177_v12, %s1225_s17 }
 0xee3   :  { %v1179_v15 = vpop.eup %1178 }
 0xee4   :  { %v1181_v16 = vpop.eup %1180  ;;  %v676_v17 = vadd.f32 1.0, %v1179_v15 }
 0xee5   :  { %v677_v18 = vadd.f32 1.0, %v1181_v16 }
 0xee6   :  { %1182 = vrcp.f32 %v676_v17 }
 0xee7   :  { %1184 = vrcp.f32 %v677_v18 }
 0xef0   :  { %v1183_v19 = vpop.eup %1182 }
 0xef1   :  { %v1185_v21 = vpop.eup %1184  ;;  %v690_v27 = vmul.f32 %v1183_v19, %v686_v25 }
 0xef2   :  { %v691_v28 = vmul.f32 %v1185_v21, %v687_v26 }
 0xf52   :  { %v695_v20 = vpop.permute.xlu1 %694 }
 0xf53   :  { %v697_v22 = vpop.permute.xlu0 %696  ;;  %v700_v23 = vmul.f32 %v1183_v19, %v695_v20 }
 0xf54   :  { %v701_v24 = vmul.f32 %v1185_v21, %v697_v22 }
 0xf55   :  { %704 = vrot.lane.b32.xlu1 %v700_v23, %s1224_s1 }
 0xf56   :  { %706 = vrot.lane.b32.xlu0 %v701_v24, %s1224_s1 }
 0xfc7   :  { %v705_v29 = vpop.permute.xlu1 %704 }
 0xfc8   :  { %v707_v30 = vpop.permute.xlu0 %706  ;;  %v710_v31 = vadd.f32 %v705_v29, %v690_v27 }
 0xfc9   :  { %v711_v32 = vadd.f32 %v707_v30, %v691_v28 }
 0xfca   :  { %1186 = vtanh.f32 %v710_v31  ;;  %v802_v12 = vrot.slane %v710_v31, 7 }
 0xfcb   :  { %1188 = vtanh.f32 %v711_v32  ;;  %v803_v0 = vrot.slane %v711_v32, 7 }
 0xfd4   :  { %v1187_v33 = vpop.eup %1186 }
 0xfd5   :  { %v1189_v34 = vpop.eup %1188  ;;  %716 = vrot.lane.b32.xlu1 %v1187_v33, %s1225_s17 }
 0xfd6   :  { %718 = vrot.lane.b32.xlu0 %v1189_v34, %s1225_s17 }
0x1047   :  { %v717_v35 = vpop.permute.xlu1 %716 }
0x1048   :  { %v719_v36 = vpop.permute.xlu0 %718  ;;  %v722_v37 = vmul.f32 %v1183_v19, %v717_v35 }
0x1049   :  { %v723_v38 = vmul.f32 %v1185_v21, %v719_v36 }
0x104a   :  { %v724_v39 = vpack.c.bf16 %v722_v37, %v722_v37 }
0x104b   :  { %v725_v40 = vpack.c.bf16 %v723_v38, %v723_v38 }
0x104c   :  { %v728_v41 = vunpack.c.l.b16 %v724_v39 }
0x104d   :  { %v729_v42 = vunpack.c.l.b16 %v725_v40 }
0x104e   :  { %v730_v43 = vrot.slane %v728_v41, 5 }
0x104f   :  { %v731_v44 = vrot.slane %v729_v42, 4 }
0x1051   :  { %v732_v45 = vsel %vm153_vm3, %v731_v44, %v730_v43 }
0x1052   :  { %v733_v46 = vpack.c.b16 %v732_v45, %v732_v45 }
0x1054   :  { %734 = vrot.lane.b32.xlu1 %v733_v46, %s1224_s1 }
0x10c6   :  { %v735_v47 = vpop.permute.xlu1 %734 }
0x10c7   :  { %1076 = vmatmul.mubr.msk.bf16.vlgmr.msra.gmra.mrb[12].mxu0 %vm40_vm2, %v735_v47 }
0x119a   :  { %v773_v48 = vpop.f32.mrb[12].mxu0 }
0x119b   :  { %v780_v49 = vrot.slane %v773_v48, 2  ;;  %v781_v50 = vrot.slane %v773_v48, 3  ;;  %v1077_v51 = vpop.f32.mrb[13].mxu0 }
0x119c   :  { %v776_v52 = vpop.f32.mrb[14].mxu0 }
0x119d   :  { %v784_v53 = vadd.f32 %v780_v49, %v1285_v11  ;;  %v785_v54 = vadd.f32 %v781_v50, %v1280_v7  ;;  %v1078_v55 = vpop.f32.mrb[15].mxu0 }
0x119f   :  { %1190 = vtanh.f32 %v784_v53  ;;  %v786_v58 = vsub.f32 0.0, %v784_v53  ;;  %v787_v59 = vsub.f32 0.0, %v785_v54 }
0x11a0   :  { %1192 = vtanh.f32 %v785_v54 }
0x11a1   :  { %v788_v60 = vmul.f32 1.442695, %v786_v58  ;;  %v790_v61 = vmul.f32 1.442695, %v787_v59 }
0x11a3   :  { %1194 = vpow2.f32 %v788_v60 }
0x11a4   :  { %1196 = vpow2.f32 %v790_v61 }
0x11a9   :  { %v1191_v56 = vpop.eup %1190 }
0x11aa   :  { %v1193_v57 = vpop.eup %1192  ;;  %810 = vrot.lane.b32.xlu0 %v1191_v56, %s1225_s17 }
0x11ab   :  { %812 = vrot.lane.b32.xlu1 %v1193_v57, %s1225_s17 }
0x11ad   :  { %v1195_v62 = vpop.eup %1194 }
0x11ae   :  { %v1197_v63 = vpop.eup %1196  ;;  %v792_v3 = vadd.f32 1.0, %v1195_v62 }
0x11af   :  { %v793_v4 = vadd.f32 1.0, %v1197_v63 }
0x11b0   :  { %1198 = vrcp.f32 %v792_v3 }
0x11b1   :  { %1200 = vrcp.f32 %v793_v4 }
0x11ba   :  { %v1199_v5 = vpop.eup %1198 }
0x11bb   :  { %v1201_v8 = vpop.eup %1200  ;;  %v806_v2 = vmul.f32 %v1199_v5, %v802_v12 }
0x11bc   :  { %v807_v13 = vmul.f32 %v1201_v8, %v803_v0 }
0x121c   :  { %v811_v6 = vpop.permute.xlu0 %810 }
0x121d   :  { %v813_v9 = vpop.permute.xlu1 %812  ;;  %v816_v10 = vmul.f32 %v1199_v5, %v811_v6 }
0x121e   :  { %v817_v1 = vmul.f32 %v1201_v8, %v813_v9 }
0x121f   :  { %820 = vrot.lane.b32.xlu0 %v816_v10, %s1224_s1 }
0x1220   :  { %822 = vrot.lane.b32.xlu1 %v817_v1, %s1224_s1 }
0x1291   :  { %v821_v14 = vpop.permute.xlu0 %820 }
0x1292   :  { %v823_v15 = vpop.permute.xlu1 %822  ;;  %v826_v16 = vadd.f32 %v821_v14, %v806_v2 }
0x1293   :  { %v827_v17 = vadd.f32 %v823_v15, %v807_v13 }
0x1294   :  { %1202 = vtanh.f32 %v826_v16  ;;  %v918_v55 = vrot.slane %v826_v16, 7 }
0x1295   :  { %1204 = vtanh.f32 %v827_v17  ;;  %v919_v56 = vrot.slane %v827_v17, 7 }
0x129e   :  { %v1203_v18 = vpop.eup %1202 }
0x129f   :  { %v1205_v19 = vpop.eup %1204  ;;  %832 = vrot.lane.b32.xlu0 %v1203_v18, %s1225_s17 }
0x12a0   :  { %834 = vrot.lane.b32.xlu1 %v1205_v19, %s1225_s17 }
0x1311   :  { %v833_v20 = vpop.permute.xlu0 %832 }
0x1312   :  { %v835_v21 = vpop.permute.xlu1 %834  ;;  %v838_v22 = vmul.f32 %v1199_v5, %v833_v20 }
0x1313   :  { %v839_v23 = vmul.f32 %v1201_v8, %v835_v21 }
0x1314   :  { %v840_v24 = vpack.c.bf16 %v838_v22, %v838_v22 }
0x1315   :  { %v841_v25 = vpack.c.bf16 %v839_v23, %v839_v23 }
0x1316   :  { %v844_v26 = vunpack.c.l.b16 %v840_v24 }
0x1317   :  { %v845_v27 = vunpack.c.l.b16 %v841_v25 }
0x1318   :  { %v846_v28 = vrot.slane %v844_v26, 6 }
0x1319   :  { %v847_v29 = vrot.slane %v845_v27, 5 }
0x131b   :  { %v848_v30 = vsel %vm153_vm3, %v847_v29, %v846_v28 }
0x131c   :  { %v849_v31 = vpack.c.b16 %v848_v30, %v848_v30 }
0x131e   :  { %850 = vrot.lane.b32.xlu0 %v849_v31, %s1224_s1 }
0x1390   :  { %v851_v32 = vpop.permute.xlu0 %850 }
0x1391   :  { %1084 = vmatmul.mubr.msk.bf16.vlgmr.msra.gmra.mrb[12].mxu1 %vm40_vm2, %v851_v32 }
0x1464   :  { %v889_v33 = vpop.f32.mrb[12].mxu1 }
0x1465   :  { %v896_v34 = vrot.slane %v889_v33, 1  ;;  %v897_v35 = vrot.slane %v889_v33, 2  ;;  %v1085_v36 = vpop.f32.mrb[13].mxu1 }
0x1466   :  { %v892_v37 = vpop.f32.mrb[14].mxu1 }
0x1467   :  { %v900_v38 = vadd.f32 %v896_v34, %v1285_v11  ;;  %v901_v39 = vadd.f32 %v897_v35, %v1280_v7  ;;  %v1086_v40 = vpop.f32.mrb[15].mxu1 }
0x1469   :  { %1206 = vtanh.f32 %v900_v38  ;;  %v902_v43 = vsub.f32 0.0, %v900_v38  ;;  %v903_v44 = vsub.f32 0.0, %v901_v39 }
0x146a   :  { %1208 = vtanh.f32 %v901_v39 }
0x146b   :  { %v904_v45 = vmul.f32 1.442695, %v902_v43  ;;  %v906_v46 = vmul.f32 1.442695, %v903_v44 }
0x146d   :  { %1210 = vpow2.f32 %v904_v45 }
0x146e   :  { %1212 = vpow2.f32 %v906_v46 }
0x1473   :  { %v1207_v41 = vpop.eup %1206 }
0x1474   :  { %v1209_v42 = vpop.eup %1208  ;;  %926 = vrot.lane.b32.xlu0 %v1207_v41, %s1225_s17 }
0x1475   :  { %928 = vrot.lane.b32.xlu1 %v1209_v42, %s1225_s17 }
0x1477   :  { %v1211_v47 = vpop.eup %1210 }
0x1478   :  { %v1213_v48 = vpop.eup %1212  ;;  %v908_v11 = vadd.f32 1.0, %v1211_v47 }
0x1479   :  { %v909_v49 = vadd.f32 1.0, %v1213_v48 }
0x147a   :  { %1214 = vrcp.f32 %v908_v11 }
0x147b   :  { %1216 = vrcp.f32 %v909_v49 }
0x1484   :  { %v1215_v7 = vpop.eup %1214 }
0x1485   :  { %v1217_v51 = vpop.eup %1216  ;;  %v922_v57 = vmul.f32 %v1215_v7, %v918_v55 }
0x1486   :  { %v923_v58 = vmul.f32 %v1217_v51, %v919_v56 }
0x14e6   :  { %v927_v50 = vpop.permute.xlu0 %926 }
0x14e7   :  { %v929_v52 = vpop.permute.xlu1 %928  ;;  %v932_v53 = vmul.f32 %v1215_v7, %v927_v50 }
0x14e8   :  { %v933_v54 = vmul.f32 %v1217_v51, %v929_v52 }
0x14e9   :  { %936 = vrot.lane.b32.xlu0 %v932_v53, %s1224_s1 }
0x14ea   :  { %938 = vrot.lane.b32.xlu1 %v933_v54, %s1224_s1 }
0x155b   :  { %v937_v59 = vpop.permute.xlu0 %936 }
0x155c   :  { %v939_v60 = vpop.permute.xlu1 %938  ;;  %v942_v61 = vadd.f32 %v937_v59, %v922_v57 }
0x155d   :  { %v943_v62 = vadd.f32 %v939_v60, %v923_v58 }
0x155e   :  { %1218 = vtanh.f32 %v942_v61 }
0x155f   :  { %1220 = vtanh.f32 %v943_v62  ;;  %v971_v10 = vrot.slane %v943_v62, 7 }
0x1568   :  { %v1219_v63 = vpop.eup %1218 }
0x1569   :  { %v1221_v3 = vpop.eup %1220  ;;  %948 = vrot.lane.b32.xlu0 %v1219_v63, %s1225_s17 }
0x156a   :  { %950 = vrot.lane.b32.xlu1 %v1221_v3, %s1225_s17 }
0x15db   :  { %v949_v4 = vpop.permute.xlu0 %948 }
0x15dc   :  { %v951_v5 = vpop.permute.xlu1 %950  ;;  %v954_v6 = vmul.f32 %v1215_v7, %v949_v4 }
0x15dd   :  { %v955_v8 = vmul.f32 %v1217_v51, %v951_v5 }
0x15de   :  { %959 = vrot.lane.b32.xlu1 %v954_v6, %s1224_s1 }
0x15df   :  { %v958_v9 = vrot.slane %v955_v8, 7 }
0x15e1   :  { %961 = vrot.lane.b32.xlu0 %v958_v9, %s1224_s1 }
0x15e2   :  { %972 = vrot.lane.b32.xlu1 %v942_v61, %s1226_s0 }
0x15e5   :  { %974 = vrot.lane.b32.xlu0 %v971_v10, %s1226_s0 }
0x1650   :  { %v960_v1 = vpop.permute.xlu1 %959 }
0x1651   :  { %966 = vst.msk [vmem:[#allocation2 - $0x7] sm:$0x80] %vm965_vm4, %v960_v1  ;;  %983 = vst.msk [vmem:[%s1446_s2 - $0x7] sm:$0x80] %vm965_vm4, %v960_v1 }
0x1653   :  { %v962_v12 = vpop.permute.xlu0 %961 }
0x1654   :  { %968 = vst.msk [vmem:[#allocation2 + $0x1] sm:$0x1] %vm967_vm5, %v962_v12  ;;  %984 = vst.msk [vmem:[%s1446_s2 + $0x1] sm:$0x1] %vm967_vm5, %v962_v12  ;;  %v973_v0 = vpop.permute.xlu1 %972 }
0x1655   :  { %978 = vst.msk [vmem:[#allocation3 - $0x7] sm:$0x80] %vm965_vm4, %v973_v0 }
0x1657   :  { %v975_v2 = vpop.permute.xlu0 %974 }
0x1658   :  { %979 = vst.msk [vmem:[#allocation3 + $0x1] sm:$0x1] %vm967_vm5, %v975_v2 }

</bundles_post_ra>
